<compile_context>
chip_gen: v6e
topology: v6e:2x2x1
jax: 0.10.0
libtpu: 0.0.40
codegen_flags: <defaults>
</compile_context>

<pallas_src>
import jax
import jax.numpy as jnp
from jax import lax
from jax.experimental import pallas as pl
from jax.experimental.pallas import tpu as pltpu

# ----------------------------- model config (module defaults) ----------------
CIN = 256            # input_channels
CH = 256             # hidden conv channels
NUM_CLUSTERS = 8
NC_PAD = 128         # logits padded to a full lane group (sliced to 8 outside)
N_CONV = 6           # ConvNormRelu stack: 1 + 5
KSIZE = 3            # ConvNormRelu default kernel_size (stride=1, pad=1)
LRELU_SLOPE = 0.2
BN_EPS = 1e-5


# ----------------------------- fused Pallas kernel ---------------------------
def _fused_kernel(x_ref, nf_ref, nl_ref, *rest):
    """Whole ClusterClassifyGAN forward for the flattened (B*T, C) token matrix.

    rest = [w_prev, w_mid, w_next, bias] * N_CONV + [w_logits_pad, b_logits_pad] + [o_ref]
    """
    o_ref = rest[-1]
    wr = rest[:-1]

    h = x_ref[...]                      # (N, CIN), N = B*T
    not_first = nf_ref[...]             # (N, 1): 0.0 on the first frame of each item
    not_last = nl_ref[...]              # (N, 1): 0.0 on the last frame of each item
    N = h.shape[0]

    def conv_bn_lrelu(h, w_prev, w_mid, w_next, b):
        # k=3, stride=1, pad=1 temporal conv as three shifted MXU matmuls.
        # pltpu.roll wraps across batch boundaries, but those rows are zeroed
        # by the masks, which is exactly the conv zero padding.
        h_prev = pltpu.roll(h, shift=1, axis=0) * not_first        # x[t-1]
        h_next = pltpu.roll(h, shift=N - 1, axis=0) * not_last     # x[t+1]
        y = (jnp.dot(h_prev, w_prev, preferred_element_type=jnp.float32)
             + jnp.dot(h, w_mid, preferred_element_type=jnp.float32)
             + jnp.dot(h_next, w_next, preferred_element_type=jnp.float32)
             + b)
        # BatchNorm is folded into (w, b); Dropout(p=0) is identity; LeakyReLU(0.2):
        return jnp.where(y >= 0.0, y, LRELU_SLOPE * y)

    for i in range(N_CONV):
        w0 = wr[4 * i + 0][...]
        w1 = wr[4 * i + 1][...]
        w2 = wr[4 * i + 2][...]
        b = wr[4 * i + 3][...]
        h = conv_bn_lrelu(h, w0, w1, w2, b)

    wl = wr[4 * N_CONV + 0][...]        # (CH, NC_PAD), zero-padded beyond NUM_CLUSTERS
    bl = wr[4 * N_CONV + 1][...]        # (1, NC_PAD)
    o_ref[...] = jnp.dot(h, wl, preferred_element_type=jnp.float32) + bl


def cluster_classify_forward(x_bct, folded):
    """x: (B, C, T) float32 -> (logits (B, T, NUM_CLUSTERS), []) like the module."""
    B, C, T = x_bct.shape
    assert C == CIN
    N = B * T

    # Layout plumbing in the wrapper: channels-last, batch flattened into tokens.
    x_flat = jnp.transpose(x_bct, (0, 2, 1)).reshape(N, C)

    # Per-row conv-boundary masks (zero out the wrapped rows of the roll).
    t_idx = jnp.tile(jnp.arange(T, dtype=jnp.int32), B)
    not_first = (t_idx != 0).astype(jnp.float32)[:, None]          # (N, 1)
    not_last = (t_idx != T - 1).astype(jnp.float32)[:, None]       # (N, 1)

    def full_spec(shape):
        return pl.BlockSpec(shape, lambda i: (0, 0))

    args = [x_flat, not_first, not_last]
    in_specs = [full_spec(x_flat.shape), full_spec(not_first.shape),
                full_spec(not_last.shape)]
    for lp in folded["conv"]:
        for a in (lp["w0"], lp["w1"], lp["w2"], lp["b"]):
            args.append(a)
            in_specs.append(full_spec(a.shape))
    for a in (folded["wl_pad"], folded["bl_pad"]):
        args.append(a)
        in_specs.append(full_spec(a.shape))

    out = pl.pallas_call(
        _fused_kernel,
        out_shape=jax.ShapeDtypeStruct((N, NC_PAD), jnp.float32),
        grid=(1,),
        in_specs=in_specs,
        out_specs=pl.BlockSpec((N, NC_PAD), lambda i: (0, 0)),
        compiler_params=pltpu.CompilerParams(dimension_semantics=("arbitrary",)),
    )(*args)

    logits = out.reshape(B, T, NC_PAD)[:, :, :NUM_CLUSTERS]
    return logits, []


# ----------------------------- parameters ------------------------------------
def init_params(key):
    ks = iter(jax.random.split(key, 8 * (N_CONV + 1)))

    def nrm(shape, scale):
        return scale * jax.random.normal(next(ks), shape, jnp.float32)

    layers = []
    cin = CIN
    for _ in range(N_CONV):
        layers.append({
            "W": nrm((CH, cin, KSIZE), 0.05),          # torch Conv1d weight (O, I, K)
            "b": nrm((CH,), 0.02),
            "bn_g": 1.0 + nrm((CH,), 0.05),
            "bn_b": nrm((CH,), 0.05),
            "bn_mean": nrm((CH,), 0.05),
            "bn_var": 1.0 + 0.1 * jnp.abs(jax.random.normal(next(ks), (CH,), jnp.float32)),
        })
        cin = CH
    logits = {"W": nrm((NUM_CLUSTERS, CH, 1), 0.05), "b": nrm((NUM_CLUSTERS,), 0.02)}
    return {"conv": layers, "logits": logits}


def fold_params(params):
    """Fold eval-mode BatchNorm into the conv weights and lay weights out (in, out)."""
    folded_layers = []
    for lp in params["conv"]:
        s = lp["bn_g"] / jnp.sqrt(lp["bn_var"] + BN_EPS)             # (CH,)
        Wf = lp["W"] * s[:, None, None]                               # (O, I, K)
        bf = lp["b"] * s + lp["bn_b"] - lp["bn_mean"] * s             # (CH,)
        folded_layers.append({
            "w0": jnp.transpose(Wf[:, :, 0]),     # tap applied to x[t-1]
            "w1": jnp.transpose(Wf[:, :, 1]),     # tap applied to x[t]
            "w2": jnp.transpose(Wf[:, :, 2]),     # tap applied to x[t+1]
            "b": bf[None, :],                     # (1, CH)
        })
    Wl = jnp.transpose(params["logits"]["W"][:, :, 0])                # (CH, NUM_CLUSTERS)
    wl_pad = jnp.zeros((CH, NC_PAD), jnp.float32).at[:, :NUM_CLUSTERS].set(Wl)
    bl_pad = jnp.zeros((1, NC_PAD), jnp.float32).at[0, :NUM_CLUSTERS].set(params["logits"]["b"])
    return {"conv": folded_layers, "wl_pad": wl_pad, "bl_pad": bl_pad}


# ----------------------------- pure-JAX reference ----------------------------
def _ref_forward(x_bct, params):
    h = x_bct
    for lp in params["conv"]:
        y = lax.conv_general_dilated(
            h, lp["W"], window_strides=(1,), padding=((1, 1),),
            dimension_numbers=("NCH", "OIH", "NCH"),
            precision=lax.Precision.HIGHEST,
        ) + lp["b"][None, :, None]
        # Dropout(p=0) is identity; BatchNorm1d (eval mode, running stats):
        inv = 1.0 / jnp.sqrt(lp["bn_var"] + BN_EPS)
        y = ((y - lp["bn_mean"][None, :, None]) * inv[None, :, None]
             * lp["bn_g"][None, :, None] + lp["bn_b"][None, :, None])
        h = jnp.where(y >= 0.0, y, LRELU_SLOPE * y)
    Wl = params["logits"]["W"][:, :, 0]                               # (O, I)
    logits = jnp.einsum("oi,bit->bot", Wl, h,
                        precision=lax.Precision.HIGHEST) + params["logits"]["b"][None, :, None]
    return jnp.transpose(logits, (0, 2, 1))                           # (B, T, num_clusters)


# ----------------------------------- main -------------------------------------
if __name__ == "__main__":
    key = jax.random.PRNGKey(0)
    kx, kp = jax.random.split(key)

    B, T = 2, 16
    x = jax.random.normal(kx, (B, CIN, T), jnp.float32)      # module input (B, C, T)
    y_unused = jnp.zeros((B, T), jnp.float32)                 # forward's `y` arg is unused

    params = init_params(kp)
    folded = fold_params(params)

    out, extra = cluster_classify_forward(x, folded)
    out = jax.block_until_ready(out)

    assert out.shape == (B, T, NUM_CLUSTERS)
    assert extra == []

    ref = _ref_forward(x, params)
    max_err = float(jnp.max(jnp.abs(out - ref)))
    tol = 2e-2 * (float(jnp.max(jnp.abs(ref))) + 1.0)
    assert max_err < tol, f"kernel/reference mismatch: {max_err} (tol {tol})"

    print("KERNEL_OK")
</pallas_src>

<mosaic_0001>
module attributes {stable_mosaic.version = 11 : i64} {
  func.func @_fused_kernel(%arg0: i32, %arg1: memref<32x256xf32, #tpu.memory_space<vmem>>, %arg2: memref<32x1xf32, #tpu.memory_space<vmem>>, %arg3: memref<32x1xf32, #tpu.memory_space<vmem>>, %arg4: memref<256x256xf32, #tpu.memory_space<vmem>>, %arg5: memref<256x256xf32, #tpu.memory_space<vmem>>, %arg6: memref<256x256xf32, #tpu.memory_space<vmem>>, %arg7: memref<1x256xf32, #tpu.memory_space<vmem>>, %arg8: memref<256x256xf32, #tpu.memory_space<vmem>>, %arg9: memref<256x256xf32, #tpu.memory_space<vmem>>, %arg10: memref<256x256xf32, #tpu.memory_space<vmem>>, %arg11: memref<1x256xf32, #tpu.memory_space<vmem>>, %arg12: memref<256x256xf32, #tpu.memory_space<vmem>>, %arg13: memref<256x256xf32, #tpu.memory_space<vmem>>, %arg14: memref<256x256xf32, #tpu.memory_space<vmem>>, %arg15: memref<1x256xf32, #tpu.memory_space<vmem>>, %arg16: memref<256x256xf32, #tpu.memory_space<vmem>>, %arg17: memref<256x256xf32, #tpu.memory_space<vmem>>, %arg18: memref<256x256xf32, #tpu.memory_space<vmem>>, %arg19: memref<1x256xf32, #tpu.memory_space<vmem>>, %arg20: memref<256x256xf32, #tpu.memory_space<vmem>>, %arg21: memref<256x256xf32, #tpu.memory_space<vmem>>, %arg22: memref<256x256xf32, #tpu.memory_space<vmem>>, %arg23: memref<1x256xf32, #tpu.memory_space<vmem>>, %arg24: memref<256x256xf32, #tpu.memory_space<vmem>>, %arg25: memref<256x256xf32, #tpu.memory_space<vmem>>, %arg26: memref<256x256xf32, #tpu.memory_space<vmem>>, %arg27: memref<1x256xf32, #tpu.memory_space<vmem>>, %arg28: memref<256x128xf32, #tpu.memory_space<vmem>>, %arg29: memref<1x128xf32, #tpu.memory_space<vmem>>, %arg30: memref<32x128xf32, #tpu.memory_space<vmem>>) attributes {dimension_semantics = [#tpu.dimension_semantics<arbitrary>], iteration_bounds = array<i64: 1>, scalar_prefetch = 0 : i64, scratch_operands = 0 : i64, tpu.core_type = #tpu.core_type<tc>, window_params = [{pipeline_mode = #tpu.pipeline_mode<synchronous>, transform_indices = @transform_0, window_bounds = array<i64: 32, 256>}, {pipeline_mode = #tpu.pipeline_mode<synchronous>, transform_indices = @transform_1, window_bounds = array<i64: 32, 1>}, {pipeline_mode = #tpu.pipeline_mode<synchronous>, transform_indices = @transform_2, window_bounds = array<i64: 32, 1>}, {pipeline_mode = #tpu.pipeline_mode<synchronous>, transform_indices = @transform_3, window_bounds = array<i64: 256, 256>}, {pipeline_mode = #tpu.pipeline_mode<synchronous>, transform_indices = @transform_4, window_bounds = array<i64: 256, 256>}, {pipeline_mode = #tpu.pipeline_mode<synchronous>, transform_indices = @transform_5, window_bounds = array<i64: 256, 256>}, {pipeline_mode = #tpu.pipeline_mode<synchronous>, transform_indices = @transform_6, window_bounds = array<i64: 1, 256>}, {pipeline_mode = #tpu.pipeline_mode<synchronous>, transform_indices = @transform_7, window_bounds = array<i64: 256, 256>}, {pipeline_mode = #tpu.pipeline_mode<synchronous>, transform_indices = @transform_8, window_bounds = array<i64: 256, 256>}, {pipeline_mode = #tpu.pipeline_mode<synchronous>, transform_indices = @transform_9, window_bounds = array<i64: 256, 256>}, {pipeline_mode = #tpu.pipeline_mode<synchronous>, transform_indices = @transform_10, window_bounds = array<i64: 1, 256>}, {pipeline_mode = #tpu.pipeline_mode<synchronous>, transform_indices = @transform_11, window_bounds = array<i64: 256, 256>}, {pipeline_mode = #tpu.pipeline_mode<synchronous>, transform_indices = @transform_12, window_bounds = array<i64: 256, 256>}, {pipeline_mode = #tpu.pipeline_mode<synchronous>, transform_indices = @transform_13, window_bounds = array<i64: 256, 256>}, {pipeline_mode = #tpu.pipeline_mode<synchronous>, transform_indices = @transform_14, window_bounds = array<i64: 1, 256>}, {pipeline_mode = #tpu.pipeline_mode<synchronous>, transform_indices = @transform_15, window_bounds = array<i64: 256, 256>}, {pipeline_mode = #tpu.pipeline_mode<synchronous>, transform_indices = @transform_16, window_bounds = array<i64: 256, 256>}, {pipeline_mode = #tpu.pipeline_mode<synchronous>, transform_indices = @transform_17, window_bounds = array<i64: 256, 256>}, {pipeline_mode = #tpu.pipeline_mode<synchronous>, transform_indices = @transform_18, window_bounds = array<i64: 1, 256>}, {pipeline_mode = #tpu.pipeline_mode<synchronous>, transform_indices = @transform_19, window_bounds = array<i64: 256, 256>}, {pipeline_mode = #tpu.pipeline_mode<synchronous>, transform_indices = @transform_20, window_bounds = array<i64: 256, 256>}, {pipeline_mode = #tpu.pipeline_mode<synchronous>, transform_indices = @transform_21, window_bounds = array<i64: 256, 256>}, {pipeline_mode = #tpu.pipeline_mode<synchronous>, transform_indices = @transform_22, window_bounds = array<i64: 1, 256>}, {pipeline_mode = #tpu.pipeline_mode<synchronous>, transform_indices = @transform_23, window_bounds = array<i64: 256, 256>}, {pipeline_mode = #tpu.pipeline_mode<synchronous>, transform_indices = @transform_24, window_bounds = array<i64: 256, 256>}, {pipeline_mode = #tpu.pipeline_mode<synchronous>, transform_indices = @transform_25, window_bounds = array<i64: 256, 256>}, {pipeline_mode = #tpu.pipeline_mode<synchronous>, transform_indices = @transform_26, window_bounds = array<i64: 1, 256>}, {pipeline_mode = #tpu.pipeline_mode<synchronous>, transform_indices = @transform_27, window_bounds = array<i64: 256, 128>}, {pipeline_mode = #tpu.pipeline_mode<synchronous>, transform_indices = @transform_28, window_bounds = array<i64: 1, 128>}, {pipeline_mode = #tpu.pipeline_mode<synchronous>, transform_indices = @transform_29, window_bounds = array<i64: 32, 128>}]} {
    %c0 = arith.constant 0 : index
    %c0_0 = arith.constant 0 : index
    %0 = vector.load %arg1[%c0, %c0_0] : memref<32x256xf32, #tpu.memory_space<vmem>>, vector<32x256xf32>
    %c0_1 = arith.constant 0 : index
    %c0_2 = arith.constant 0 : index
    %1 = vector.load %arg2[%c0_1, %c0_2] : memref<32x1xf32, #tpu.memory_space<vmem>>, vector<32x1xf32>
    %c0_3 = arith.constant 0 : index
    %c0_4 = arith.constant 0 : index
    %2 = vector.load %arg3[%c0_3, %c0_4] : memref<32x1xf32, #tpu.memory_space<vmem>>, vector<32x1xf32>
    %c0_5 = arith.constant 0 : index
    %c0_6 = arith.constant 0 : index
    %3 = vector.load %arg4[%c0_5, %c0_6] : memref<256x256xf32, #tpu.memory_space<vmem>>, vector<256x256xf32>
    %c0_7 = arith.constant 0 : index
    %c0_8 = arith.constant 0 : index
    %4 = vector.load %arg5[%c0_7, %c0_8] : memref<256x256xf32, #tpu.memory_space<vmem>>, vector<256x256xf32>
    %c0_9 = arith.constant 0 : index
    %c0_10 = arith.constant 0 : index
    %5 = vector.load %arg6[%c0_9, %c0_10] : memref<256x256xf32, #tpu.memory_space<vmem>>, vector<256x256xf32>
    %c0_11 = arith.constant 0 : index
    %c0_12 = arith.constant 0 : index
    %6 = vector.load %arg7[%c0_11, %c0_12] : memref<1x256xf32, #tpu.memory_space<vmem>>, vector<1x256xf32>
    %c1_i32 = arith.constant 1 : i32
    %7 = tpu.dynamic_rotate %0 by %c1_i32 dim 0 : vector<32x256xf32>, i32 -> vector<32x256xf32>
    %8 = vector.broadcast %1 : vector<32x1xf32> to vector<32x256xf32>
    %9 = arith.mulf %7, %8 : vector<32x256xf32>
    %c31_i32 = arith.constant 31 : i32
    %10 = tpu.dynamic_rotate %0 by %c31_i32 dim 0 : vector<32x256xf32>, i32 -> vector<32x256xf32>
    %11 = vector.broadcast %2 : vector<32x1xf32> to vector<32x256xf32>
    %12 = arith.mulf %10, %11 : vector<32x256xf32>
    %cst = arith.constant dense<0.000000e+00> : vector<32x256xf32>
    %13 = tpu.matmul %9, %3, %cst {dimension_numbers = #tpu.dot_dimension_numbers<[1], [0], [0], [1], [0, 0, 1, 1], [], []>} : vector<32x256xf32>, vector<256x256xf32>, vector<32x256xf32> -> vector<32x256xf32>
    %cst_13 = arith.constant dense<0.000000e+00> : vector<32x256xf32>
    %14 = tpu.matmul %0, %4, %cst_13 {dimension_numbers = #tpu.dot_dimension_numbers<[1], [0], [0], [1], [0, 0, 1, 1], [], []>} : vector<32x256xf32>, vector<256x256xf32>, vector<32x256xf32> -> vector<32x256xf32>
    %15 = arith.addf %13, %14 : vector<32x256xf32>
    %cst_14 = arith.constant dense<0.000000e+00> : vector<32x256xf32>
    %16 = tpu.matmul %12, %5, %cst_14 {dimension_numbers = #tpu.dot_dimension_numbers<[1], [0], [0], [1], [0, 0, 1, 1], [], []>} : vector<32x256xf32>, vector<256x256xf32>, vector<32x256xf32> -> vector<32x256xf32>
    %17 = arith.addf %15, %16 : vector<32x256xf32>
    %18 = vector.broadcast %6 : vector<1x256xf32> to vector<32x256xf32>
    %19 = arith.addf %17, %18 : vector<32x256xf32>
    %cst_15 = arith.constant 0.000000e+00 : f32
    %20 = vector.broadcast %cst_15 : f32 to vector<32x256xf32>
    %21 = arith.cmpf oge, %19, %20 : vector<32x256xf32>
    %cst_16 = arith.constant 2.000000e-01 : f32
    %22 = vector.broadcast %cst_16 : f32 to vector<32x256xf32>
    %23 = arith.mulf %22, %19 : vector<32x256xf32>
    %24 = arith.select %21, %19, %23 : vector<32x256xi1>, vector<32x256xf32>
    %c0_17 = arith.constant 0 : index
    %c0_18 = arith.constant 0 : index
    %25 = vector.load %arg8[%c0_17, %c0_18] : memref<256x256xf32, #tpu.memory_space<vmem>>, vector<256x256xf32>
    %c0_19 = arith.constant 0 : index
    %c0_20 = arith.constant 0 : index
    %26 = vector.load %arg9[%c0_19, %c0_20] : memref<256x256xf32, #tpu.memory_space<vmem>>, vector<256x256xf32>
    %c0_21 = arith.constant 0 : index
    %c0_22 = arith.constant 0 : index
    %27 = vector.load %arg10[%c0_21, %c0_22] : memref<256x256xf32, #tpu.memory_space<vmem>>, vector<256x256xf32>
    %c0_23 = arith.constant 0 : index
    %c0_24 = arith.constant 0 : index
    %28 = vector.load %arg11[%c0_23, %c0_24] : memref<1x256xf32, #tpu.memory_space<vmem>>, vector<1x256xf32>
    %c1_i32_25 = arith.constant 1 : i32
    %29 = tpu.dynamic_rotate %24 by %c1_i32_25 dim 0 : vector<32x256xf32>, i32 -> vector<32x256xf32>
    %30 = vector.broadcast %1 : vector<32x1xf32> to vector<32x256xf32>
    %31 = arith.mulf %29, %30 : vector<32x256xf32>
    %c31_i32_26 = arith.constant 31 : i32
    %32 = tpu.dynamic_rotate %24 by %c31_i32_26 dim 0 : vector<32x256xf32>, i32 -> vector<32x256xf32>
    %33 = vector.broadcast %2 : vector<32x1xf32> to vector<32x256xf32>
    %34 = arith.mulf %32, %33 : vector<32x256xf32>
    %cst_27 = arith.constant dense<0.000000e+00> : vector<32x256xf32>
    %35 = tpu.matmul %31, %25, %cst_27 {dimension_numbers = #tpu.dot_dimension_numbers<[1], [0], [0], [1], [0, 0, 1, 1], [], []>} : vector<32x256xf32>, vector<256x256xf32>, vector<32x256xf32> -> vector<32x256xf32>
    %cst_28 = arith.constant dense<0.000000e+00> : vector<32x256xf32>
    %36 = tpu.matmul %24, %26, %cst_28 {dimension_numbers = #tpu.dot_dimension_numbers<[1], [0], [0], [1], [0, 0, 1, 1], [], []>} : vector<32x256xf32>, vector<256x256xf32>, vector<32x256xf32> -> vector<32x256xf32>
    %37 = arith.addf %35, %36 : vector<32x256xf32>
    %cst_29 = arith.constant dense<0.000000e+00> : vector<32x256xf32>
    %38 = tpu.matmul %34, %27, %cst_29 {dimension_numbers = #tpu.dot_dimension_numbers<[1], [0], [0], [1], [0, 0, 1, 1], [], []>} : vector<32x256xf32>, vector<256x256xf32>, vector<32x256xf32> -> vector<32x256xf32>
    %39 = arith.addf %37, %38 : vector<32x256xf32>
    %40 = vector.broadcast %28 : vector<1x256xf32> to vector<32x256xf32>
    %41 = arith.addf %39, %40 : vector<32x256xf32>
    %cst_30 = arith.constant 0.000000e+00 : f32
    %42 = vector.broadcast %cst_30 : f32 to vector<32x256xf32>
    %43 = arith.cmpf oge, %41, %42 : vector<32x256xf32>
    %cst_31 = arith.constant 2.000000e-01 : f32
    %44 = vector.broadcast %cst_31 : f32 to vector<32x256xf32>
    %45 = arith.mulf %44, %41 : vector<32x256xf32>
    %46 = arith.select %43, %41, %45 : vector<32x256xi1>, vector<32x256xf32>
    %c0_32 = arith.constant 0 : index
    %c0_33 = arith.constant 0 : index
    %47 = vector.load %arg12[%c0_32, %c0_33] : memref<256x256xf32, #tpu.memory_space<vmem>>, vector<256x256xf32>
    %c0_34 = arith.constant 0 : index
    %c0_35 = arith.constant 0 : index
    %48 = vector.load %arg13[%c0_34, %c0_35] : memref<256x256xf32, #tpu.memory_space<vmem>>, vector<256x256xf32>
    %c0_36 = arith.constant 0 : index
    %c0_37 = arith.constant 0 : index
    %49 = vector.load %arg14[%c0_36, %c0_37] : memref<256x256xf32, #tpu.memory_space<vmem>>, vector<256x256xf32>
    %c0_38 = arith.constant 0 : index
    %c0_39 = arith.constant 0 : index
    %50 = vector.load %arg15[%c0_38, %c0_39] : memref<1x256xf32, #tpu.memory_space<vmem>>, vector<1x256xf32>
    %c1_i32_40 = arith.constant 1 : i32
    %51 = tpu.dynamic_rotate %46 by %c1_i32_40 dim 0 : vector<32x256xf32>, i32 -> vector<32x256xf32>
    %52 = vector.broadcast %1 : vector<32x1xf32> to vector<32x256xf32>
    %53 = arith.mulf %51, %52 : vector<32x256xf32>
    %c31_i32_41 = arith.constant 31 : i32
    %54 = tpu.dynamic_rotate %46 by %c31_i32_41 dim 0 : vector<32x256xf32>, i32 -> vector<32x256xf32>
    %55 = vector.broadcast %2 : vector<32x1xf32> to vector<32x256xf32>
    %56 = arith.mulf %54, %55 : vector<32x256xf32>
    %cst_42 = arith.constant dense<0.000000e+00> : vector<32x256xf32>
    %57 = tpu.matmul %53, %47, %cst_42 {dimension_numbers = #tpu.dot_dimension_numbers<[1], [0], [0], [1], [0, 0, 1, 1], [], []>} : vector<32x256xf32>, vector<256x256xf32>, vector<32x256xf32> -> vector<32x256xf32>
    %cst_43 = arith.constant dense<0.000000e+00> : vector<32x256xf32>
    %58 = tpu.matmul %46, %48, %cst_43 {dimension_numbers = #tpu.dot_dimension_numbers<[1], [0], [0], [1], [0, 0, 1, 1], [], []>} : vector<32x256xf32>, vector<256x256xf32>, vector<32x256xf32> -> vector<32x256xf32>
    %59 = arith.addf %57, %58 : vector<32x256xf32>
    %cst_44 = arith.constant dense<0.000000e+00> : vector<32x256xf32>
    %60 = tpu.matmul %56, %49, %cst_44 {dimension_numbers = #tpu.dot_dimension_numbers<[1], [0], [0], [1], [0, 0, 1, 1], [], []>} : vector<32x256xf32>, vector<256x256xf32>, vector<32x256xf32> -> vector<32x256xf32>
    %61 = arith.addf %59, %60 : vector<32x256xf32>
    %62 = vector.broadcast %50 : vector<1x256xf32> to vector<32x256xf32>
    %63 = arith.addf %61, %62 : vector<32x256xf32>
    %cst_45 = arith.constant 0.000000e+00 : f32
    %64 = vector.broadcast %cst_45 : f32 to vector<32x256xf32>
    %65 = arith.cmpf oge, %63, %64 : vector<32x256xf32>
    %cst_46 = arith.constant 2.000000e-01 : f32
    %66 = vector.broadcast %cst_46 : f32 to vector<32x256xf32>
    %67 = arith.mulf %66, %63 : vector<32x256xf32>
    %68 = arith.select %65, %63, %67 : vector<32x256xi1>, vector<32x256xf32>
    %c0_47 = arith.constant 0 : index
    %c0_48 = arith.constant 0 : index
    %69 = vector.load %arg16[%c0_47, %c0_48] : memref<256x256xf32, #tpu.memory_space<vmem>>, vector<256x256xf32>
    %c0_49 = arith.constant 0 : index
    %c0_50 = arith.constant 0 : index
    %70 = vector.load %arg17[%c0_49, %c0_50] : memref<256x256xf32, #tpu.memory_space<vmem>>, vector<256x256xf32>
    %c0_51 = arith.constant 0 : index
    %c0_52 = arith.constant 0 : index
    %71 = vector.load %arg18[%c0_51, %c0_52] : memref<256x256xf32, #tpu.memory_space<vmem>>, vector<256x256xf32>
    %c0_53 = arith.constant 0 : index
    %c0_54 = arith.constant 0 : index
    %72 = vector.load %arg19[%c0_53, %c0_54] : memref<1x256xf32, #tpu.memory_space<vmem>>, vector<1x256xf32>
    %c1_i32_55 = arith.constant 1 : i32
    %73 = tpu.dynamic_rotate %68 by %c1_i32_55 dim 0 : vector<32x256xf32>, i32 -> vector<32x256xf32>
    %74 = vector.broadcast %1 : vector<32x1xf32> to vector<32x256xf32>
    %75 = arith.mulf %73, %74 : vector<32x256xf32>
    %c31_i32_56 = arith.constant 31 : i32
    %76 = tpu.dynamic_rotate %68 by %c31_i32_56 dim 0 : vector<32x256xf32>, i32 -> vector<32x256xf32>
    %77 = vector.broadcast %2 : vector<32x1xf32> to vector<32x256xf32>
    %78 = arith.mulf %76, %77 : vector<32x256xf32>
    %cst_57 = arith.constant dense<0.000000e+00> : vector<32x256xf32>
    %79 = tpu.matmul %75, %69, %cst_57 {dimension_numbers = #tpu.dot_dimension_numbers<[1], [0], [0], [1], [0, 0, 1, 1], [], []>} : vector<32x256xf32>, vector<256x256xf32>, vector<32x256xf32> -> vector<32x256xf32>
    %cst_58 = arith.constant dense<0.000000e+00> : vector<32x256xf32>
    %80 = tpu.matmul %68, %70, %cst_58 {dimension_numbers = #tpu.dot_dimension_numbers<[1], [0], [0], [1], [0, 0, 1, 1], [], []>} : vector<32x256xf32>, vector<256x256xf32>, vector<32x256xf32> -> vector<32x256xf32>
    %81 = arith.addf %79, %80 : vector<32x256xf32>
    %cst_59 = arith.constant dense<0.000000e+00> : vector<32x256xf32>
    %82 = tpu.matmul %78, %71, %cst_59 {dimension_numbers = #tpu.dot_dimension_numbers<[1], [0], [0], [1], [0, 0, 1, 1], [], []>} : vector<32x256xf32>, vector<256x256xf32>, vector<32x256xf32> -> vector<32x256xf32>
    %83 = arith.addf %81, %82 : vector<32x256xf32>
    %84 = vector.broadcast %72 : vector<1x256xf32> to vector<32x256xf32>
    %85 = arith.addf %83, %84 : vector<32x256xf32>
    %cst_60 = arith.constant 0.000000e+00 : f32
    %86 = vector.broadcast %cst_60 : f32 to vector<32x256xf32>
    %87 = arith.cmpf oge, %85, %86 : vector<32x256xf32>
    %cst_61 = arith.constant 2.000000e-01 : f32
    %88 = vector.broadcast %cst_61 : f32 to vector<32x256xf32>
    %89 = arith.mulf %88, %85 : vector<32x256xf32>
    %90 = arith.select %87, %85, %89 : vector<32x256xi1>, vector<32x256xf32>
    %c0_62 = arith.constant 0 : index
    %c0_63 = arith.constant 0 : index
    %91 = vector.load %arg20[%c0_62, %c0_63] : memref<256x256xf32, #tpu.memory_space<vmem>>, vector<256x256xf32>
    %c0_64 = arith.constant 0 : index
    %c0_65 = arith.constant 0 : index
    %92 = vector.load %arg21[%c0_64, %c0_65] : memref<256x256xf32, #tpu.memory_space<vmem>>, vector<256x256xf32>
    %c0_66 = arith.constant 0 : index
    %c0_67 = arith.constant 0 : index
    %93 = vector.load %arg22[%c0_66, %c0_67] : memref<256x256xf32, #tpu.memory_space<vmem>>, vector<256x256xf32>
    %c0_68 = arith.constant 0 : index
    %c0_69 = arith.constant 0 : index
    %94 = vector.load %arg23[%c0_68, %c0_69] : memref<1x256xf32, #tpu.memory_space<vmem>>, vector<1x256xf32>
    %c1_i32_70 = arith.constant 1 : i32
    %95 = tpu.dynamic_rotate %90 by %c1_i32_70 dim 0 : vector<32x256xf32>, i32 -> vector<32x256xf32>
    %96 = vector.broadcast %1 : vector<32x1xf32> to vector<32x256xf32>
    %97 = arith.mulf %95, %96 : vector<32x256xf32>
    %c31_i32_71 = arith.constant 31 : i32
    %98 = tpu.dynamic_rotate %90 by %c31_i32_71 dim 0 : vector<32x256xf32>, i32 -> vector<32x256xf32>
    %99 = vector.broadcast %2 : vector<32x1xf32> to vector<32x256xf32>
    %100 = arith.mulf %98, %99 : vector<32x256xf32>
    %cst_72 = arith.constant dense<0.000000e+00> : vector<32x256xf32>
    %101 = tpu.matmul %97, %91, %cst_72 {dimension_numbers = #tpu.dot_dimension_numbers<[1], [0], [0], [1], [0, 0, 1, 1], [], []>} : vector<32x256xf32>, vector<256x256xf32>, vector<32x256xf32> -> vector<32x256xf32>
    %cst_73 = arith.constant dense<0.000000e+00> : vector<32x256xf32>
    %102 = tpu.matmul %90, %92, %cst_73 {dimension_numbers = #tpu.dot_dimension_numbers<[1], [0], [0], [1], [0, 0, 1, 1], [], []>} : vector<32x256xf32>, vector<256x256xf32>, vector<32x256xf32> -> vector<32x256xf32>
    %103 = arith.addf %101, %102 : vector<32x256xf32>
    %cst_74 = arith.constant dense<0.000000e+00> : vector<32x256xf32>
    %104 = tpu.matmul %100, %93, %cst_74 {dimension_numbers = #tpu.dot_dimension_numbers<[1], [0], [0], [1], [0, 0, 1, 1], [], []>} : vector<32x256xf32>, vector<256x256xf32>, vector<32x256xf32> -> vector<32x256xf32>
    %105 = arith.addf %103, %104 : vector<32x256xf32>
    %106 = vector.broadcast %94 : vector<1x256xf32> to vector<32x256xf32>
    %107 = arith.addf %105, %106 : vector<32x256xf32>
    %cst_75 = arith.constant 0.000000e+00 : f32
    %108 = vector.broadcast %cst_75 : f32 to vector<32x256xf32>
    %109 = arith.cmpf oge, %107, %108 : vector<32x256xf32>
    %cst_76 = arith.constant 2.000000e-01 : f32
    %110 = vector.broadcast %cst_76 : f32 to vector<32x256xf32>
    %111 = arith.mulf %110, %107 : vector<32x256xf32>
    %112 = arith.select %109, %107, %111 : vector<32x256xi1>, vector<32x256xf32>
    %c0_77 = arith.constant 0 : index
    %c0_78 = arith.constant 0 : index
    %113 = vector.load %arg24[%c0_77, %c0_78] : memref<256x256xf32, #tpu.memory_space<vmem>>, vector<256x256xf32>
    %c0_79 = arith.constant 0 : index
    %c0_80 = arith.constant 0 : index
    %114 = vector.load %arg25[%c0_79, %c0_80] : memref<256x256xf32, #tpu.memory_space<vmem>>, vector<256x256xf32>
    %c0_81 = arith.constant 0 : index
    %c0_82 = arith.constant 0 : index
    %115 = vector.load %arg26[%c0_81, %c0_82] : memref<256x256xf32, #tpu.memory_space<vmem>>, vector<256x256xf32>
    %c0_83 = arith.constant 0 : index
    %c0_84 = arith.constant 0 : index
    %116 = vector.load %arg27[%c0_83, %c0_84] : memref<1x256xf32, #tpu.memory_space<vmem>>, vector<1x256xf32>
    %c1_i32_85 = arith.constant 1 : i32
    %117 = tpu.dynamic_rotate %112 by %c1_i32_85 dim 0 : vector<32x256xf32>, i32 -> vector<32x256xf32>
    %118 = vector.broadcast %1 : vector<32x1xf32> to vector<32x256xf32>
    %119 = arith.mulf %117, %118 : vector<32x256xf32>
    %c31_i32_86 = arith.constant 31 : i32
    %120 = tpu.dynamic_rotate %112 by %c31_i32_86 dim 0 : vector<32x256xf32>, i32 -> vector<32x256xf32>
    %121 = vector.broadcast %2 : vector<32x1xf32> to vector<32x256xf32>
    %122 = arith.mulf %120, %121 : vector<32x256xf32>
    %cst_87 = arith.constant dense<0.000000e+00> : vector<32x256xf32>
    %123 = tpu.matmul %119, %113, %cst_87 {dimension_numbers = #tpu.dot_dimension_numbers<[1], [0], [0], [1], [0, 0, 1, 1], [], []>} : vector<32x256xf32>, vector<256x256xf32>, vector<32x256xf32> -> vector<32x256xf32>
    %cst_88 = arith.constant dense<0.000000e+00> : vector<32x256xf32>
    %124 = tpu.matmul %112, %114, %cst_88 {dimension_numbers = #tpu.dot_dimension_numbers<[1], [0], [0], [1], [0, 0, 1, 1], [], []>} : vector<32x256xf32>, vector<256x256xf32>, vector<32x256xf32> -> vector<32x256xf32>
    %125 = arith.addf %123, %124 : vector<32x256xf32>
    %cst_89 = arith.constant dense<0.000000e+00> : vector<32x256xf32>
    %126 = tpu.matmul %122, %115, %cst_89 {dimension_numbers = #tpu.dot_dimension_numbers<[1], [0], [0], [1], [0, 0, 1, 1], [], []>} : vector<32x256xf32>, vector<256x256xf32>, vector<32x256xf32> -> vector<32x256xf32>
    %127 = arith.addf %125, %126 : vector<32x256xf32>
    %128 = vector.broadcast %116 : vector<1x256xf32> to vector<32x256xf32>
    %129 = arith.addf %127, %128 : vector<32x256xf32>
    %cst_90 = arith.constant 0.000000e+00 : f32
    %130 = vector.broadcast %cst_90 : f32 to vector<32x256xf32>
    %131 = arith.cmpf oge, %129, %130 : vector<32x256xf32>
    %cst_91 = arith.constant 2.000000e-01 : f32
    %132 = vector.broadcast %cst_91 : f32 to vector<32x256xf32>
    %133 = arith.mulf %132, %129 : vector<32x256xf32>
    %134 = arith.select %131, %129, %133 : vector<32x256xi1>, vector<32x256xf32>
    %c0_92 = arith.constant 0 : index
    %c0_93 = arith.constant 0 : index
    %135 = vector.load %arg28[%c0_92, %c0_93] : memref<256x128xf32, #tpu.memory_space<vmem>>, vector<256x128xf32>
    %c0_94 = arith.constant 0 : index
    %c0_95 = arith.constant 0 : index
    %136 = vector.load %arg29[%c0_94, %c0_95] : memref<1x128xf32, #tpu.memory_space<vmem>>, vector<1x128xf32>
    %cst_96 = arith.constant dense<0.000000e+00> : vector<32x128xf32>
    %137 = tpu.matmul %134, %135, %cst_96 {dimension_numbers = #tpu.dot_dimension_numbers<[1], [0], [0], [1], [0, 0, 1, 1], [], []>} : vector<32x256xf32>, vector<256x128xf32>, vector<32x128xf32> -> vector<32x128xf32>
    %138 = vector.broadcast %136 : vector<1x128xf32> to vector<32x128xf32>
    %139 = arith.addf %137, %138 : vector<32x128xf32>
    %c0_97 = arith.constant 0 : index
    %c0_98 = arith.constant 0 : index
    %140 = vector.load %arg30[%c0_97, %c0_98] : memref<32x128xf32, #tpu.memory_space<vmem>>, vector<32x128xf32>
    tpu.vector_store %arg30[%c0_97, %c0_98], %139 {strides = array<i32>} : memref<32x128xf32, #tpu.memory_space<vmem>>, vector<32x128xf32>,
    return
  }
  func.func @transform_0(%arg0: i32) -> (i32, i32) {
    %c0_i32 = arith.constant 0 : i32
    %c0_i32_0 = arith.constant 0 : i32
    %c0_i32_1 = arith.constant 0 : i32
    return %c0_i32, %c0_i32_0 : i32, i32
  }
  func.func @transform_1(%arg0: i32) -> (i32, i32) {
    %c0_i32 = arith.constant 0 : i32
    %c0_i32_0 = arith.constant 0 : i32
    %c0_i32_1 = arith.constant 0 : i32
    return %c0_i32, %c0_i32_0 : i32, i32
  }
  func.func @transform_2(%arg0: i32) -> (i32, i32) {
    %c0_i32 = arith.constant 0 : i32
    %c0_i32_0 = arith.constant 0 : i32
    %c0_i32_1 = arith.constant 0 : i32
    return %c0_i32, %c0_i32_0 : i32, i32
  }
  func.func @transform_3(%arg0: i32) -> (i32, i32) {
    %c0_i32 = arith.constant 0 : i32
    %c0_i32_0 = arith.constant 0 : i32
    %c0_i32_1 = arith.constant 0 : i32
    return %c0_i32, %c0_i32_0 : i32, i32
  }
  func.func @transform_4(%arg0: i32) -> (i32, i32) {
    %c0_i32 = arith.constant 0 : i32
    %c0_i32_0 = arith.constant 0 : i32
    %c0_i32_1 = arith.constant 0 : i32
    return %c0_i32, %c0_i32_0 : i32, i32
  }
  func.func @transform_5(%arg0: i32) -> (i32, i32) {
    %c0_i32 = arith.constant 0 : i32
    %c0_i32_0 = arith.constant 0 : i32
    %c0_i32_1 = arith.constant 0 : i32
    return %c0_i32, %c0_i32_0 : i32, i32
  }
  func.func @transform_6(%arg0: i32) -> (i32, i32) {
    %c0_i32 = arith.constant 0 : i32
    %c0_i32_0 = arith.constant 0 : i32
    %c0_i32_1 = arith.constant 0 : i32
    return %c0_i32, %c0_i32_0 : i32, i32
  }
  func.func @transform_7(%arg0: i32) -> (i32, i32) {
    %c0_i32 = arith.constant 0 : i32
    %c0_i32_0 = arith.constant 0 : i32
    %c0_i32_1 = arith.constant 0 : i32
    return %c0_i32, %c0_i32_0 : i32, i32
  }
  func.func @transform_8(%arg0: i32) -> (i32, i32) {
    %c0_i32 = arith.constant 0 : i32
    %c0_i32_0 = arith.constant 0 : i32
    %c0_i32_1 = arith.constant 0 : i32
    return %c0_i32, %c0_i32_0 : i32, i32
  }
  func.func @transform_9(%arg0: i32) -> (i32, i32) {
    %c0_i32 = arith.constant 0 : i32
    %c0_i32_0 = arith.constant 0 : i32
    %c0_i32_1 = arith.constant 0 : i32
    return %c0_i32, %c0_i32_0 : i32, i32
  }
  func.func @transform_10(%arg0: i32) -> (i32, i32) {
    %c0_i32 = arith.constant 0 : i32
    %c0_i32_0 = arith.constant 0 : i32
    %c0_i32_1 = arith.constant 0 : i32
    return %c0_i32, %c0_i32_0 : i32, i32
  }
  func.func @transform_11(%arg0: i32) -> (i32, i32) {
    %c0_i32 = arith.constant 0 : i32
    %c0_i32_0 = arith.constant 0 : i32
    %c0_i32_1 = arith.constant 0 : i32
    return %c0_i32, %c0_i32_0 : i32, i32
  }
  func.func @transform_12(%arg0: i32) -> (i32, i32) {
    %c0_i32 = arith.constant 0 : i32
    %c0_i32_0 = arith.constant 0 : i32
    %c0_i32_1 = arith.constant 0 : i32
    return %c0_i32, %c0_i32_0 : i32, i32
  }
  func.func @transform_13(%arg0: i32) -> (i32, i32) {
    %c0_i32 = arith.constant 0 : i32
    %c0_i32_0 = arith.constant 0 : i32
    %c0_i32_1 = arith.constant 0 : i32
    return %c0_i32, %c0_i32_0 : i32, i32
  }
  func.func @transform_14(%arg0: i32) -> (i32, i32) {
    %c0_i32 = arith.constant 0 : i32
    %c0_i32_0 = arith.constant 0 : i32
    %c0_i32_1 = arith.constant 0 : i32
    return %c0_i32, %c0_i32_0 : i32, i32
  }
  func.func @transform_15(%arg0: i32) -> (i32, i32) {
    %c0_i32 = arith.constant 0 : i32
    %c0_i32_0 = arith.constant 0 : i32
    %c0_i32_1 = arith.constant 0 : i32
    return %c0_i32, %c0_i32_0 : i32, i32
  }
  func.func @transform_16(%arg0: i32) -> (i32, i32) {
    %c0_i32 = arith.constant 0 : i32
    %c0_i32_0 = arith.constant 0 : i32
    %c0_i32_1 = arith.constant 0 : i32
    return %c0_i32, %c0_i32_0 : i32, i32
  }
  func.func @transform_17(%arg0: i32) -> (i32, i32) {
    %c0_i32 = arith.constant 0 : i32
    %c0_i32_0 = arith.constant 0 : i32
    %c0_i32_1 = arith.constant 0 : i32
    return %c0_i32, %c0_i32_0 : i32, i32
  }
  func.func @transform_18(%arg0: i32) -> (i32, i32) {
    %c0_i32 = arith.constant 0 : i32
    %c0_i32_0 = arith.constant 0 : i32
    %c0_i32_1 = arith.constant 0 : i32
    return %c0_i32, %c0_i32_0 : i32, i32
  }
  func.func @transform_19(%arg0: i32) -> (i32, i32) {
    %c0_i32 = arith.constant 0 : i32
    %c0_i32_0 = arith.constant 0 : i32
    %c0_i32_1 = arith.constant 0 : i32
    return %c0_i32, %c0_i32_0 : i32, i32
  }
  func.func @transform_20(%arg0: i32) -> (i32, i32) {
    %c0_i32 = arith.constant 0 : i32
    %c0_i32_0 = arith.constant 0 : i32
    %c0_i32_1 = arith.constant 0 : i32
    return %c0_i32, %c0_i32_0 : i32, i32
  }
  func.func @transform_21(%arg0: i32) -> (i32, i32) {
    %c0_i32 = arith.constant 0 : i32
    %c0_i32_0 = arith.constant 0 : i32
    %c0_i32_1 = arith.constant 0 : i32
    return %c0_i32, %c0_i32_0 : i32, i32
  }
  func.func @transform_22(%arg0: i32) -> (i32, i32) {
    %c0_i32 = arith.constant 0 : i32
    %c0_i32_0 = arith.constant 0 : i32
    %c0_i32_1 = arith.constant 0 : i32
    return %c0_i32, %c0_i32_0 : i32, i32
  }
  func.func @transform_23(%arg0: i32) -> (i32, i32) {
    %c0_i32 = arith.constant 0 : i32
    %c0_i32_0 = arith.constant 0 : i32
    %c0_i32_1 = arith.constant 0 : i32
    return %c0_i32, %c0_i32_0 : i32, i32
  }
  func.func @transform_24(%arg0: i32) -> (i32, i32) {
    %c0_i32 = arith.constant 0 : i32
    %c0_i32_0 = arith.constant 0 : i32
    %c0_i32_1 = arith.constant 0 : i32
    return %c0_i32, %c0_i32_0 : i32, i32
  }
  func.func @transform_25(%arg0: i32) -> (i32, i32) {
    %c0_i32 = arith.constant 0 : i32
    %c0_i32_0 = arith.constant 0 : i32
    %c0_i32_1 = arith.constant 0 : i32
    return %c0_i32, %c0_i32_0 : i32, i32
  }
  func.func @transform_26(%arg0: i32) -> (i32, i32) {
    %c0_i32 = arith.constant 0 : i32
    %c0_i32_0 = arith.constant 0 : i32
    %c0_i32_1 = arith.constant 0 : i32
    return %c0_i32, %c0_i32_0 : i32, i32
  }
  func.func @transform_27(%arg0: i32) -> (i32, i32) {
    %c0_i32 = arith.constant 0 : i32
    %c0_i32_0 = arith.constant 0 : i32
    %c0_i32_1 = arith.constant 0 : i32
    return %c0_i32, %c0_i32_0 : i32, i32
  }
  func.func @transform_28(%arg0: i32) -> (i32, i32) {
    %c0_i32 = arith.constant 0 : i32
    %c0_i32_0 = arith.constant 0 : i32
    %c0_i32_1 = arith.constant 0 : i32
    return %c0_i32, %c0_i32_0 : i32, i32
  }
  func.func @transform_29(%arg0: i32) -> (i32, i32) {
    %c0_i32 = arith.constant 0 : i32
    %c0_i32_0 = arith.constant 0 : i32
    %c0_i32_1 = arith.constant 0 : i32
    return %c0_i32, %c0_i32_0 : i32, i32
  }
}

</mosaic_0001>

<bundles_post_ra>
// kernel: tpu_custom_call.1
= control target key start
LH: loop header
LB: loop body
LE: loop exit
PB: predicated region body
PF: predicated region fallthrough
CT: control target
= control target key end

     0   :  { %s4532_s6 = smov 1   ;;  %s4533_s10 = smov 2   ;;  %s5506_s0 = inlined_call_operand.smem [shape: u32[30], index: -1, kind: input, shape index: {}] }
   0x1   :  { %s4594_s5 = sld [smem:[%s5506_s0]]   ;;  %s4534_s14 = smov 3  }
   0x2   :  { %s4599_s9 = sld [smem:[%s5506_s0 + %s4532_s6]]   ;;  %s4535_s18 = smov 4  }
   0x3   :  { %s4604_s13 = sld [smem:[%s5506_s0 + %s4533_s10]]   ;;  %s4536_s22 = smov 5  }
   0x4   :  { %s4609_s17 = sld [smem:[%s5506_s0 + %s4534_s14]]   ;;  %s4537_s26 = smov 6  }
   0x5   :  { %s4614_s21 = sld [smem:[%s5506_s0 + %s4535_s18]]   ;;  %s4538_s30 = smov 7  }
   0x6   :  { %s4619_s25 = sld [smem:[%s5506_s0 + %s4536_s22]]   ;;  %s4539_s4 = smov 8  }
   0x7   :  { %5510 = sst [smem:[#allocation44_spill]] %s4594_s5  ;;  %s4540_s10 = smov 9  }
   0x8   :  { %5511 = sst [smem:[#allocation45_spill]] %s4599_s9  ;;  %s4541_s15 = smov 10  }
   0x9   :  { %5512 = sst [smem:[#allocation46_spill]] %s4604_s13  ;;  %s4542_s20 = smov 11  }
   0xa   :  { %s4624_s29 = sld [smem:[%s5506_s0 + %s4537_s26]]   ;;  %s4543_s26 = smov 12  }
   0xb   :  { %s4629_s3 = sld [smem:[%s5506_s0 + %s4538_s30]]   ;;  %s4544_s1 = smov 13  }
   0xc   :  { %s4634_s8 = sld [smem:[%s5506_s0 + %s4539_s4]]   ;;  %s4545_s7 = smov 14  }
   0xd   :  { %s4639_s14 = sld [smem:[%s5506_s0 + %s4540_s10]]   ;;  %s4547_s22 = smov 16  }
   0xe   :  { %s4644_s19 = sld [smem:[%s5506_s0 + %s4541_s15]]   ;;  %s4546_s15 = smov 15  }
   0xf   :  { %s4649_s24 = sld [smem:[%s5506_s0 + %s4542_s20]]   ;;  %s4548_s28 = smov 17  }
  0x10   :  { %5513 = sst [smem:[#allocation47_spill]] %s4624_s29 }
  0x11   :  { %s4654_s30 = sld [smem:[%s5506_s0 + %s4543_s26]]  }
  0x12   :  { %s4659_s6 = sld [smem:[%s5506_s0 + %s4544_s1]]  }
  0x13   :  { %s4664_s12 = sld [smem:[%s5506_s0 + %s4545_s7]]   ;;  %s4549_s7 = smov 18  }
  0x14   :  { %5514 = sst [smem:[#allocation48_spill]] %s4644_s19 }
  0x15   :  { %s4669_s20 = sld [smem:[%s5506_s0 + %s4546_s15]]   ;;  %s4550_s15 = smov 19  }
  0x16   :  { %s4674_s27 = sld [smem:[%s5506_s0 + %s4547_s22]]   ;;  %s4551_s22 = smov 20  }
  0x17   :  { %s4679_s4 = sld [smem:[%s5506_s0 + %s4548_s28]]   ;;  %s4552_s28 = smov 21  }
  0x18   :  { %s4689_s19 = sld [smem:[%s5506_s0 + %s4550_s15]]   ;;  %s4554_s15 = smov 23  }
  0x19   :  { %5515 = sst [smem:[#allocation49_spill]] %s4664_s12 }
  0x1a   :  { %s4684_s12 = sld [smem:[%s5506_s0 + %s4549_s7]]   ;;  %s4553_s7 = smov 22  }
  0x1b   :  { %s4694_s29 = sld [smem:[%s5506_s0 + %s4551_s22]]   ;;  %s4555_s22 = smov 24  }
  0x1c   :  { %5516 = sst [smem:[#allocation50_spill]] %s4674_s27 }
  0x1d   :  { %s4699_s5 = sld [smem:[%s5506_s0 + %s4552_s28]]   ;;  %s4556_s28 = smov 25  }
  0x1e   :  { %5518 = sst [smem:[#allocation52_spill]] %s4689_s19 }
  0x1f   :  { %s4709_s13 = sld [smem:[%s5506_s0 + %s4554_s15]]   ;;  %s4558_s15 = smov 27  }
  0x20   :  { %5517 = sst [smem:[#allocation51_spill]] %s4684_s12 }
  0x21   :  { %s4704_s12 = sld [smem:[%s5506_s0 + %s4553_s7]]   ;;  %s4557_s7 = smov 26  }
  0x22   :  { %s4714_s9 = sld [smem:[%s5506_s0 + %s4555_s22]]   ;;  %s4559_s22 = smov 28  }
  0x23   :  { %5519 = sst [smem:[#allocation53_spill]] %s4699_s5 }
  0x24   :  { %s4719_s5 = sld [smem:[%s5506_s0 + %s4556_s28]]   ;;  %s4560_s28 = smov 29  }
  0x25   :  { %s4729_s19 = sld [smem:[%s5506_s0 + %s4558_s15]]  }
  0x26   :  { %s4739_s27 = sld [smem:[%s5506_s0 + %s4560_s28]]  }
  0x27   :  { %5520 = sst [smem:[#allocation54_spill]] %s4704_s12 }
  0x28   :  { %5521 = sst [smem:[#allocation55_spill]] %s4714_s9 }
  0x29   :  { %s4724_s12 = sld [smem:[%s5506_s0 + %s4557_s7]]  }
  0x2a   :  { %s4734_s9 = sld [smem:[%s5506_s0 + %s4559_s22]]  }
  0x2b   :  { %64 = vsyncpa [#allocation3], 0 }
  0x2c   :  { %65 = vsyncpa [#allocation6], 0 }
  0x2d   :  { %66 = vsyncpa [#allocation9], 0 }
  0x2e   :  { %67 = vsyncpa [#allocation12], 0 }
  0x2f   :  { %68 = vsyncpa [#allocation15], 0 }
  0x30   :  { %69 = vsyncpa [#allocation18], 0 }
  0x31   :  { %70 = vsyncpa [#allocation21], 0 }
  0x32   :  { %71 = vsyncpa [#allocation24], 0 }
  0x33   :  { %72 = vsyncpa [#allocation27], 0 }
  0x34   :  { %73 = vsyncpa [#allocation30], 0 }
  0x35   :  { %74 = vsyncpa [#allocation4], 0  ;;  %s4561_s7 = smov [#allocation5]   ;;  %s4562_s11 = smov [#allocation8]  }
  0x36   :  { %s98_s10 = sshll.u32 %s4561_s7, 4  ;;  %s124_s15 = sshll.u32 %s4562_s11, 4  ;;  %s99_s10 = int_to_ptr.vmem [resolvable:$true] %s98_s10  ;;  %s125_s15 = int_to_ptr.vmem [resolvable:$true] %s124_s15 }
  0x37   :  { %s4118_s16 = scalar_lea.vmem %s99_s10, 8192  ;;  %p4123_p1 = scmp.lt.s32.totalorder %s99_s10, %s99_s10 }
  0x38   :  { %p4119_p0 = scmp.ne.s32.totalorder %s99_s10, %s4118_s16  ;;  %p4124_p2 = scmp.lt.s32.totalorder %s4118_s16, %s4118_s16 }
  0x3a   :  { %p4125_p3 = por %p4124_p2, %p4123_p1 }
  0x3c   :  { %p4126_p4 = pnand %p4125_p3, %p4119_p0 }
  0x3e   :  { %4129 = shalt.err (!%p4126_p4)
}
  0x3f   :  { %s4563_s0 = smov 256   ;;  %s4564_s18 = smov 16  }
  0x40   :  { %104 = dma.hbm_to_vmem [thread:$0]  %s4614_s21, 8192, %s99_s10, [#allocation6], %s4563_s0, %s4563_s0, %s4564_s18  }
  0x41   :  { %s4138_s22 = scalar_lea.vmem %s125_s15, 8192  ;;  %p4143_p6 = scmp.lt.s32.totalorder %s125_s15, %s125_s15 }
  0x42   :  { %p4139_p5 = scmp.ne.s32.totalorder %s125_s15, %s4138_s22  ;;  %p4144_p7 = scmp.lt.s32.totalorder %s4138_s22, %s4138_s22 }
  0x44   :  { %p4145_p8 = por %p4144_p7, %p4143_p6 }
  0x46   :  { %p4146_p9 = pnand %p4145_p8, %p4139_p5 }
  0x48   :  { %4149 = shalt.err (!%p4146_p9)
}
  0x49   :  { %130 = dma.hbm_to_vmem [thread:$0]  %s4629_s3, 8192, %s125_s15, [#allocation9], %s4563_s0, %s4563_s0, %s4564_s18  }
  0x4a   :  { %s4565_s23 = smov [#allocation11]   ;;  %s4566_s28 = smov [#allocation14]  }
  0x4b   :  { %s148_s26 = sshll.u32 %s4565_s23, 4  ;;  %s174_s1 = sshll.u32 %s4566_s28, 4  ;;  %s149_s26 = int_to_ptr.vmem [resolvable:$true] %s148_s26  ;;  %s175_s1 = int_to_ptr.vmem [resolvable:$true] %s174_s1 }
  0x4c   :  { %s4158_s2 = scalar_lea.vmem %s149_s26, 8192  ;;  %p4163_p11 = scmp.lt.s32.totalorder %s149_s26, %s149_s26 }
  0x4d   :  { %p4159_p10 = scmp.ne.s32.totalorder %s149_s26, %s4158_s2  ;;  %p4164_p12 = scmp.lt.s32.totalorder %s4158_s2, %s4158_s2 }
  0x4f   :  { %p4165_p13 = por %p4164_p12, %p4163_p11 }
  0x51   :  { %p4166_p0 = pnand %p4165_p13, %p4159_p10 }
  0x53   :  { %4169 = shalt.err (!%p4166_p0)
}
  0x54   :  { %154 = dma.hbm_to_vmem [thread:$0]  %s4639_s14, 8192, %s149_s26, [#allocation12], %s4563_s0, %s4563_s0, %s4564_s18  }
  0x55   :  { %s4178_s21 = scalar_lea.vmem %s175_s1, 8192  ;;  %p4183_p2 = scmp.lt.s32.totalorder %s175_s1, %s175_s1 }
  0x56   :  { %p4179_p1 = scmp.ne.s32.totalorder %s175_s1, %s4178_s21  ;;  %p4184_p3 = scmp.lt.s32.totalorder %s4178_s21, %s4178_s21 }
  0x58   :  { %p4185_p4 = por %p4184_p3, %p4183_p2 }
  0x5a   :  { %p4186_p5 = pnand %p4185_p4, %p4179_p1 }
  0x5c   :  { %4189 = shalt.err (!%p4186_p5)
}
  0x5d   :  { %180 = dma.hbm_to_vmem [thread:$0]  %s4654_s30, 8192, %s175_s1, [#allocation15], %s4563_s0, %s4563_s0, %s4564_s18  }
  0x5e   :  { %s4567_s3 = smov [#allocation17]   ;;  %s4568_s10 = smov [#allocation20]  }
  0x5f   :  { %s200_s7 = sshll.u32 %s4567_s3, 4  ;;  %s224_s11 = sshll.u32 %s4568_s10, 4  ;;  %s201_s7 = int_to_ptr.vmem [resolvable:$true] %s200_s7  ;;  %s225_s11 = int_to_ptr.vmem [resolvable:$true] %s224_s11 }
  0x60   :  { %s4198_s15 = scalar_lea.vmem %s201_s7, 8192  ;;  %p4203_p7 = scmp.lt.s32.totalorder %s201_s7, %s201_s7 }
  0x61   :  { %p4199_p6 = scmp.ne.s32.totalorder %s201_s7, %s4198_s15  ;;  %p4204_p8 = scmp.lt.s32.totalorder %s4198_s15, %s4198_s15 }
  0x63   :  { %p4205_p9 = por %p4204_p8, %p4203_p7 }
  0x65   :  { %p4206_p10 = pnand %p4205_p9, %p4199_p6 }
  0x67   :  { %4209 = shalt.err (!%p4206_p10)
}
  0x68   :  { %206 = dma.hbm_to_vmem [thread:$0]  %s4669_s20, 8192, %s201_s7, [#allocation18], %s4563_s0, %s4563_s0, %s4564_s18  }
  0x69   :  { %s4218_s14 = scalar_lea.vmem %s225_s11, 8192  ;;  %p4223_p12 = scmp.lt.s32.totalorder %s225_s11, %s225_s11 }
  0x6a   :  { %p4219_p11 = scmp.ne.s32.totalorder %s225_s11, %s4218_s14  ;;  %p4224_p13 = scmp.lt.s32.totalorder %s4218_s14, %s4218_s14 }
  0x6c   :  { %p4225_p0 = por %p4224_p13, %p4223_p12 }
  0x6e   :  { %p4226_p1 = pnand %p4225_p0, %p4219_p11 }
  0x70   :  { %4229 = shalt.err (!%p4226_p1)
}
  0x71   :  { %230 = dma.hbm_to_vmem [thread:$0]  %s4679_s4, 8192, %s225_s11, [#allocation21], %s4563_s0, %s4563_s0, %s4564_s18  }
  0x72   :  { %s4569_s30 = smov [#allocation23]   ;;  %s4570_s22 = smov [#allocation26]  }
  0x73   :  { %s250_s16 = sshll.u32 %s4569_s30, 4  ;;  %s276_s23 = sshll.u32 %s4570_s22, 4  ;;  %s251_s16 = int_to_ptr.vmem [resolvable:$true] %s250_s16  ;;  %s277_s23 = int_to_ptr.vmem [resolvable:$true] %s276_s23 }
  0x74   :  { %s4238_s26 = scalar_lea.vmem %s251_s16, 8192  ;;  %p4243_p3 = scmp.lt.s32.totalorder %s251_s16, %s251_s16 }
  0x75   :  { %p4239_p2 = scmp.ne.s32.totalorder %s251_s16, %s4238_s26  ;;  %p4244_p4 = scmp.lt.s32.totalorder %s4238_s26, %s4238_s26 }
  0x77   :  { %p4245_p5 = por %p4244_p4, %p4243_p3 }
  0x79   :  { %p4246_p6 = pnand %p4245_p5, %p4239_p2 }
  0x7b   :  { %4249 = shalt.err (!%p4246_p6)
}
  0x7c   :  { %256 = dma.hbm_to_vmem [thread:$0]  %s4694_s29, 8192, %s251_s16, [#allocation24], %s4563_s0, %s4563_s0, %s4564_s18  }
  0x7d   :  { %s4258_s20 = scalar_lea.vmem %s277_s23, 8192  ;;  %p4263_p8 = scmp.lt.s32.totalorder %s277_s23, %s277_s23 }
  0x7e   :  { %p4259_p7 = scmp.ne.s32.totalorder %s277_s23, %s4258_s20  ;;  %p4264_p9 = scmp.lt.s32.totalorder %s4258_s20, %s4258_s20 }
  0x80   :  { %p4265_p10 = por %p4264_p9, %p4263_p8 }
  0x82   :  { %p4266_p11 = pnand %p4265_p10, %p4259_p7 }
  0x84   :  { %4269 = shalt.err (!%p4266_p11)
}
  0x85   :  { %282 = dma.hbm_to_vmem [thread:$0]  %s4709_s13, 8192, %s277_s23, [#allocation27], %s4563_s0, %s4563_s0, %s4564_s18  }
  0x86   :  { %s4571_s4 = smov [#allocation29]   ;;  %s4572_s1 = smov [#allocation2]  }
  0x87   :  { %s300_s28 = sshll.u32 %s4571_s4, 4  ;;  %s86_s2 = sshll.u32 %s4572_s1, 4  ;;  %s301_s28 = int_to_ptr.vmem [resolvable:$true] %s300_s28  ;;  %s87_s2 = int_to_ptr.vmem [resolvable:$true] %s86_s2 }
  0x88   :  { %s4278_s21 = scalar_lea.vmem %s301_s28, 8192  ;;  %p4283_p13 = scmp.lt.s32.totalorder %s301_s28, %s301_s28 }
  0x89   :  { %p4279_p12 = scmp.ne.s32.totalorder %s301_s28, %s4278_s21  ;;  %p4284_p0 = scmp.lt.s32.totalorder %s4278_s21, %s4278_s21 }
  0x8b   :  { %p4285_p1 = por %p4284_p0, %p4283_p13 }
  0x8d   :  { %p4286_p2 = pnand %p4285_p1, %p4279_p12 }
  0x8f   :  { %4289 = shalt.err (!%p4286_p2)
}
  0x90   :  { %306 = dma.hbm_to_vmem [thread:$0]  %s4719_s5, 8192, %s301_s28, [#allocation30], %s4563_s0, %s4563_s0, %s4564_s18  }
  0x91   :  { %s4298_s29 = scalar_lea.vmem %s87_s2, 8192  ;;  %p4303_p4 = scmp.lt.s32.totalorder %s87_s2, %s87_s2 }
  0x92   :  { %p4299_p3 = scmp.ne.s32.totalorder %s87_s2, %s4298_s29  ;;  %p4304_p5 = scmp.lt.s32.totalorder %s4298_s29, %s4298_s29 }
  0x94   :  { %p4305_p6 = por %p4304_p5, %p4303_p4 }
  0x96   :  { %p4306_p7 = pnand %p4305_p6, %p4299_p3 }
  0x98   :  { %4309 = shalt.err (!%p4306_p7)
}
  0x99   :  { %92 = dma.hbm_to_vmem [thread:$0]  %s4609_s17, 8192, %s87_s2, [#allocation3], %s4563_s0, %s4563_s0, %s4564_s18  }
  0x9a   :  { %s4573_s13 = smov [#allocation7]   ;;  %s4574_s7 = smov [#allocation10]  }
  0x9b   :  { %s110_s3 = sshll.u32 %s4573_s13, 4  ;;  %s136_s10 = sshll.u32 %s4574_s7, 4  ;;  %s111_s3 = int_to_ptr.vmem [resolvable:$true] %s110_s3  ;;  %s137_s10 = int_to_ptr.vmem [resolvable:$true] %s136_s10 }
  0x9c   :  { %s4318_s11 = scalar_lea.vmem %s111_s3, 8192  ;;  %p4323_p9 = scmp.lt.s32.totalorder %s111_s3, %s111_s3 }
  0x9d   :  { %p4319_p8 = scmp.ne.s32.totalorder %s111_s3, %s4318_s11  ;;  %p4324_p10 = scmp.lt.s32.totalorder %s4318_s11, %s4318_s11 }
  0x9f   :  { %p4325_p11 = por %p4324_p10, %p4323_p9 }
  0xa1   :  { %p4326_p12 = pnand %p4325_p11, %p4319_p8 }
  0xa3   :  { %4329 = shalt.err (!%p4326_p12)
}
  0xa4   :  { %116 = dma.hbm_to_vmem [thread:$0]  %s4619_s25, 8192, %s111_s3, [#allocation6], %s4563_s0, %s4563_s0, %s4564_s18  }
  0xa5   :  { %s4338_s5 = scalar_lea.vmem %s137_s10, 8192  ;;  %p4343_p0 = scmp.lt.s32.totalorder %s137_s10, %s137_s10 }
  0xa6   :  { %p4339_p13 = scmp.ne.s32.totalorder %s137_s10, %s4338_s5  ;;  %p4344_p1 = scmp.lt.s32.totalorder %s4338_s5, %s4338_s5 }
  0xa8   :  { %p4345_p2 = por %p4344_p1, %p4343_p0 }
  0xaa   :  { %p4346_p3 = pnand %p4345_p2, %p4339_p13 }
  0xac   :  { %4349 = shalt.err (!%p4346_p3)
}
  0xad   :  { %142 = dma.hbm_to_vmem [thread:$0]  %s4634_s8, 8192, %s137_s10, [#allocation9], %s4563_s0, %s4563_s0, %s4564_s18  }
  0xae   :  { %s4575_s17 = smov [#allocation13]   ;;  %s4576_s14 = smov [#allocation16]  }
  0xaf   :  { %s162_s15 = sshll.u32 %s4575_s17, 4  ;;  %s186_s30 = sshll.u32 %s4576_s14, 4  ;;  %s163_s15 = int_to_ptr.vmem [resolvable:$true] %s162_s15  ;;  %s187_s30 = int_to_ptr.vmem [resolvable:$true] %s186_s30 }
  0xb0   :  { %s4358_s16 = scalar_lea.vmem %s163_s15, 8192  ;;  %p4363_p5 = scmp.lt.s32.totalorder %s163_s15, %s163_s15 }
  0xb1   :  { %p4359_p4 = scmp.ne.s32.totalorder %s163_s15, %s4358_s16  ;;  %p4364_p6 = scmp.lt.s32.totalorder %s4358_s16, %s4358_s16 }
  0xb3   :  { %p4365_p7 = por %p4364_p6, %p4363_p5 }
  0xb5   :  { %p4366_p8 = pnand %p4365_p7, %p4359_p4 }
  0xb7   :  { %4369 = shalt.err (!%p4366_p8)
}
  0xb8   :  { %168 = dma.hbm_to_vmem [thread:$0]  %s4649_s24, 8192, %s163_s15, [#allocation12], %s4563_s0, %s4563_s0, %s4564_s18  }
  0xb9   :  { %s4378_s25 = scalar_lea.vmem %s187_s30, 8192  ;;  %p4383_p10 = scmp.lt.s32.totalorder %s187_s30, %s187_s30 }
  0xba   :  { %p4379_p9 = scmp.ne.s32.totalorder %s187_s30, %s4378_s25  ;;  %p4384_p11 = scmp.lt.s32.totalorder %s4378_s25, %s4378_s25 }
  0xbc   :  { %p4385_p12 = por %p4384_p11, %p4383_p10 }
  0xbe   :  { %p4386_p13 = pnand %p4385_p12, %p4379_p9 }
  0xc0   :  { %4389 = shalt.err (!%p4386_p13)
}
  0xc1   :  { %192 = dma.hbm_to_vmem [thread:$0]  %s4659_s6, 8192, %s187_s30, [#allocation15], %s4563_s0, %s4563_s0, %s4564_s18  }
  0xc2   :  { %s4577_s8 = smov [#allocation19]   ;;  %s4578_s23 = smov [#allocation22]  }
  0xc3   :  { %s212_s22 = sshll.u32 %s4577_s8, 4  ;;  %s238_s26 = sshll.u32 %s4578_s23, 4  ;;  %s213_s22 = int_to_ptr.vmem [resolvable:$true] %s212_s22  ;;  %s239_s26 = int_to_ptr.vmem [resolvable:$true] %s238_s26 }
  0xc4   :  { %s4398_s20 = scalar_lea.vmem %s213_s22, 8192  ;;  %p4403_p1 = scmp.lt.s32.totalorder %s213_s22, %s213_s22 }
  0xc5   :  { %p4399_p0 = scmp.ne.s32.totalorder %s213_s22, %s4398_s20  ;;  %p4404_p2 = scmp.lt.s32.totalorder %s4398_s20, %s4398_s20 }
  0xc7   :  { %p4405_p3 = por %p4404_p2, %p4403_p1 }
  0xc9   :  { %p4406_p4 = pnand %p4405_p3, %p4399_p0 }
  0xcb   :  { %4409 = shalt.err (!%p4406_p4)
}
  0xcc   :  { %s5522_s24 = sld [smem:[#allocation50_spill]]  ;;  %s4418_s4 = scalar_lea.vmem %s239_s26, 8192 }
  0xcd   :  { %p4419_p5 = scmp.ne.s32.totalorder %s239_s26, %s4418_s4  ;;  %p4423_p6 = scmp.lt.s32.totalorder %s239_s26, %s239_s26 }
  0xce   :  { %p4424_p7 = scmp.lt.s32.totalorder %s4418_s4, %s4418_s4 }
  0xd0   :  { %p4425_p8 = por %p4424_p7, %p4423_p6 }
  0xd2   :  { %218 = dma.hbm_to_vmem [thread:$0]  %s5522_s24, 8192, %s213_s22, [#allocation18], %s4563_s0, %s4563_s0, %s4564_s18  }
  0xd3   :  { %p4426_p9 = pnand %p4425_p8, %p4419_p5 }
  0xd5   :  { %4429 = shalt.err (!%p4426_p9)
}
  0xd6   :  { %s5523_s6 = sld [smem:[#allocation52_spill]]  ;;  %s4579_s28 = smov [#allocation25]  }
  0xd7   :  { %s262_s1 = sshll.u32 %s4579_s28, 4  ;;  %s4580_s2 = smov [#allocation28]   ;;  %s263_s1 = int_to_ptr.vmem [resolvable:$true] %s262_s1 }
  0xd8   :  { %s288_s21 = sshll.u32 %s4580_s2, 4  ;;  %s4438_s29 = scalar_lea.vmem %s263_s1, 8192  ;;  %s289_s21 = int_to_ptr.vmem [resolvable:$true] %s288_s21 }
  0xd9   :  { %p4439_p10 = scmp.ne.s32.totalorder %s263_s1, %s4438_s29  ;;  %p4443_p11 = scmp.lt.s32.totalorder %s263_s1, %s263_s1 }
  0xda   :  { %p4444_p12 = scmp.lt.s32.totalorder %s4438_s29, %s4438_s29 }
  0xdc   :  { %244 = dma.hbm_to_vmem [thread:$0]  %s5523_s6, 8192, %s239_s26, [#allocation21], %s4563_s0, %s4563_s0, %s4564_s18  }
  0xdd   :  { %p4445_p13 = por %p4444_p12, %p4443_p11 }
  0xdf   :  { %p4446_p0 = pnand %p4445_p13, %p4439_p10 }
  0xe1   :  { %4449 = shalt.err (!%p4446_p0)
}
  0xe2   :  { %s5524_s13 = sld [smem:[#allocation53_spill]]  ;;  %s4458_s3 = scalar_lea.vmem %s289_s21, 8192 }
  0xe3   :  { %p4459_p1 = scmp.ne.s32.totalorder %s289_s21, %s4458_s3  ;;  %p4463_p2 = scmp.lt.s32.totalorder %s289_s21, %s289_s21 }
  0xe4   :  { %p4464_p3 = scmp.lt.s32.totalorder %s4458_s3, %s4458_s3 }
  0xe6   :  { %p4465_p4 = por %p4464_p3, %p4463_p2 }
  0xe8   :  { %268 = dma.hbm_to_vmem [thread:$0]  %s5524_s13, 8192, %s263_s1, [#allocation24], %s4563_s0, %s4563_s0, %s4564_s18  }
  0xe9   :  { %p4466_p5 = pnand %p4465_p4, %p4459_p1 }
  0xeb   :  { %4469 = shalt.err (!%p4466_p5)
}
  0xec   :  { %s5525_s7 = sld [smem:[#allocation55_spill]]  ;;  %s4581_s10 = smov [#allocation31]  }
  0xed   :  { %s314_s11 = sshll.u32 %s4581_s10, 4  ;;  %s315_s11 = int_to_ptr.vmem [resolvable:$true] %s314_s11 }
  0xee   :  { %s4478_s5 = scalar_lea.vmem %s315_s11, 4096  ;;  %p4483_p7 = scmp.lt.s32.totalorder %s315_s11, %s315_s11 }
  0xef   :  { %p4479_p6 = scmp.ne.s32.totalorder %s315_s11, %s4478_s5  ;;  %p4484_p8 = scmp.lt.s32.totalorder %s4478_s5, %s4478_s5 }
  0xf1   :  { %p4485_p9 = por %p4484_p8, %p4483_p7 }
  0xf2   :  { %294 = dma.hbm_to_vmem [thread:$0]  %s5525_s7, 8192, %s289_s21, [#allocation27], %s4563_s0, %s4563_s0, %s4564_s18  }
  0xf3   :  { %p4486_p10 = pnand %p4485_p9, %p4479_p6 }
  0xf5   :  { %4489 = shalt.err (!%p4486_p10)
}
  0xf6   :  { %s4582_s17 = smov 128   ;;  %s4583_s15 = smov 8  }
  0xf7   :  { %320 = dma.hbm_to_vmem [thread:$0]  %s4729_s19, 4096, %s315_s11, [#allocation30], %s4582_s17, %s4582_s17, %s4583_s15  }
  0xf8   :  { %4510 = dma.done.wait [#allocation3], 8192  }
  0xf9   :  { %4511 = vsyncadd [#allocation3], 4294959104 }
  0xfa   :  { %4512 = dma.done.wait [#allocation6], 16384  }
  0xfb   :  { %4513 = vsyncadd [#allocation6], 4294950912 }
  0xfc   :  { %4514 = dma.done.wait [#allocation9], 16384  }
  0xfd   :  { %4515 = vsyncadd [#allocation9], 4294950912 }
  0xfe   :  { %4516 = dma.done.wait [#allocation12], 16384  }
  0xff   :  { %4517 = vsyncadd [#allocation12], 4294950912 }
 0x100   :  { %4518 = dma.done.wait [#allocation15], 16384  }
 0x101   :  { %4519 = vsyncadd [#allocation15], 4294950912 }
 0x102   :  { %4520 = dma.done.wait [#allocation18], 16384  }
 0x103   :  { %4521 = vsyncadd [#allocation18], 4294950912 }
 0x104   :  { %4522 = dma.done.wait [#allocation21], 16384  }
 0x105   :  { %4523 = vsyncadd [#allocation21], 4294950912 }
 0x106   :  { %4524 = dma.done.wait [#allocation24], 16384  }
 0x107   :  { %4525 = vsyncadd [#allocation24], 4294950912 }
 0x108   :  { %4526 = dma.done.wait [#allocation27], 16384  }
 0x109   :  { %4527 = vsyncadd [#allocation27], 4294950912 }
 0x10a   :  { %4528 = dma.done.wait [#allocation30], 12288  }
 0x10b   :  { %4529 = vsyncadd [#allocation30], 4294955008  ;;  %s5526_s19 = sld [smem:[#allocation45_spill]]  ;;  %v4584_v0 = vmov 0   ;;  %v491_v2 = vld [vmem:[#allocation5 + $0xf8] sm:$0xff]  ;;  %v490_v3 = vld [vmem:[#allocation5 + $0xf0] sm:$0xff] }
 0x10c   :  { %s5527_s0 = sld [smem:[#allocation46_spill]]  ;;  %4108 = vset.pattern.permute.xlu0 %v4584_v0  ;;  %4109 = vset.pattern.permute.xlu1 %v4584_v0  ;;  %v489_v4 = vld [vmem:[#allocation5 + $0xe8] sm:$0xff]  ;;  %v488_v7 = vld [vmem:[#allocation5 + $0xe0] sm:$0xff]  ;;  %v487_v8 = vld [vmem:[#allocation5 + $0xd8] sm:$0xff] }
 0x10d   :  { %681 = vmatprep.subr.mxu0 %v491_v2  ;;  %v486_v9 = vld [vmem:[#allocation5 + $0xd0] sm:$0xff]  ;;  %v485_v11 = vld [vmem:[#allocation5 + $0xc8] sm:$0xff]  ;;  %v484_v12 = vld [vmem:[#allocation5 + $0xc0] sm:$0xff]  ;;  %s5528_s18 = sld [smem:[#allocation44_spill]] }
 0x10e   :  { %682 = vmatpush1.msra.mxu0 %v490_v3  ;;  %v483_v14 = vld [vmem:[#allocation5 + $0xb8] sm:$0xff]  ;;  %v482_v15 = vld [vmem:[#allocation5 + $0xb0] sm:$0xff]  ;;  %v481_v17 = vld [vmem:[#allocation5 + $0xa8] sm:$0xff]  ;;  %s5529_s14 = sld [smem:[#allocation47_spill]] }
 0x10f   :  { %683 = vmatprep.subr.mxu0 %v489_v4  ;;  %v480_v18 = vld [vmem:[#allocation5 + $0xa0] sm:$0xff]  ;;  %v479_v20 = vld [vmem:[#allocation5 + $0x98] sm:$0xff]  ;;  %v478_v21 = vld [vmem:[#allocation5 + $0x90] sm:$0xff]  ;;  %s5530_s30 = sld [smem:[#allocation48_spill]] }
 0x110   :  { %684 = vmatpush1.msra.mxu0 %v488_v7  ;;  %v477_v23 = vld [vmem:[#allocation5 + $0x88] sm:$0xff]  ;;  %v476_v24 = vld [vmem:[#allocation5 + $0x80] sm:$0xff]  ;;  %v475_v25 = vld [vmem:[#allocation5 + $0x78] sm:$0xff]  ;;  %s5531_s16 = sld [smem:[#allocation49_spill]] }
 0x111   :  { %v388_v1 = vld [vmem:[%s5526_s19] sm:$0xff]  ;;  %v389_v5 = vld [vmem:[%s5526_s19 + $0x8] sm:$0xff]  ;;  %685 = vmatprep.subr.mxu0 %v487_v8  ;;  %v390_v13 = vld [vmem:[%s5526_s19 + $0x10] sm:$0xff]  ;;  %s5532_s25 = sld [smem:[#allocation51_spill]] }
 0x112   :  { %610 = vperm.xlu0 %4108, %v388_v1   ;;  %615 = vperm.xlu1 %4109, %v389_v5   ;;  %v392_v6 = vld [vmem:[%s5527_s0] sm:$0xff]  ;;  %v393_v10 = vld [vmem:[%s5527_s0 + $0x8] sm:$0xff]  ;;  %v394_v16 = vld [vmem:[%s5527_s0 + $0x10] sm:$0xff]  ;;  %s5533_s8 = sld [smem:[#allocation54_spill]] }
 0x113   :  { %686 = vmatpush1.msra.mxu0 %v486_v9  ;;  %v391_v19 = vld [vmem:[%s5526_s19 + $0x18] sm:$0xff]  ;;  %v474_v26 = vld [vmem:[#allocation5 + $0x70] sm:$0xff]  ;;  %v473_v27 = vld [vmem:[#allocation5 + $0x68] sm:$0xff] }
 0x114   :  { %687 = vmatprep.subr.mxu0 %v485_v11  ;;  %v395_v22 = vld [vmem:[%s5527_s0 + $0x18] sm:$0xff]  ;;  %v472_v28 = vld [vmem:[#allocation5 + $0x60] sm:$0xff]  ;;  %v470_v30 = vld [vmem:[#allocation5 + $0x50] sm:$0xff] }
 0x115   :  { %688 = vmatpush1.msra.mxu0 %v484_v12  ;;  %v471_v29 = vld [vmem:[#allocation5 + $0x58] sm:$0xff]  ;;  %v469_v31 = vld [vmem:[#allocation5 + $0x48] sm:$0xff]  ;;  %v468_v32 = vld [vmem:[#allocation5 + $0x40] sm:$0xff] }
 0x116   :  { %655 = vperm.xlu0 %4108, %v392_v6   ;;  %660 = vperm.xlu1 %4109, %v393_v10   ;;  %v467_v33 = vld [vmem:[#allocation5 + $0x38] sm:$0xff]  ;;  %v466_v34 = vld [vmem:[#allocation5 + $0x30] sm:$0xff]  ;;  %v465_v36 = vld [vmem:[#allocation5 + $0x28] sm:$0xff] }
 0x117   :  { %689 = vmatprep.subr.mxu0 %v483_v14  ;;  %v427_v35 = vld [vmem:[#allocation2 + $0xf8] sm:$0xff]  ;;  %v426_v37 = vld [vmem:[#allocation2 + $0xf0] sm:$0xff]  ;;  %v4826_v38 = vld [vmem:[%s5528_s18 + $0x8] sm:$0xff] }
 0x118   :  { %690 = vmatpush1.msra.mxu0 %v482_v15  ;;  %770 = vmatprep.subr.mxu1 %v427_v35  ;;  %v464_v39 = vld [vmem:[#allocation5 + $0x20] sm:$0xff]  ;;  %v425_v40 = vld [vmem:[#allocation2 + $0xe8] sm:$0xff]  ;;  %v463_v42 = vld [vmem:[#allocation5 + $0x18] sm:$0xff] }
 0x119   :  { %691 = vmatprep.subr.mxu0 %v481_v17  ;;  %771 = vmatpush1.msra.mxu1 %v426_v37  ;;  %v424_v41 = vld [vmem:[#allocation2 + $0xe0] sm:$0xff]  ;;  %v423_v43 = vld [vmem:[#allocation2 + $0xd8] sm:$0xff]  ;;  %v462_v44 = vld [vmem:[#allocation5 + $0x10] sm:$0xff] }
 0x11a   :  { %620 = vperm.xlu0 %4108, %v390_v13   ;;  %665 = vperm.xlu1 %4109, %v394_v16   ;;  %v422_v45 = vld [vmem:[#allocation2 + $0xd0] sm:$0xff]  ;;  %v461_v46 = vld [vmem:[#allocation5 + $0x8] sm:$0xff]  ;;  %v460_v48 = vld [vmem:[#allocation5] sm:$0xff] }
 0x11b   :  { %692 = vmatpush1.msra.mxu0 %v480_v18  ;;  %745 = vmatprep.mubr.f32.mxu0 %v4826_v38  ;;  %v421_v47 = vld [vmem:[#allocation2 + $0xc8] sm:$0xff]  ;;  %v420_v49 = vld [vmem:[#allocation2 + $0xc0] sm:$0xff]  ;;  %v523_v50 = vld [vmem:[#allocation5 + $0x1f8] sm:$0xff] }
 0x11c   :  { %693 = vmatprep.subr.mxu0 %v479_v20  ;;  %772 = vmatprep.subr.mxu1 %v425_v40  ;;  %v419_v51 = vld [vmem:[#allocation2 + $0xb8] sm:$0xff]  ;;  %v522_v52 = vld [vmem:[#allocation5 + $0x1f0] sm:$0xff]  ;;  %v521_v54 = vld [vmem:[#allocation5 + $0x1e8] sm:$0xff] }
 0x11d   :  { %694 = vmatpush1.msra.mxu0 %v478_v21  ;;  %773 = vmatpush1.msra.mxu1 %v424_v41  ;;  %v418_v53 = vld [vmem:[#allocation2 + $0xb0] sm:$0xff]  ;;  %v417_v55 = vld [vmem:[#allocation2 + $0xa8] sm:$0xff]  ;;  %v520_v56 = vld [vmem:[#allocation5 + $0x1e0] sm:$0xff] }
 0x11e   :  { %625 = vperm.xlu0 %4108, %v391_v19   ;;  %670 = vperm.xlu1 %4109, %v395_v22   ;;  %v416_v57 = vld [vmem:[#allocation2 + $0xa0] sm:$0xff]  ;;  %v519_v58 = vld [vmem:[#allocation5 + $0x1d8] sm:$0xff]  ;;  %v518_v60 = vld [vmem:[#allocation5 + $0x1d0] sm:$0xff] }
 0x11f   :  { %695 = vmatprep.subr.mxu0 %v477_v23  ;;  %774 = vmatprep.subr.mxu1 %v423_v43  ;;  %v415_v59 = vld [vmem:[#allocation2 + $0x98] sm:$0xff]  ;;  %v414_v61 = vld [vmem:[#allocation2 + $0x90] sm:$0xff]  ;;  %v517_v62 = vld [vmem:[#allocation5 + $0x1c8] sm:$0xff] }
 0x120   :  { %696 = vmatpush1.msra.mxu0 %v476_v24  ;;  %775 = vmatpush1.msra.mxu1 %v422_v45  ;;  %v413_v63 = vld [vmem:[#allocation2 + $0x88] sm:$0xff]  ;;  %v516_v0 = vld [vmem:[#allocation5 + $0x1c0] sm:$0xff]  ;;  %v515_v2 = vld [vmem:[#allocation5 + $0x1b8] sm:$0xff] }
 0x121   :  { %697 = vmatprep.subr.mxu0 %v475_v25  ;;  %776 = vmatprep.subr.mxu1 %v421_v47  ;;  %v412_v1 = vld [vmem:[#allocation2 + $0x80] sm:$0xff]  ;;  %v411_v3 = vld [vmem:[#allocation2 + $0x78] sm:$0xff]  ;;  %v514_v4 = vld [vmem:[#allocation5 + $0x1b0] sm:$0xff] }
 0x122   :  { %698 = vmatpush1.msra.mxu0 %v474_v26  ;;  %777 = vmatpush1.msra.mxu1 %v420_v49  ;;  %v410_v5 = vld [vmem:[#allocation2 + $0x70] sm:$0xff]  ;;  %v513_v6 = vld [vmem:[#allocation5 + $0x1a8] sm:$0xff]  ;;  %v512_v8 = vld [vmem:[#allocation5 + $0x1a0] sm:$0xff] }
 0x123   :  { %699 = vmatprep.subr.mxu0 %v473_v27  ;;  %778 = vmatprep.subr.mxu1 %v419_v51  ;;  %v409_v7 = vld [vmem:[#allocation2 + $0x68] sm:$0xff]  ;;  %v408_v9 = vld [vmem:[#allocation2 + $0x60] sm:$0xff]  ;;  %v511_v10 = vld [vmem:[#allocation5 + $0x198] sm:$0xff] }
 0x124   :  { %700 = vmatpush1.msra.mxu0 %v472_v28  ;;  %779 = vmatpush1.msra.mxu1 %v418_v53  ;;  %v407_v11 = vld [vmem:[#allocation2 + $0x58] sm:$0xff]  ;;  %v510_v12 = vld [vmem:[#allocation5 + $0x190] sm:$0xff]  ;;  %v509_v14 = vld [vmem:[#allocation5 + $0x188] sm:$0xff] }
 0x125   :  { %701 = vmatprep.subr.mxu0 %v471_v29  ;;  %780 = vmatprep.subr.mxu1 %v417_v55  ;;  %v406_v13 = vld [vmem:[#allocation2 + $0x50] sm:$0xff]  ;;  %v405_v15 = vld [vmem:[#allocation2 + $0x48] sm:$0xff]  ;;  %v508_v16 = vld [vmem:[#allocation5 + $0x180] sm:$0xff] }
 0x126   :  { %702 = vmatpush1.msra.mxu0 %v470_v30  ;;  %781 = vmatpush1.msra.mxu1 %v416_v57  ;;  %v404_v17 = vld [vmem:[#allocation2 + $0x40] sm:$0xff]  ;;  %v507_v18 = vld [vmem:[#allocation5 + $0x178] sm:$0xff]  ;;  %v506_v20 = vld [vmem:[#allocation5 + $0x170] sm:$0xff] }
 0x127   :  { %703 = vmatprep.subr.mxu0 %v469_v31  ;;  %782 = vmatprep.subr.mxu1 %v415_v59  ;;  %v403_v19 = vld [vmem:[#allocation2 + $0x38] sm:$0xff]  ;;  %v402_v21 = vld [vmem:[#allocation2 + $0x30] sm:$0xff]  ;;  %v505_v22 = vld [vmem:[#allocation5 + $0x168] sm:$0xff] }
 0x128   :  { %704 = vmatpush1.msra.mxu0 %v468_v32  ;;  %783 = vmatpush1.msra.mxu1 %v414_v61  ;;  %v401_v23 = vld [vmem:[#allocation2 + $0x28] sm:$0xff]  ;;  %v504_v24 = vld [vmem:[#allocation5 + $0x160] sm:$0xff]  ;;  %v503_v26 = vld [vmem:[#allocation5 + $0x158] sm:$0xff] }
 0x129   :  { %705 = vmatprep.subr.mxu0 %v467_v33  ;;  %784 = vmatprep.subr.mxu1 %v413_v63  ;;  %v400_v25 = vld [vmem:[#allocation2 + $0x20] sm:$0xff]  ;;  %v399_v27 = vld [vmem:[#allocation2 + $0x18] sm:$0xff]  ;;  %v502_v28 = vld [vmem:[#allocation5 + $0x150] sm:$0xff] }
 0x12a   :  { %706 = vmatpush1.msra.mxu0 %v466_v34  ;;  %785 = vmatpush1.msra.mxu1 %v412_v1  ;;  %v398_v29 = vld [vmem:[#allocation2 + $0x10] sm:$0xff]  ;;  %v501_v30 = vld [vmem:[#allocation5 + $0x148] sm:$0xff]  ;;  %v500_v32 = vld [vmem:[#allocation5 + $0x140] sm:$0xff] }
 0x12b   :  { %707 = vmatprep.subr.mxu0 %v465_v36  ;;  %786 = vmatprep.subr.mxu1 %v411_v3  ;;  %v397_v31 = vld [vmem:[#allocation2 + $0x8] sm:$0xff]  ;;  %v396_v33 = vld [vmem:[#allocation2] sm:$0xff]  ;;  %v499_v34 = vld [vmem:[#allocation5 + $0x138] sm:$0xff] }
 0x12c   :  { %708 = vmatpush1.msra.mxu0 %v464_v39  ;;  %787 = vmatpush1.msra.mxu1 %v410_v5  ;;  %v459_v35 = vld [vmem:[#allocation2 + $0x1f8] sm:$0xff]  ;;  %v498_v36 = vld [vmem:[#allocation5 + $0x130] sm:$0xff]  ;;  %v497_v39 = vld [vmem:[#allocation5 + $0x128] sm:$0xff] }
 0x12d   :  { %709 = vmatprep.subr.mxu0 %v463_v42  ;;  %788 = vmatprep.subr.mxu1 %v409_v7  ;;  %v458_v37 = vld [vmem:[#allocation2 + $0x1f0] sm:$0xff]  ;;  %v457_v40 = vld [vmem:[#allocation2 + $0x1e8] sm:$0xff]  ;;  %v496_v41 = vld [vmem:[#allocation5 + $0x120] sm:$0xff] }
 0x12e   :  { %710 = vmatpush1.msra.mxu0 %v462_v44  ;;  %789 = vmatpush1.msra.mxu1 %v408_v9  ;;  %v456_v42 = vld [vmem:[#allocation2 + $0x1e0] sm:$0xff]  ;;  %v495_v43 = vld [vmem:[#allocation5 + $0x118] sm:$0xff]  ;;  %v494_v45 = vld [vmem:[#allocation5 + $0x110] sm:$0xff] }
 0x12f   :  { %711 = vmatprep.subr.mxu0 %v461_v46  ;;  %790 = vmatprep.subr.mxu1 %v407_v11  ;;  %v455_v44 = vld [vmem:[#allocation2 + $0x1d8] sm:$0xff]  ;;  %v454_v46 = vld [vmem:[#allocation2 + $0x1d0] sm:$0xff]  ;;  %v493_v47 = vld [vmem:[#allocation5 + $0x108] sm:$0xff] }
 0x130   :  { %712 = vmatpush1.msra.mxu0 %v460_v48  ;;  %791 = vmatpush1.msra.mxu1 %v406_v13  ;;  %v453_v48 = vld [vmem:[#allocation2 + $0x1c8] sm:$0xff]  ;;  %v492_v49 = vld [vmem:[#allocation5 + $0x100] sm:$0xff]  ;;  %v554_v53 = vld [vmem:[#allocation7 + $0xf0] sm:$0xff] }
 0x131   :  { %713 = vmatprep.subr.mxu0 %v523_v50  ;;  %792 = vmatprep.subr.mxu1 %v405_v15  ;;  %v452_v50 = vld [vmem:[#allocation2 + $0x1c0] sm:$0xff]  ;;  %v553_v55 = vld [vmem:[#allocation7 + $0xe8] sm:$0xff]  ;;  %v551_v59 = vld [vmem:[#allocation7 + $0xd8] sm:$0xff] }
 0x132   :  { %714 = vmatpush2.msra.mxu0 %v522_v52  ;;  %793 = vmatpush1.msra.mxu1 %v404_v17  ;;  %v4830_v51 = vld [vmem:[%s5528_s18] sm:$0xff]  ;;  %v555_v52 = vld [vmem:[#allocation7 + $0xf8] sm:$0xff]  ;;  %v550_v61 = vld [vmem:[#allocation7 + $0xd0] sm:$0xff] }
 0x133   :  { %715 = vmatprep.subr.mxu0 %v521_v54  ;;  %794 = vmatprep.subr.mxu1 %v403_v19  ;;  %v451_v54 = vld [vmem:[#allocation2 + $0x1b8] sm:$0xff]  ;;  %v552_v57 = vld [vmem:[#allocation7 + $0xe0] sm:$0xff]  ;;  %v549_v63 = vld [vmem:[#allocation7 + $0xc8] sm:$0xff] }
 0x134   :  { %716 = vmatpush2.msra.mxu0 %v520_v56  ;;  %795 = vmatpush1.msra.mxu1 %v402_v21  ;;  %v450_v56 = vld [vmem:[#allocation2 + $0x1b0] sm:$0xff]  ;;  %v548_v1 = vld [vmem:[#allocation7 + $0xc0] sm:$0xff]  ;;  %v547_v3 = vld [vmem:[#allocation7 + $0xb8] sm:$0xff] }
 0x135   :  { %717 = vmatprep.subr.mxu0 %v519_v58  ;;  %796 = vmatprep.subr.mxu1 %v401_v23  ;;  %v449_v58 = vld [vmem:[#allocation2 + $0x1a8] sm:$0xff]  ;;  %v546_v5 = vld [vmem:[#allocation7 + $0xb0] sm:$0xff]  ;;  %v544_v9 = vld [vmem:[#allocation7 + $0xa0] sm:$0xff] }
 0x136   :  { %718 = vmatpush2.msra.mxu0 %v518_v60  ;;  %797 = vmatpush1.msra.mxu1 %v400_v25  ;;  %v448_v60 = vld [vmem:[#allocation2 + $0x1a0] sm:$0xff]  ;;  %v545_v7 = vld [vmem:[#allocation7 + $0xa8] sm:$0xff]  ;;  %v543_v11 = vld [vmem:[#allocation7 + $0x98] sm:$0xff] }
 0x137   :  { %719 = vmatprep.subr.mxu0 %v517_v62  ;;  %798 = vmatprep.subr.mxu1 %v399_v27  ;;  %v447_v62 = vld [vmem:[#allocation2 + $0x198] sm:$0xff]  ;;  %v542_v13 = vld [vmem:[#allocation7 + $0x90] sm:$0xff]  ;;  %v541_v15 = vld [vmem:[#allocation7 + $0x88] sm:$0xff] }
 0x138   :  { %720 = vmatpush2.msra.mxu0 %v516_v0  ;;  %799 = vmatpush1.msra.mxu1 %v398_v29  ;;  %v446_v0 = vld [vmem:[#allocation2 + $0x190] sm:$0xff]  ;;  %v540_v17 = vld [vmem:[#allocation7 + $0x80] sm:$0xff]  ;;  %v539_v19 = vld [vmem:[#allocation7 + $0x78] sm:$0xff] }
 0x139   :  { %721 = vmatprep.subr.mxu0 %v515_v2  ;;  %800 = vmatprep.subr.mxu1 %v397_v31  ;;  %v445_v2 = vld [vmem:[#allocation2 + $0x188] sm:$0xff]  ;;  %v538_v21 = vld [vmem:[#allocation7 + $0x70] sm:$0xff]  ;;  %v536_v25 = vld [vmem:[#allocation7 + $0x60] sm:$0xff] }
 0x13a   :  { %722 = vmatpush2.msra.mxu0 %v514_v4  ;;  %801 = vmatpush1.msra.mxu1 %v396_v33  ;;  %v444_v4 = vld [vmem:[#allocation2 + $0x180] sm:$0xff]  ;;  %v537_v23 = vld [vmem:[#allocation7 + $0x68] sm:$0xff]  ;;  %v535_v27 = vld [vmem:[#allocation7 + $0x58] sm:$0xff] }
 0x13b   :  { %723 = vmatprep.subr.mxu0 %v513_v6  ;;  %802 = vmatprep.subr.mxu1 %v459_v35  ;;  %v443_v6 = vld [vmem:[#allocation2 + $0x178] sm:$0xff]  ;;  %v534_v29 = vld [vmem:[#allocation7 + $0x50] sm:$0xff]  ;;  %v533_v31 = vld [vmem:[#allocation7 + $0x48] sm:$0xff] }
 0x13c   :  { %724 = vmatpush2.msra.mxu0 %v512_v8  ;;  %803 = vmatpush2.msra.mxu1 %v458_v37  ;;  %v442_v8 = vld [vmem:[#allocation2 + $0x170] sm:$0xff]  ;;  %v532_v33 = vld [vmem:[#allocation7 + $0x40] sm:$0xff]  ;;  %v531_v35 = vld [vmem:[#allocation7 + $0x38] sm:$0xff] }
 0x13d   :  { %725 = vmatprep.subr.mxu0 %v511_v10  ;;  %804 = vmatprep.subr.mxu1 %v457_v40  ;;  %v441_v10 = vld [vmem:[#allocation2 + $0x168] sm:$0xff]  ;;  %v530_v37 = vld [vmem:[#allocation7 + $0x30] sm:$0xff] }
 0x13e   :  { %726 = vmatpush2.msra.mxu0 %v510_v12  ;;  %805 = vmatpush2.msra.mxu1 %v456_v42  ;;  %v440_v12 = vld [vmem:[#allocation2 + $0x160] sm:$0xff]  ;;  %v529_v40 = vld [vmem:[#allocation7 + $0x28] sm:$0xff]  ;;  %v430_v42 = vld [vmem:[#allocation2 + $0x110] sm:$0xff] }
 0x13f   :  { %727 = vmatprep.subr.mxu0 %v509_v14  ;;  %806 = vmatprep.subr.mxu1 %v455_v44  ;;  %v439_v14 = vld [vmem:[#allocation2 + $0x158] sm:$0xff] }
 0x140   :  { %728 = vmatpush2.msra.mxu0 %v508_v16  ;;  %807 = vmatpush2.msra.mxu1 %v454_v46  ;;  %v4834_v16 = vld [vmem:[%s5528_s18 + $0x18] sm:$0xff]  ;;  %v429_v46 = vld [vmem:[#allocation2 + $0x108] sm:$0xff] }
 0x141   :  { %729 = vmatprep.subr.mxu0 %v507_v18  ;;  %808 = vmatprep.subr.mxu1 %v453_v48  ;;  %v438_v18 = vld [vmem:[#allocation2 + $0x150] sm:$0xff]  ;;  %v4850_v44 = vld [vmem:[%s5528_s18 + $0x38] sm:$0xff] }
 0x142   :  { %730 = vmatpush2.msra.mxu0 %v506_v20  ;;  %809 = vmatpush2.msra.mxu1 %v452_v50  ;;  %v4837_v20 = vld [vmem:[%s5528_s18 + $0x10] sm:$0xff]  ;;  %v524_v50 = vld [vmem:[#allocation7] sm:$0xff] }
 0x143   :  { %731 = vmatprep.subr.mxu0 %v505_v22  ;;  %810 = vmatprep.subr.mxu1 %v451_v54  ;;  %v437_v22 = vld [vmem:[#allocation2 + $0x148] sm:$0xff]  ;;  %v4854_v48 = vld [vmem:[%s5528_s18 + $0x30] sm:$0xff] }
 0x144   :  { %732 = vmatpush2.msra.mxu0 %v504_v24  ;;  %811 = vmatpush2.msra.mxu1 %v450_v56  ;;  %v436_v24 = vld [vmem:[#allocation2 + $0x140] sm:$0xff]  ;;  %v585_v54 = vld [vmem:[#allocation7 + $0x1e8] sm:$0xff]  ;;  %v583_v56 = vld [vmem:[#allocation7 + $0x1d8] sm:$0xff] }
 0x145   :  { %733 = vmatprep.subr.mxu0 %v503_v26  ;;  %812 = vmatprep.subr.mxu1 %v449_v58  ;;  %v435_v26 = vld [vmem:[#allocation2 + $0x138] sm:$0xff]  ;;  %v581_v58 = vld [vmem:[#allocation7 + $0x1c8] sm:$0xff] }
 0x146   :  { %734 = vmatpush2.msra.mxu0 %v502_v28  ;;  %813 = vmatpush2.msra.mxu1 %v448_v60  ;;  %v4842_v28 = vld [vmem:[%s5528_s18 + $0x28] sm:$0xff]  ;;  %v579_v60 = vld [vmem:[#allocation7 + $0x1b8] sm:$0xff] }
 0x147   :  { %735 = vmatprep.subr.mxu0 %v501_v30  ;;  %814 = vmatprep.subr.mxu1 %v447_v62  ;;  %v434_v30 = vld [vmem:[#allocation2 + $0x130] sm:$0xff]  ;;  %v577_v62 = vld [vmem:[#allocation7 + $0x1a8] sm:$0xff] }
 0x148   :  { %736 = vmatpush2.msra.mxu0 %v500_v32  ;;  %815 = vmatpush2.msra.mxu1 %v446_v0  ;;  %v4845_v32 = vld [vmem:[%s5528_s18 + $0x20] sm:$0xff]  ;;  %v575_v0 = vld [vmem:[#allocation7 + $0x198] sm:$0xff] }
 0x149   :  { %737 = vmatprep.subr.mxu0 %v499_v34  ;;  %816 = vmatprep.subr.mxu1 %v445_v2  ;;  %v433_v34 = vld [vmem:[#allocation2 + $0x128] sm:$0xff] }
 0x14a   :  { %738 = vmatpush2.msra.mxu0 %v498_v36  ;;  %817 = vmatpush2.msra.mxu1 %v444_v4  ;;  %v432_v36 = vld [vmem:[#allocation2 + $0x120] sm:$0xff]  ;;  %v573_v2 = vld [vmem:[#allocation7 + $0x188] sm:$0xff]  ;;  %v571_v4 = vld [vmem:[#allocation7 + $0x178] sm:$0xff] }
 0x14b   :  { %739 = vmatprep.subr.mxu0 %v497_v39  ;;  %818 = vmatprep.subr.mxu1 %v443_v6  ;;  %v431_v39 = vld [vmem:[#allocation2 + $0x118] sm:$0xff]  ;;  %v597_v6 = vlaneseq }
 0x14c   :  { %740 = vmatpush2.msra.mxu0 %v496_v41  ;;  %819 = vmatpush2.msra.mxu1 %v442_v8  ;;  %v528_v41 = vld [vmem:[#allocation7 + $0x20] sm:$0xff] }
 0x14d   :  { %741 = vmatprep.subr.mxu0 %v495_v43  ;;  %820 = vmatprep.subr.mxu1 %v441_v10  ;;  %v527_v43 = vld [vmem:[#allocation7 + $0x18] sm:$0xff]  ;;  %v568_v8 = vld [vmem:[#allocation7 + $0x160] sm:$0xff]  ;;  %v4857_v10 = vshrl.u32 %v597_v6, 7 }
 0x14e   :  { %742 = vmatpush2.msra.mxu0 %v494_v45  ;;  %821 = vmatpush2.msra.mxu1 %v440_v12  ;;  %v526_v45 = vld [vmem:[#allocation7 + $0x10] sm:$0xff]  ;;  %v565_v12 = vld [vmem:[#allocation7 + $0x148] sm:$0xff] }
 0x14f   :  { %743 = vmatprep.subr.mxu0 %v493_v47  ;;  %822 = vmatprep.subr.mxu1 %v439_v14  ;;  %v525_v47 = vld [vmem:[#allocation7 + $0x8] sm:$0xff]  ;;  %v590_v14 = vrot.slane %v4826_v38, 7  ;;  %vm599_vm0 = vcmp.lt.s32.totalorder %v4857_v10, 1  ;;  %vm644_vm1 = vcmp.lt.s32.totalorder %v4857_v10, 7 }
 0x150   :  { %744 = vmatpush2.msra.mxu0 %v492_v49  ;;  %823 = vmatpush2.msra.mxu1 %v438_v18  ;;  %v428_v49 = vld [vmem:[#allocation2 + $0x100] sm:$0xff]  ;;  %v596_v18 = vrot.slane %v4850_v44, 7 }
 0x151   :  { %746 = vmatmul.mubr.f32.vlgmr.msra.gmra.mxu0 %v4830_v51  ;;  %859 = vmatprep.subr.mxu0 %v555_v52  ;;  %v587_v52 = vld [vmem:[#allocation7 + $0x1f8] sm:$0xff] }
 0x152   :  { %860 = vmatpush1.msra.mxu0 %v554_v53  ;;  %751 = vmatprep.mubr.f32.mxu0 %v4834_v16  ;;  %v586_v53 = vld [vmem:[#allocation7 + $0x1f0] sm:$0xff] }
 0x153   :  { %861 = vmatprep.subr.mxu0 %v553_v55  ;;  %824 = vmatprep.subr.mxu1 %v437_v22  ;;  %v584_v55 = vld [vmem:[#allocation7 + $0x1e0] sm:$0xff]  ;;  %v562_v22 = vld [vmem:[#allocation7 + $0x130] sm:$0xff] }
 0x154   :  { %862 = vmatpush1.msra.mxu0 %v552_v57  ;;  %825 = vmatpush2.msra.mxu1 %v436_v24  ;;  %v582_v57 = vld [vmem:[#allocation7 + $0x1d0] sm:$0xff]  ;;  %v639_v24 = vrot.slane %v4834_v16, 1 }
 0x155   :  { %863 = vmatprep.subr.mxu0 %v551_v59  ;;  %752 = vmatmul.mubr.f32.gmra.mxu0 %v4837_v20  ;;  %v580_v59 = vld [vmem:[#allocation7 + $0x1c0] sm:$0xff] }
 0x156   :  { %864 = vmatpush1.msra.mxu0 %v550_v61  ;;  %826 = vmatprep.subr.mxu1 %v435_v26  ;;  %v578_v61 = vld [vmem:[#allocation7 + $0x1b0] sm:$0xff]  ;;  %v591_v26 = vrot.slane %v4837_v20, 7 }
 0x157   :  { %865 = vmatprep.subr.mxu0 %v549_v63  ;;  %757 = vmatprep.mubr.f32.mxu0 %v4842_v28  ;;  %v576_v63 = vld [vmem:[#allocation7 + $0x1a0] sm:$0xff] }
 0x158   :  { %866 = vmatpush1.msra.mxu0 %v548_v1  ;;  %827 = vmatpush2.msra.mxu1 %v434_v30  ;;  %v574_v1 = vld [vmem:[#allocation7 + $0x190] sm:$0xff]  ;;  %v638_v30 = vrot.slane %v4837_v20, 1 }
 0x159   :  { %867 = vmatprep.subr.mxu0 %v547_v3  ;;  %758 = vmatmul.mubr.f32.gmra.mxu0 %v4845_v32  ;;  %v572_v3 = vld [vmem:[#allocation7 + $0x180] sm:$0xff] }
 0x15a   :  { %868 = vmatpush1.msra.mxu0 %v546_v5  ;;  %828 = vmatprep.subr.mxu1 %v433_v34  ;;  %v570_v5 = vld [vmem:[#allocation7 + $0x170] sm:$0xff]  ;;  %v641_v34 = vrot.slane %v4842_v28, 1 }
 0x15b   :  { %869 = vmatprep.subr.mxu0 %v545_v7  ;;  %829 = vmatpush2.msra.mxu1 %v432_v36  ;;  %v569_v7 = vld [vmem:[#allocation7 + $0x168] sm:$0xff] }
 0x15c   :  { %870 = vmatpush1.msra.mxu0 %v544_v9  ;;  %830 = vmatprep.subr.mxu1 %v431_v39  ;;  %v567_v9 = vld [vmem:[#allocation7 + $0x158] sm:$0xff] }
 0x15d   :  { %871 = vmatprep.subr.mxu0 %v543_v11  ;;  %763 = vmatprep.mubr.f32.mxu0 %v4850_v44  ;;  %v566_v11 = vld [vmem:[#allocation7 + $0x150] sm:$0xff] }
 0x15e   :  { %872 = vmatpush1.msra.mxu0 %v542_v13  ;;  %831 = vmatpush2.msra.mxu1 %v430_v42  ;;  %v564_v13 = vld [vmem:[#allocation7 + $0x140] sm:$0xff] }
 0x15f   :  { %873 = vmatprep.subr.mxu0 %v541_v15  ;;  %764 = vmatmul.mubr.f32.gmra.mxu0 %v4854_v48  ;;  %v589_v15 = vrot.slane %v4830_v51, 7 }
 0x160   :  { %874 = vmatpush1.msra.mxu0 %v540_v17  ;;  %832 = vmatprep.subr.mxu1 %v429_v46  ;;  %v563_v17 = vld [vmem:[#allocation7 + $0x138] sm:$0xff] }
 0x161   :  { %875 = vmatprep.subr.mxu0 %v539_v19  ;;  %833 = vmatpush2.msra.mxu1 %v428_v49  ;;  %v595_v19 = vrot.slane %v4854_v48, 7  ;;  %v604_v46 = vsel %vm599_vm0, %v589_v15, %v591_v26  ;;  %v594_v49 = vrot.slane %v4842_v28, 7  ;;  %v642_v28 = vrot.slane %v4854_v48, 1  ;;  %v1089_v48 = vld [vmem:[#allocation10 + $0xd0] sm:$0xff] }
 0x162   :  { %876 = vmatpush1.msra.mxu0 %v538_v21  ;;  %v592_v21 = vrot.slane %v4834_v16, 7 }
 0x163   :  { %877 = vmatprep.subr.mxu0 %v537_v23  ;;  %v637_v23 = vrot.slane %v4826_v38, 1  ;;  %v606_v16 = vsel %vm599_vm0, %v595_v19, %v589_v15 }
 0x164   :  { %878 = vmatpush1.msra.mxu0 %v536_v25  ;;  %v561_v25 = vld [vmem:[#allocation7 + $0x128] sm:$0xff]  ;;  %v605_v36 = vsel %vm599_vm0, %v590_v14, %v592_v21 }
 0x165   :  { %879 = vmatprep.subr.mxu0 %v535_v27  ;;  %v560_v27 = vld [vmem:[#allocation7 + $0x120] sm:$0xff]  ;;  %v650_v39 = vsel %vm644_vm1, %v637_v23, %v639_v24 }
 0x166   :  { %880 = vmatpush1.msra.mxu0 %v534_v29  ;;  %v636_v29 = vrot.slane %v4830_v51, 1  ;;  %v1028_v51 = vld [vmem:[#allocation8 + $0xe8] sm:$0xff] }
 0x167   :  { %881 = vmatprep.subr.mxu0 %v533_v31  ;;  %v607_v31 = vsel %vm599_vm0, %v596_v18, %v590_v14 }
 0x168   :  { %882 = vmatpush1.msra.mxu0 %v532_v33  ;;  %v559_v33 = vld [vmem:[#allocation7 + $0x118] sm:$0xff]  ;;  %v651_v38 = vsel %vm644_vm1, %v642_v28, %v636_v29 }
 0x169   :  { %883 = vmatprep.subr.mxu0 %v531_v35  ;;  %v558_v35 = vld [vmem:[#allocation7 + $0x110] sm:$0xff] }
 0x16a   :  { %884 = vmatpush1.msra.mxu0 %v530_v37  ;;  %v557_v37 = vld [vmem:[#allocation7 + $0x108] sm:$0xff] }
 0x16b   :  { %885 = vmatprep.subr.mxu0 %v529_v40  ;;  %v640_v40 = vrot.slane %v4845_v32, 1 }
 0x16c   :  { %886 = vmatpush1.msra.mxu0 %v528_v41 }
 0x16d   :  { %887 = vmatprep.subr.mxu0 %v527_v43 }
 0x16e   :  { %888 = vmatpush1.msra.mxu0 %v526_v45  ;;  %v556_v45 = vld [vmem:[#allocation7 + $0x100] sm:$0xff] }
 0x16f   :  { %889 = vmatprep.subr.mxu0 %v525_v47  ;;  %v649_v47 = vsel %vm644_vm1, %v636_v29, %v638_v30  ;;  %v1085_v29 = vld [vmem:[#allocation10 + $0xb0] sm:$0xff] }
 0x170   :  { %890 = vmatpush1.msra.mxu0 %v524_v50  ;;  %v593_v50 = vrot.slane %v4845_v32, 7 }
 0x171   :  { %891 = vmatprep.subr.mxu0 %v587_v52 }
 0x172   :  { %892 = vmatpush2.msra.mxu0 %v586_v53  ;;  %v643_v53 = vrot.slane %v4850_v44, 1  ;;  %v1090_v44 = vld [vmem:[#allocation10 + $0xd8] sm:$0xff] }
 0x173   :  { %893 = vmatprep.subr.mxu0 %v585_v54  ;;  %v648_v54 = vsel %vm644_vm1, %v639_v24, %v641_v34  ;;  %v1088_v24 = vld [vmem:[#allocation10 + $0xc8] sm:$0xff] }
 0x174   :  { %894 = vmatpush2.msra.mxu0 %v584_v55  ;;  %v652_v14 = vsel %vm644_vm1, %v643_v53, %v637_v23 }
 0x175   :  { %895 = vmatprep.subr.mxu0 %v583_v56 }
 0x176   :  { %896 = vmatpush2.msra.mxu0 %v582_v57 }
 0x177   :  { %897 = vmatprep.subr.mxu0 %v581_v58 }
 0x178   :  { %898 = vmatpush2.msra.mxu0 %v580_v59  ;;  %v647_v59 = vsel %vm644_vm1, %v638_v30, %v640_v40  ;;  %v1086_v30 = vld [vmem:[#allocation10 + $0xb8] sm:$0xff] }
 0x179   :  { %899 = vmatprep.subr.mxu0 %v579_v60  ;;  %v603_v60 = vsel %vm599_vm0, %v592_v21, %v594_v49 }
 0x17a   :  { %900 = vmatpush2.msra.mxu0 %v578_v61 }
 0x17b   :  { %901 = vmatprep.subr.mxu0 %v577_v62  ;;  %v602_v62 = vsel %vm599_vm0, %v591_v26, %v593_v50  ;;  %v1029_v26 = vld [vmem:[#allocation8 + $0xf0] sm:$0xff] }
 0x17c   :  { %902 = vmatpush2.msra.mxu0 %v576_v63  ;;  %v646_v63 = vsel %vm644_vm1, %v641_v34, %v643_v53  ;;  %v1026_v34 = vld [vmem:[#allocation8 + $0xd8] sm:$0xff]  ;;  %v1019_v53 = vld [vmem:[#allocation8 + $0xa0] sm:$0xff] }
 0x17d   :  { %903 = vmatprep.subr.mxu0 %v575_v0  ;;  %v1094_v0 = vld [vmem:[#allocation10 + $0xf8] sm:$0xff] }
 0x17e   :  { %904 = vmatpush2.msra.mxu0 %v574_v1  ;;  %v1093_v1 = vld [vmem:[#allocation10 + $0xf0] sm:$0xff]  ;;  %1240 = vmatprep.subr.mxu1 %v1094_v0  ;;  %v1070_v0 = vld [vmem:[#allocation10 + $0x38] sm:$0xff] }
 0x17f   :  { %905 = vmatprep.subr.mxu0 %v573_v2 }
 0x180   :  { %906 = vmatpush2.msra.mxu0 %v572_v3 }
 0x181   :  { %907 = vmatprep.subr.mxu0 %v571_v4  ;;  %v1092_v4 = vld [vmem:[#allocation10 + $0xe8] sm:$0xff] }
 0x182   :  { %908 = vmatpush2.msra.mxu0 %v570_v5 }
 0x183   :  { %909 = vmatprep.subr.mxu0 %v569_v7 }
 0x184   :  { %910 = vmatpush2.msra.mxu0 %v568_v8  ;;  %v645_v8 = vsel %vm644_vm1, %v640_v40, %v642_v28  ;;  %v1080_v40 = vld [vmem:[#allocation10 + $0x88] sm:$0xff]  ;;  %v1074_v28 = vld [vmem:[#allocation10 + $0x58] sm:$0xff] }
 0x185   :  { %911 = vmatprep.subr.mxu0 %v567_v9  ;;  %v601_v9 = vsel %vm599_vm0, %v594_v49, %v596_v18  ;;  %v1077_v49 = vld [vmem:[#allocation10 + $0x70] sm:$0xff] }
 0x186   :  { %912 = vmatpush2.msra.mxu0 %v566_v11 }
 0x187   :  { %913 = vmatprep.subr.mxu0 %v565_v12  ;;  %v600_v12 = vsel %vm599_vm0, %v593_v50, %v595_v19  ;;  %v1020_v50 = vld [vmem:[#allocation8 + $0xa8] sm:$0xff] }
 0x188   :  { %914 = vmatpush2.msra.mxu0 %v564_v13  ;;  %v1091_v13 = vld [vmem:[#allocation10 + $0xe0] sm:$0xff] }
 0x189   :  { %915 = vmatprep.subr.mxu0 %v563_v17 }
 0x18a   :  { %916 = vmatpush2.msra.mxu0 %v562_v22  ;;  %v1030_v22 = vld [vmem:[#allocation8 + $0xf8] sm:$0xff] }
 0x18b   :  { %917 = vmatprep.subr.mxu0 %v561_v25  ;;  %v1087_v25 = vld [vmem:[#allocation10 + $0xc0] sm:$0xff] }
 0x18c   :  { %918 = vmatpush2.msra.mxu0 %v560_v27 }
 0x18d   :  { %v4882_v20 = vpop.permute.xlu0 %610  ;;  %v4890_v42 = vpop.permute.xlu1 %615  ;;  %919 = vmatprep.subr.mxu0 %v559_v33  ;;  %v1083_v33 = vld [vmem:[#allocation10 + $0xa0] sm:$0xff] }
 0x18e   :  { %v629_v41 = vmul.f32 %v4882_v20, %v607_v31  ;;  %v628_v43 = vmul.f32 %v4882_v20, %v606_v16  ;;  %920 = vmatpush2.msra.mxu0 %v558_v35  ;;  %v631_v52 = vmul.f32 %v4890_v42, %v605_v36  ;;  %v630_v56 = vmul.f32 %v4890_v42, %v604_v46  ;;  %v1084_v31 = vld [vmem:[#allocation10 + $0xa8] sm:$0xff]  ;;  %v1027_v16 = vld [vmem:[#allocation8 + $0xe0] sm:$0xff]  ;;  %v1082_v35 = vld [vmem:[#allocation10 + $0x98] sm:$0xff] }
 0x18f   :  { %921 = vmatprep.subr.mxu0 %v557_v37  ;;  %v1025_v36 = vld [vmem:[#allocation8 + $0xd0] sm:$0xff]  ;;  %v1078_v46 = vld [vmem:[#allocation10 + $0x78] sm:$0xff] }
 0x190   :  { %834 = vmatprep.mubr.f32.mxu1 %v629_v41  ;;  %922 = vmatpush2.msra.mxu0 %v556_v45  ;;  %v1081_v37 = vld [vmem:[#allocation10 + $0x90] sm:$0xff]  ;;  %v1023_v41 = vld [vmem:[#allocation8 + $0xc0] sm:$0xff]  ;;  %v1022_v45 = vld [vmem:[#allocation8 + $0xb8] sm:$0xff] }
 0x191   :  { %v4905_v55 = vpop.permute.xlu0 %655  ;;  %835 = vmatmul.mubr.f32.vlgmr.msra.gmra.mxu1 %v628_v43  ;;  %v4910_v57 = vpop.permute.xlu1 %660  ;;  %1329 = vmatprep.subr.mxu0 %v1030_v22  ;;  %v1079_v43 = vld [vmem:[#allocation10 + $0x80] sm:$0xff]  ;;  %v1125_v22 = vld [vmem:[#allocation10 + $0x1f0] sm:$0xff] }
 0x192   :  { %840 = vmatprep.mubr.f32.mxu1 %v631_v52  ;;  %v674_v32 = vmul.f32 %v4905_v55, %v650_v39  ;;  %v673_v58 = vmul.f32 %v4905_v55, %v649_v47  ;;  %v676_v61 = vmul.f32 %v4910_v57, %v648_v54  ;;  %v675_v3 = vmul.f32 %v4910_v57, %v647_v59  ;;  %v1024_v39 = vld [vmem:[#allocation8 + $0xc8] sm:$0xff]  ;;  %v1021_v47 = vld [vmem:[#allocation8 + $0xb0] sm:$0xff]  ;;  %v1075_v54 = vld [vmem:[#allocation10 + $0x60] sm:$0xff] }
 0x193   :  { %1241 = vmatpush1.msra.mxu1 %v1093_v1  ;;  %v1076_v52 = vld [vmem:[#allocation10 + $0x68] sm:$0xff]  ;;  %v1013_v1 = vld [vmem:[#allocation8 + $0x70] sm:$0xff] }
 0x194   :  { %923 = vmatprep.mubr.f32.mxu0 %v674_v32  ;;  %1242 = vmatprep.subr.mxu1 %v1092_v4  ;;  %v1017_v32 = vld [vmem:[#allocation8 + $0x90] sm:$0xff]  ;;  %v1016_v59 = vld [vmem:[#allocation8 + $0x88] sm:$0xff] }
 0x195   :  { %v4922_v2 = vpop.permute.xlu0 %620  ;;  %841 = vmatmul.mubr.f32.gmra.mxu1 %v630_v56  ;;  %924 = vmatmul.mubr.f32.vlgmr.msra.gmra.mxu0 %v673_v58  ;;  %v4926_v6 = vpop.permute.xlu1 %665  ;;  %v1018_v56 = vld [vmem:[#allocation8 + $0x98] sm:$0xff]  ;;  %v1073_v58 = vld [vmem:[#allocation10 + $0x50] sm:$0xff]  ;;  %v1012_v4 = vld [vmem:[#allocation8 + $0x68] sm:$0xff] }
 0x196   :  { %v633_v5 = vmul.f32 %v4922_v2, %v603_v60  ;;  %929 = vmatprep.mubr.f32.mxu0 %v676_v61  ;;  %v632_v7 = vmul.f32 %v4922_v2, %v602_v62  ;;  %v678_v11 = vmul.f32 %v4926_v6, %v646_v63  ;;  %v677_v17 = vmul.f32 %v4926_v6, %v645_v8  ;;  %v1072_v60 = vld [vmem:[#allocation10 + $0x48] sm:$0xff]  ;;  %v1015_v61 = vld [vmem:[#allocation8 + $0x80] sm:$0xff]  ;;  %v1014_v63 = vld [vmem:[#allocation8 + $0x78] sm:$0xff] }
 0x197   :  { %1243 = vmatpush1.msra.mxu1 %v1091_v13  ;;  %1330 = vmatpush1.msra.mxu0 %v1029_v26  ;;  %v1071_v62 = vld [vmem:[#allocation10 + $0x40] sm:$0xff]  ;;  %v1065_v13 = vld [vmem:[#allocation10 + $0x10] sm:$0xff] }
 0x198   :  { %846 = vmatprep.mubr.f32.mxu1 %v633_v5  ;;  %1244 = vmatprep.subr.mxu1 %v1090_v44  ;;  %v1068_v5 = vld [vmem:[#allocation10 + $0x28] sm:$0xff]  ;;  %v1067_v8 = vld [vmem:[#allocation10 + $0x20] sm:$0xff] }
 0x199   :  { %v4944_v15 = vpop.permute.xlu0 %625  ;;  %847 = vmatmul.mubr.f32.gmra.mxu1 %v632_v7  ;;  %930 = vmatmul.mubr.f32.gmra.mxu0 %v675_v3  ;;  %v4948_v19 = vpop.permute.xlu1 %670  ;;  %v1069_v3 = vld [vmem:[#allocation10 + $0x30] sm:$0xff]  ;;  %v1011_v7 = vld [vmem:[#allocation8 + $0x60] sm:$0xff]  ;;  %v1064_v44 = vld [vmem:[#allocation10 + $0x8] sm:$0xff] }
 0x19a   :  { %v635_v18 = vmul.f32 %v4944_v15, %v601_v9  ;;  %935 = vmatprep.mubr.f32.mxu0 %v678_v11  ;;  %v634_v21 = vmul.f32 %v4944_v15, %v600_v12  ;;  %v680_v23 = vmul.f32 %v4948_v19, %v652_v14  ;;  %1245 = vmatpush1.msra.mxu1 %v1089_v48  ;;  %v1010_v9 = vld [vmem:[#allocation8 + $0x58] sm:$0xff]  ;;  %v1009_v12 = vld [vmem:[#allocation8 + $0x50] sm:$0xff]  ;;  %v1008_v14 = vld [vmem:[#allocation8 + $0x48] sm:$0xff] }
 0x19b   :  { %v679_v27 = vmul.f32 %v4948_v19, %v651_v38  ;;  %1246 = vmatprep.subr.mxu1 %v1088_v24  ;;  %1331 = vmatprep.subr.mxu0 %v1028_v51  ;;  %v1066_v11 = vld [vmem:[#allocation10 + $0x18] sm:$0xff]  ;;  %v1063_v48 = vld [vmem:[#allocation10] sm:$0xff]  ;;  %v1005_v38 = vld [vmem:[#allocation8 + $0x30] sm:$0xff] }
 0x19c   :  { %852 = vmatprep.mubr.f32.mxu1 %v635_v18  ;;  %1247 = vmatpush1.msra.mxu1 %v1087_v25  ;;  %v1006_v18 = vld [vmem:[#allocation8 + $0x38] sm:$0xff]  ;;  %v1124_v24 = vld [vmem:[#allocation10 + $0x1e8] sm:$0xff]  ;;  %v1003_v25 = vld [vmem:[#allocation8 + $0x20] sm:$0xff] }
 0x19d   :  { %853 = vmatmul.mubr.f32.gmra.mxu1 %v634_v21  ;;  %936 = vmatmul.mubr.f32.gmra.mxu0 %v677_v17  ;;  %v1007_v17 = vld [vmem:[#allocation8 + $0x40] sm:$0xff]  ;;  %v1126_v21 = vld [vmem:[#allocation10 + $0x1f8] sm:$0xff]  ;;  %v1001_v51 = vld [vmem:[#allocation8 + $0x10] sm:$0xff] }
 0x19e   :  { %941 = vmatprep.mubr.f32.mxu0 %v680_v23  ;;  %1248 = vmatprep.subr.mxu1 %v1086_v30  ;;  %v1004_v23 = vld [vmem:[#allocation8 + $0x28] sm:$0xff]  ;;  %v1123_v26 = vld [vmem:[#allocation10 + $0x1e0] sm:$0xff]  ;;  %v1122_v30 = vld [vmem:[#allocation10 + $0x1d8] sm:$0xff] }
 0x19f   :  { %1249 = vmatpush1.msra.mxu1 %v1085_v29  ;;  %1332 = vmatpush1.msra.mxu0 %v1027_v16  ;;  %v1121_v29 = vld [vmem:[#allocation10 + $0x1d0] sm:$0xff]  ;;  %v1120_v16 = vld [vmem:[#allocation10 + $0x1c8] sm:$0xff] }
 0x1a0   :  { %1250 = vmatprep.subr.mxu1 %v1084_v31  ;;  %1333 = vmatprep.subr.mxu0 %v1026_v34  ;;  %v1000_v31 = vld [vmem:[#allocation8 + $0x8] sm:$0xff]  ;;  %v1119_v34 = vld [vmem:[#allocation10 + $0x1c0] sm:$0xff] }
 0x1a1   :  { %942 = vmatmul.mubr.f32.gmra.mxu0 %v679_v27  ;;  %1251 = vmatpush1.msra.mxu1 %v1083_v33  ;;  %v1002_v27 = vld [vmem:[#allocation8 + $0x18] sm:$0xff]  ;;  %v999_v33 = vld [vmem:[#allocation8] sm:$0xff] }
 0x1a2   :  { %1252 = vmatprep.subr.mxu1 %v1082_v35  ;;  %1334 = vmatpush1.msra.mxu0 %v1025_v36  ;;  %v1118_v35 = vld [vmem:[#allocation10 + $0x1b8] sm:$0xff]  ;;  %v1117_v36 = vld [vmem:[#allocation10 + $0x1b0] sm:$0xff] }
 0x1a3   :  { %1253 = vmatpush1.msra.mxu1 %v1081_v37  ;;  %1335 = vmatprep.subr.mxu0 %v1024_v39  ;;  %v1116_v37 = vld [vmem:[#allocation10 + $0x1a8] sm:$0xff]  ;;  %v1115_v39 = vld [vmem:[#allocation10 + $0x1a0] sm:$0xff] }
 0x1a4   :  { %1254 = vmatprep.subr.mxu1 %v1080_v40  ;;  %1336 = vmatpush1.msra.mxu0 %v1023_v41  ;;  %v1114_v40 = vld [vmem:[#allocation10 + $0x198] sm:$0xff]  ;;  %v1113_v41 = vld [vmem:[#allocation10 + $0x190] sm:$0xff] }
 0x1a5   :  { %1255 = vmatpush1.msra.mxu1 %v1079_v43  ;;  %1337 = vmatprep.subr.mxu0 %v1022_v45  ;;  %v1112_v43 = vld [vmem:[#allocation10 + $0x188] sm:$0xff]  ;;  %v1111_v45 = vld [vmem:[#allocation10 + $0x180] sm:$0xff] }
 0x1a6   :  { %1256 = vmatprep.subr.mxu1 %v1078_v46  ;;  %1338 = vmatpush1.msra.mxu0 %v1021_v47  ;;  %v1110_v46 = vld [vmem:[#allocation10 + $0x178] sm:$0xff]  ;;  %v1109_v47 = vld [vmem:[#allocation10 + $0x170] sm:$0xff] }
 0x1a7   :  { %1257 = vmatpush1.msra.mxu1 %v1077_v49  ;;  %1339 = vmatprep.subr.mxu0 %v1020_v50  ;;  %v1108_v49 = vld [vmem:[#allocation10 + $0x168] sm:$0xff]  ;;  %v1062_v50 = vld [vmem:[#allocation8 + $0x1f8] sm:$0xff] }
 0x1a8   :  { %1258 = vmatprep.subr.mxu1 %v1076_v52  ;;  %1340 = vmatpush1.msra.mxu0 %v1019_v53  ;;  %v1107_v52 = vld [vmem:[#allocation10 + $0x160] sm:$0xff]  ;;  %v1061_v53 = vld [vmem:[#allocation8 + $0x1f0] sm:$0xff] }
 0x1a9   :  { %1259 = vmatpush1.msra.mxu1 %v1075_v54  ;;  %1341 = vmatprep.subr.mxu0 %v1018_v56  ;;  %v1106_v54 = vld [vmem:[#allocation10 + $0x158] sm:$0xff]  ;;  %v1060_v56 = vld [vmem:[#allocation8 + $0x1e8] sm:$0xff] }
 0x1aa   :  { %1260 = vmatprep.subr.mxu1 %v1074_v28  ;;  %1342 = vmatpush1.msra.mxu0 %v1017_v32  ;;  %v1105_v28 = vld [vmem:[#allocation10 + $0x150] sm:$0xff]  ;;  %v1059_v32 = vld [vmem:[#allocation8 + $0x1e0] sm:$0xff] }
 0x1ab   :  { %1261 = vmatpush1.msra.mxu1 %v1073_v58  ;;  %1343 = vmatprep.subr.mxu0 %v1016_v59  ;;  %v1104_v58 = vld [vmem:[#allocation10 + $0x148] sm:$0xff]  ;;  %v1058_v59 = vld [vmem:[#allocation8 + $0x1d8] sm:$0xff] }
 0x1ac   :  { %1262 = vmatprep.subr.mxu1 %v1072_v60  ;;  %1344 = vmatpush1.msra.mxu0 %v1015_v61  ;;  %v1103_v60 = vld [vmem:[#allocation10 + $0x140] sm:$0xff]  ;;  %v1057_v61 = vld [vmem:[#allocation8 + $0x1d0] sm:$0xff] }
 0x1ad   :  { %1263 = vmatpush1.msra.mxu1 %v1071_v62  ;;  %1345 = vmatprep.subr.mxu0 %v1014_v63  ;;  %v1102_v62 = vld [vmem:[#allocation10 + $0x138] sm:$0xff]  ;;  %v1056_v63 = vld [vmem:[#allocation8 + $0x1c8] sm:$0xff] }
 0x1ae   :  { %1264 = vmatprep.subr.mxu1 %v1070_v0  ;;  %1346 = vmatpush1.msra.mxu0 %v1013_v1  ;;  %v1101_v0 = vld [vmem:[#allocation10 + $0x130] sm:$0xff]  ;;  %v1055_v1 = vld [vmem:[#allocation8 + $0x1c0] sm:$0xff] }
 0x1af   :  { %1265 = vmatpush1.msra.mxu1 %v1069_v3  ;;  %1347 = vmatprep.subr.mxu0 %v1012_v4  ;;  %v1100_v3 = vld [vmem:[#allocation10 + $0x128] sm:$0xff]  ;;  %v1054_v4 = vld [vmem:[#allocation8 + $0x1b8] sm:$0xff] }
 0x1b0   :  { %1266 = vmatprep.subr.mxu1 %v1068_v5  ;;  %1348 = vmatpush1.msra.mxu0 %v1011_v7  ;;  %v1099_v5 = vld [vmem:[#allocation10 + $0x120] sm:$0xff]  ;;  %v1053_v7 = vld [vmem:[#allocation8 + $0x1b0] sm:$0xff] }
 0x1b1   :  { %1267 = vmatpush1.msra.mxu1 %v1067_v8  ;;  %1349 = vmatprep.subr.mxu0 %v1010_v9  ;;  %v1098_v8 = vld [vmem:[#allocation10 + $0x118] sm:$0xff]  ;;  %v1052_v9 = vld [vmem:[#allocation8 + $0x1a8] sm:$0xff] }
 0x1b2   :  { %1268 = vmatprep.subr.mxu1 %v1066_v11  ;;  %1350 = vmatpush1.msra.mxu0 %v1009_v12  ;;  %v1097_v11 = vld [vmem:[#allocation10 + $0x110] sm:$0xff]  ;;  %v1051_v12 = vld [vmem:[#allocation8 + $0x1a0] sm:$0xff] }
 0x1b3   :  { %1269 = vmatpush1.msra.mxu1 %v1065_v13  ;;  %1351 = vmatprep.subr.mxu0 %v1008_v14  ;;  %v1096_v13 = vld [vmem:[#allocation10 + $0x108] sm:$0xff]  ;;  %v1050_v14 = vld [vmem:[#allocation8 + $0x198] sm:$0xff] }
 0x1b4   :  { %1270 = vmatprep.subr.mxu1 %v1064_v44  ;;  %1352 = vmatpush1.msra.mxu0 %v1007_v17  ;;  %v1095_v44 = vld [vmem:[#allocation10 + $0x100] sm:$0xff]  ;;  %v1049_v17 = vld [vmem:[#allocation8 + $0x190] sm:$0xff] }
 0x1b5   :  { %1271 = vmatpush1.msra.mxu1 %v1063_v48  ;;  %1353 = vmatprep.subr.mxu0 %v1006_v18  ;;  %v1048_v48 = vld [vmem:[#allocation8 + $0x188] sm:$0xff]  ;;  %v1158_v18 = vld [vmem:[#allocation11 + $0xf8] sm:$0xff] }
 0x1b6   :  { %1272 = vmatprep.subr.mxu1 %v1126_v21  ;;  %1354 = vmatpush1.msra.mxu0 %v1005_v38  ;;  %v1047_v21 = vld [vmem:[#allocation8 + $0x180] sm:$0xff]  ;;  %v1046_v38 = vld [vmem:[#allocation8 + $0x178] sm:$0xff] }
 0x1b7   :  { %1273 = vmatpush2.msra.mxu1 %v1125_v22  ;;  %1355 = vmatprep.subr.mxu0 %v1004_v23  ;;  %v1045_v22 = vld [vmem:[#allocation8 + $0x170] sm:$0xff]  ;;  %v1044_v23 = vld [vmem:[#allocation8 + $0x168] sm:$0xff] }
 0x1b8   :  { %1274 = vmatprep.subr.mxu1 %v1124_v24  ;;  %1356 = vmatpush1.msra.mxu0 %v1003_v25  ;;  %v1043_v24 = vld [vmem:[#allocation8 + $0x160] sm:$0xff]  ;;  %v1042_v25 = vld [vmem:[#allocation8 + $0x158] sm:$0xff] }
 0x1b9   :  { %1275 = vmatpush2.msra.mxu1 %v1123_v26  ;;  %1357 = vmatprep.subr.mxu0 %v1002_v27  ;;  %v1041_v26 = vld [vmem:[#allocation8 + $0x150] sm:$0xff]  ;;  %v1040_v27 = vld [vmem:[#allocation8 + $0x148] sm:$0xff] }
 0x1ba   :  { %1276 = vmatprep.subr.mxu1 %v1122_v30  ;;  %1358 = vmatpush1.msra.mxu0 %v1001_v51  ;;  %v1039_v30 = vld [vmem:[#allocation8 + $0x140] sm:$0xff]  ;;  %v1038_v51 = vld [vmem:[#allocation8 + $0x138] sm:$0xff] }
 0x1bb   :  { %1277 = vmatpush2.msra.mxu1 %v1121_v29  ;;  %1359 = vmatprep.subr.mxu0 %v1000_v31  ;;  %v1037_v29 = vld [vmem:[#allocation8 + $0x130] sm:$0xff]  ;;  %v1036_v31 = vld [vmem:[#allocation8 + $0x128] sm:$0xff] }
 0x1bc   :  { %1278 = vmatprep.subr.mxu1 %v1120_v16  ;;  %1360 = vmatpush1.msra.mxu0 %v999_v33  ;;  %v1035_v16 = vld [vmem:[#allocation8 + $0x120] sm:$0xff]  ;;  %v1034_v33 = vld [vmem:[#allocation8 + $0x118] sm:$0xff] }
 0x1bd   :  { %1279 = vmatpush2.msra.mxu1 %v1119_v34  ;;  %1361 = vmatprep.subr.mxu0 %v1062_v50  ;;  %v1033_v34 = vld [vmem:[#allocation8 + $0x110] sm:$0xff]  ;;  %v588_v50 = vld [vmem:[%s5529_s14] sm:$0x3] }
 0x1be   :  { %1280 = vmatprep.subr.mxu1 %v1118_v35  ;;  %1362 = vmatpush2.msra.mxu0 %v1061_v53  ;;  %v1032_v35 = vld [vmem:[#allocation8 + $0x108] sm:$0xff] }
 0x1bf   :  { %1281 = vmatpush2.msra.mxu1 %v1117_v36  ;;  %1363 = vmatprep.subr.mxu0 %v1060_v56  ;;  %v1031_v36 = vld [vmem:[#allocation8 + $0x100] sm:$0xff] }
 0x1c0   :  { %1282 = vmatprep.subr.mxu1 %v1116_v37  ;;  %1364 = vmatpush2.msra.mxu0 %v1059_v32 }
 0x1c1   :  { %1283 = vmatpush2.msra.mxu1 %v1115_v39  ;;  %1365 = vmatprep.subr.mxu0 %v1058_v59 }
 0x1c2   :  { %1284 = vmatprep.subr.mxu1 %v1114_v40  ;;  %1366 = vmatpush2.msra.mxu0 %v1057_v61 }
 0x1c3   :  { %1285 = vmatpush2.msra.mxu1 %v1113_v41  ;;  %1367 = vmatprep.subr.mxu0 %v1056_v63 }
 0x1c4   :  { %1286 = vmatprep.subr.mxu1 %v1112_v43  ;;  %1368 = vmatpush2.msra.mxu0 %v1055_v1 }
 0x1c5   :  { %1287 = vmatpush2.msra.mxu1 %v1111_v45  ;;  %1369 = vmatprep.subr.mxu0 %v1054_v4 }
 0x1c6   :  { %1288 = vmatprep.subr.mxu1 %v1110_v46  ;;  %1370 = vmatpush2.msra.mxu0 %v1053_v7 }
 0x1c7   :  { %1289 = vmatpush2.msra.mxu1 %v1109_v47  ;;  %1371 = vmatprep.subr.mxu0 %v1052_v9  ;;  %v4958_v47 = vsub.s32 0, %v4857_v10 }
 0x1c8   :  { %1290 = vmatprep.subr.mxu1 %v1108_v49  ;;  %1372 = vmatpush2.msra.mxu0 %v1051_v12 }
 0x1c9   :  { %1291 = vmatpush2.msra.mxu1 %v1107_v52  ;;  %1373 = vmatprep.subr.mxu0 %v1050_v14  ;;  %v4962_v52 = vsub.s32 1, %v4857_v10  ;;  %v3822_v10 = vld [vmem:[#allocation31 + $0xe0] sm:$0xff] }
 0x1ca   :  { %1292 = vmatprep.subr.mxu1 %v1106_v54  ;;  %1374 = vmatpush2.msra.mxu0 %v1049_v17 }
 0x1cb   :  { %1293 = vmatpush2.msra.mxu1 %v1105_v28  ;;  %1375 = vmatprep.subr.mxu0 %v1048_v48  ;;  %v960_v28 = vrot.slane %v588_v50, %v4958_v47  ;;  %v4966_v61 = vrot.slane %v588_v50, %v4962_v52 }
 0x1cc   :  { %1294 = vmatprep.subr.mxu1 %v1104_v58  ;;  %1376 = vmatpush2.msra.mxu0 %v1047_v21 }
 0x1cd   :  { %1295 = vmatpush2.msra.mxu1 %v1103_v60  ;;  %1377 = vmatprep.subr.mxu0 %v1046_v38 }
 0x1ce   :  { %1296 = vmatprep.subr.mxu1 %v1102_v62  ;;  %1378 = vmatpush2.msra.mxu0 %v1045_v22 }
 0x1cf   :  { %1297 = vmatpush2.msra.mxu1 %v1101_v0  ;;  %1379 = vmatprep.subr.mxu0 %v1044_v23 }
 0x1d0   :  { %1298 = vmatprep.subr.mxu1 %v1100_v3  ;;  %1380 = vmatpush2.msra.mxu0 %v1043_v24 }
 0x1d1   :  { %1299 = vmatpush2.msra.mxu1 %v1099_v5  ;;  %1381 = vmatprep.subr.mxu0 %v1042_v25  ;;  %v1157_v25 = vld [vmem:[#allocation11 + $0xf0] sm:$0xff] }
 0x1d2   :  { %1300 = vmatprep.subr.mxu1 %v1098_v8  ;;  %1382 = vmatpush2.msra.mxu0 %v1041_v26 }
 0x1d3   :  { %1301 = vmatpush2.msra.mxu1 %v1097_v11  ;;  %1383 = vmatprep.subr.mxu0 %v1040_v27 }
 0x1d4   :  { %1302 = vmatprep.subr.mxu1 %v1096_v13  ;;  %1384 = vmatpush2.msra.mxu0 %v1039_v30 }
 0x1d5   :  { %1303 = vmatpush2.msra.mxu1 %v1095_v44  ;;  %1385 = vmatprep.subr.mxu0 %v1038_v51  ;;  %v1156_v51 = vld [vmem:[#allocation11 + $0xe8] sm:$0xff] }
 0x1d6   :  { %1418 = vmatprep.subr.mxu1 %v1158_v18  ;;  %1386 = vmatpush2.msra.mxu0 %v1037_v29 }
 0x1d7   :  { %1387 = vmatprep.subr.mxu0 %v1036_v31 }
 0x1d8   :  { %1388 = vmatpush2.msra.mxu0 %v1035_v16 }
 0x1d9   :  { %1389 = vmatprep.subr.mxu0 %v1034_v33  ;;  %v1155_v33 = vld [vmem:[#allocation11 + $0xe0] sm:$0xff] }
 0x1da   :  { %1390 = vmatpush2.msra.mxu0 %v1033_v34 }
 0x1db   :  { %1391 = vmatprep.subr.mxu0 %v1032_v35 }
 0x1dc   :  { %1392 = vmatpush2.msra.mxu0 %v1031_v36  ;;  %v1154_v36 = vld [vmem:[#allocation11 + $0xd8] sm:$0xff] }
 0x211   :  { %v747_v37 = vpop.f32.mrf.mxu0 }
 0x213   :  { %v749_v39 = vpop.f32.mrf.mxu0 }
 0x215   :  { %v753_v40 = vpop.f32.mrf.mxu0 }
 0x217   :  { %v755_v41 = vpop.f32.mrf.mxu0 }
 0x219   :  { %v759_v43 = vpop.f32.mrf.mxu0 }
 0x21b   :  { %v761_v45 = vpop.f32.mrf.mxu0 }
 0x21f   :  { %v765_v46 = vpop.f32.mrf.mxu0 }
 0x221   :  { %v767_v53 = vpop.f32.mrf.mxu0 }
 0x251   :  { %v836_v49 = vpop.f32.mrf.mxu1 }
 0x252   :  { %v837_v56 = vadd.f32 %v836_v49, %v747_v37 }
 0x253   :  { %v838_v54 = vpop.f32.mrf.mxu1 }
 0x254   :  { %v839_v59 = vadd.f32 %v838_v54, %v749_v39 }
 0x255   :  { %v842_v32 = vpop.f32.mrf.mxu1  ;;  %v925_v58 = vpop.f32.mrf.mxu0 }
 0x256   :  { %v948_v60 = vadd.f32 %v925_v58, %v837_v56  ;;  %v843_v3 = vadd.f32 %v842_v32, %v753_v40  ;;  %v1152_v56 = vld [vmem:[#allocation11 + $0xc8] sm:$0xff]  ;;  %v1151_v58 = vld [vmem:[#allocation11 + $0xc0] sm:$0xff] }
 0x257   :  { %v844_v62 = vpop.f32.mrf.mxu1  ;;  %v927_v63 = vpop.f32.mrf.mxu0 }
 0x258   :  { %v967_v0 = vadd.f32 %v960_v28, %v948_v60  ;;  %v949_v1 = vadd.f32 %v927_v63, %v839_v59  ;;  %v845_v7 = vadd.f32 %v844_v62, %v755_v41 }
 0x259   :  { %v848_v4 = vpop.f32.mrf.mxu1  ;;  %v931_v5 = vpop.f32.mrf.mxu0 }
 0x25a   :  { %v968_v8 = vadd.f32 %v4966_v61, %v949_v1  ;;  %vm975_vm2 = vcmp.ge.f32.partialorder %v967_v0, 0.0  ;;  %v983_v9 = vmul.f32 0.2, %v967_v0  ;;  %v950_v11 = vadd.f32 %v931_v5, %v843_v3  ;;  %v1149_v1 = vld [vmem:[#allocation11 + $0xb0] sm:$0xff] }
 0x25b   :  { %v850_v12 = vpop.f32.mrf.mxu1  ;;  %v933_v13 = vpop.f32.mrf.mxu0  ;;  %v849_v14 = vadd.f32 %v848_v4, %v759_v43  ;;  %v1148_v4 = vld [vmem:[#allocation11 + $0xa8] sm:$0xff] }
 0x25c   :  { %v951_v44 = vadd.f32 %v933_v13, %v845_v7  ;;  %vm976_vm3 = vcmp.ge.f32.partialorder %v968_v8, 0.0  ;;  %v984_v17 = vmul.f32 0.2, %v968_v8  ;;  %v969_v48 = vadd.f32 %v960_v28, %v950_v11  ;;  %v1146_v11 = vld [vmem:[#allocation11 + $0x98] sm:$0xff] }
 0x25d   :  { %v854_v18 = vpop.f32.mrf.mxu1  ;;  %v937_v21 = vpop.f32.mrf.mxu0  ;;  %v851_v38 = vadd.f32 %v850_v12, %v761_v45  ;;  %v4974_v30 = vsel %vm975_vm2, %v967_v0, %v983_v9 }
 0x25e   :  { %v970_v22 = vadd.f32 %v4966_v61, %v951_v44  ;;  %v952_v23 = vadd.f32 %v937_v21, %v849_v14  ;;  %v4970_v24 = vsel %vm976_vm3, %v968_v8, %v984_v17  ;;  %v855_v29 = vadd.f32 %v854_v18, %v765_v46  ;;  %v1153_v46 = vld [vmem:[#allocation11 + $0xd0] sm:$0xff]  ;;  %v1144_v18 = vld [vmem:[#allocation11 + $0x88] sm:$0xff] }
 0x25f   :  { %v856_v26 = vpop.f32.mrf.mxu1  ;;  %v939_v27 = vpop.f32.mrf.mxu0  ;;  %1304 = vmatprep.mubr.f32.mxu1 %v4970_v24  ;;  %vm977_vm5 = vcmp.ge.f32.partialorder %v969_v48, 0.0  ;;  %v985_v37 = vmul.f32 0.2, %v969_v48  ;;  %v1217_v63 = vrot.slane %v4970_v24, 1  ;;  %v1192_v13 = vrot.slane %v4974_v30, 7  ;;  %v1145_v44 = vld [vmem:[#allocation11 + $0x90] sm:$0xff] }
 0x260   :  { %v971_v31 = vadd.f32 %v960_v28, %v952_v23  ;;  %v953_v16 = vadd.f32 %v939_v27, %v851_v38  ;;  %1305 = vmatmul.mubr.f32.vlgmr.msra.gmra.mxu1 %v4974_v30  ;;  %vm978_vm4 = vcmp.ge.f32.partialorder %v970_v22, 0.0  ;;  %v986_v35 = vmul.f32 0.2, %v970_v22  ;;  %v1143_v23 = vld [vmem:[#allocation11 + $0x80] sm:$0xff] }
 0x261   :  { %1419 = vmatpush1.msra.mxu1 %v1157_v25  ;;  %v943_v34 = vpop.f32.mrf.mxu0  ;;  %v857_v39 = vadd.f32 %v856_v26, %v767_v53  ;;  %v4981_v54 = vsel %vm977_vm5, %v969_v48, %v985_v37  ;;  %v1193_v17 = vrot.slane %v4970_v24, 7  ;;  %v1142_v26 = vld [vmem:[#allocation11 + $0x78] sm:$0xff]  ;;  %v1650_v24 = vld [vmem:[#allocation14 + $0xe0] sm:$0xff] }
 0x262   :  { %v972_v40 = vadd.f32 %v4966_v61, %v953_v16  ;;  %v954_v41 = vadd.f32 %v943_v34, %v855_v29  ;;  %1420 = vmatprep.subr.mxu1 %v1156_v51  ;;  %v4978_v45 = vsel %vm978_vm4, %v970_v22, %v986_v35  ;;  %v987_v32 = vmul.f32 0.2, %v971_v31 }
 0x263   :  { %1421 = vmatpush1.msra.mxu1 %v1155_v33  ;;  %v945_v43 = vpop.f32.mrf.mxu0  ;;  %1310 = vmatprep.mubr.f32.mxu1 %v4978_v45  ;;  %v1219_v53 = vrot.slane %v4978_v45, 1  ;;  %vm979_vm7 = vcmp.ge.f32.partialorder %v971_v31, 0.0  ;;  %v1195_v9 = vrot.slane %v4978_v45, 7  ;;  %v1194_v38 = vrot.slane %v4981_v54, 7  ;;  %v1140_v33 = vld [vmem:[#allocation11 + $0x68] sm:$0xff] }
 0x264   :  { %v973_v49 = vadd.f32 %v960_v28, %v954_v41  ;;  %v955_v50 = vadd.f32 %v945_v43, %v857_v39  ;;  %1422 = vmatprep.subr.mxu1 %v1154_v36  ;;  %1311 = vmatmul.mubr.f32.gmra.mxu1 %v4981_v54  ;;  %vm980_vm6 = vcmp.ge.f32.partialorder %v972_v40, 0.0  ;;  %v988_v59 = vmul.f32 0.2, %v972_v40  ;;  %v1150_v28 = vld [vmem:[#allocation11 + $0xb8] sm:$0xff]  ;;  %v1139_v36 = vld [vmem:[#allocation11 + $0x60] sm:$0xff]  ;;  %v1137_v41 = vld [vmem:[#allocation11 + $0x50] sm:$0xff] }
 0x265   :  { %1423 = vmatpush1.msra.mxu1 %v1153_v46  ;;  %v4990_v3 = vsel %vm979_vm7, %v971_v31, %v987_v32  ;;  %v1229_v8 = vsel %vm644_vm1, %v1217_v63, %v1219_v53  ;;  %v1205_v51 = vsel %vm599_vm0, %v1193_v17, %v1195_v9  ;;  %v1141_v31 = vld [vmem:[#allocation11 + $0x70] sm:$0xff]  ;;  %v1204_v37 = vsel %vm599_vm0, %v1192_v13, %v1194_v38  ;;  %v1138_v39 = vld [vmem:[#allocation11 + $0x58] sm:$0xff]  ;;  %v1136_v46 = vld [vmem:[#allocation11 + $0x48] sm:$0xff] }
 0x266   :  { %v974_v60 = vadd.f32 %v4966_v61, %v955_v50  ;;  %vm981_vm8 = vcmp.ge.f32.partialorder %v973_v49, 0.0  ;;  %v989_v62 = vmul.f32 0.2, %v973_v49  ;;  %1424 = vmatprep.subr.mxu1 %v1152_v56  ;;  %v4987_v0 = vsel %vm980_vm6, %v972_v40, %v988_v59  ;;  %v1147_v61 = vld [vmem:[#allocation11 + $0xa0] sm:$0xff]  ;;  %v1134_v32 = vld [vmem:[#allocation11 + $0x38] sm:$0xff]  ;;  %v1133_v59 = vld [vmem:[#allocation11 + $0x30] sm:$0xff] }
 0x267   :  { %1425 = vmatpush1.msra.mxu1 %v1151_v58  ;;  %1316 = vmatprep.mubr.f32.mxu1 %v4987_v0  ;;  %v1233_v21 = vmul.f32 %v1229_v8, %v4905_v55  ;;  %v1197_v25 = vrot.slane %v4987_v0, 7  ;;  %v1196_v34 = vrot.slane %v4990_v3, 7  ;;  %v1211_v35 = vmul.f32 %v1205_v51, %v4890_v42  ;;  %v1135_v50 = vld [vmem:[#allocation11 + $0x40] sm:$0xff]  ;;  %v1177_v51 = vld [vmem:[#allocation11 + $0x190] sm:$0xff] }
 0x268   :  { %vm982_vm9 = vcmp.ge.f32.partialorder %v974_v60, 0.0  ;;  %1426 = vmatprep.subr.mxu1 %v1150_v28  ;;  %1317 = vmatmul.mubr.f32.gmra.mxu1 %v4990_v3  ;;  %v990_v5 = vmul.f32 0.2, %v974_v60  ;;  %v4993_v7 = vsel %vm981_vm8, %v973_v49, %v989_v62  ;;  %v1210_v43 = vmul.f32 %v1204_v37, %v4890_v42  ;;  %v1132_v28 = vld [vmem:[#allocation11 + $0x28] sm:$0xff]  ;;  %v1169_v37 = vld [vmem:[#allocation11 + $0x150] sm:$0xff] }
 0x269   :  { %1427 = vmatpush1.msra.mxu1 %v1149_v1  ;;  %v1198_v12 = vrot.slane %v4993_v7, 7  ;;  %v1203_v40 = vsel %vm599_vm0, %v1195_v9, %v1197_v25  ;;  %v1202_v56 = vsel %vm599_vm0, %v1194_v38, %v1196_v34  ;;  %v1131_v1 = vld [vmem:[#allocation11 + $0x20] sm:$0xff]  ;;  %v1128_v9 = vld [vmem:[#allocation11 + $0x8] sm:$0xff] }
 0x26a   :  { %1428 = vmatprep.subr.mxu1 %v1148_v4  ;;  %v5004_v14 = vsel %vm982_vm9, %v974_v60, %v990_v5  ;;  %v1213_v49 = vmul.f32 %v1203_v40, %v4922_v2  ;;  %v1212_v60 = vmul.f32 %v1202_v56, %v4922_v2  ;;  %v1129_v5 = vld [vmem:[#allocation11 + $0x10] sm:$0xff]  ;;  %v1183_v38 = vld [vmem:[#allocation11 + $0x1c0] sm:$0xff] }
 0x26b   :  { %1429 = vmatpush1.msra.mxu1 %v1147_v61  ;;  %v1199_v48 = vrot.slane %v5004_v14, 7  ;;  %1322 = vmatprep.mubr.f32.mxu1 %v5004_v14  ;;  %v1206_v22 = vsel %vm599_vm0, %v1198_v12, %v1192_v13  ;;  %v1200_v4 = vsel %vm599_vm0, %v1196_v34, %v1198_v12  ;;  %v1130_v61 = vld [vmem:[#allocation11 + $0x18] sm:$0xff]  ;;  %v1187_v12 = vld [vmem:[#allocation11 + $0x1e0] sm:$0xff]  ;;  %v1172_v34 = vld [vmem:[#allocation11 + $0x168] sm:$0xff] }
 0x26c   :  { %1430 = vmatprep.subr.mxu1 %v1146_v11  ;;  %1323 = vmatmul.mubr.f32.gmra.mxu1 %v4993_v7  ;;  %v1208_v16 = vmul.f32 %v1206_v22, %v4882_v20  ;;  %v1214_v8 = vmul.f32 %v1200_v4, %v4944_v15  ;;  %v1127_v11 = vld [vmem:[#allocation11] sm:$0xff]  ;;  %v1190_v13 = vld [vmem:[#allocation11 + $0x1f8] sm:$0xff]  ;;  %v1222_v4 = vrot.slane %v4993_v7, 1 }
 0x26d   :  { %1431 = vmatpush1.msra.mxu1 %v1145_v44  ;;  %1482 = vmatprep.mubr.f32.mxu1 %v1233_v21  ;;  %v1207_v27 = vsel %vm599_vm0, %v1199_v48, %v1193_v17  ;;  %v1201_v58 = vsel %vm599_vm0, %v1197_v25, %v1199_v48  ;;  %v1189_v44 = vld [vmem:[#allocation11 + $0x1f0] sm:$0xff]  ;;  %v1188_v17 = vld [vmem:[#allocation11 + $0x1e8] sm:$0xff]  ;;  %v1186_v48 = vld [vmem:[#allocation11 + $0x1d8] sm:$0xff] }
 0x26e   :  { %1432 = vmatprep.subr.mxu1 %v1144_v18  ;;  %v1209_v29 = vmul.f32 %v1207_v27, %v4882_v20  ;;  %v1215_v62 = vmul.f32 %v1201_v58, %v4944_v15  ;;  %v1185_v18 = vld [vmem:[#allocation11 + $0x1d0] sm:$0xff]  ;;  %v1184_v21 = vld [vmem:[#allocation11 + $0x1c8] sm:$0xff]  ;;  %v1182_v22 = vld [vmem:[#allocation11 + $0x1b8] sm:$0xff] }
 0x26f   :  { %1433 = vmatpush1.msra.mxu1 %v1143_v23  ;;  %v1181_v23 = vld [vmem:[#allocation11 + $0x1b0] sm:$0xff]  ;;  %v1180_v25 = vld [vmem:[#allocation11 + $0x1a8] sm:$0xff]  ;;  %v1178_v27 = vld [vmem:[#allocation11 + $0x198] sm:$0xff] }
 0x270   :  { %1434 = vmatprep.subr.mxu1 %v1142_v26  ;;  %1393 = vmatprep.mubr.f32.mxu0 %v1209_v29  ;;  %v1179_v26 = vld [vmem:[#allocation11 + $0x1a0] sm:$0xff]  ;;  %v1176_v29 = vld [vmem:[#allocation11 + $0x188] sm:$0xff]  ;;  %v1162_v58 = vld [vmem:[#allocation11 + $0x118] sm:$0xff] }
 0x271   :  { %1435 = vmatpush1.msra.mxu1 %v1141_v31  ;;  %1394 = vmatmul.mubr.f32.vlgmr.msra.gmra.mxu0 %v1208_v16  ;;  %v1175_v31 = vld [vmem:[#allocation11 + $0x180] sm:$0xff]  ;;  %v1174_v16 = vld [vmem:[#allocation11 + $0x178] sm:$0xff] }
 0x272   :  { %1436 = vmatprep.subr.mxu1 %v1140_v33  ;;  %1399 = vmatprep.mubr.f32.mxu0 %v1211_v35  ;;  %v1173_v33 = vld [vmem:[#allocation11 + $0x170] sm:$0xff]  ;;  %v1171_v35 = vld [vmem:[#allocation11 + $0x160] sm:$0xff] }
 0x273   :  { %1437 = vmatpush1.msra.mxu1 %v1139_v36  ;;  %v1170_v36 = vld [vmem:[#allocation11 + $0x158] sm:$0xff]  ;;  %v1167_v40 = vld [vmem:[#allocation11 + $0x140] sm:$0xff] }
 0x274   :  { %1438 = vmatprep.subr.mxu1 %v1138_v39  ;;  %v1168_v39 = vld [vmem:[#allocation11 + $0x148] sm:$0xff]  ;;  %v1163_v56 = vld [vmem:[#allocation11 + $0x120] sm:$0xff] }
 0x275   :  { %1439 = vmatpush1.msra.mxu1 %v1137_v41  ;;  %1400 = vmatmul.mubr.f32.gmra.mxu0 %v1210_v43  ;;  %v1166_v41 = vld [vmem:[#allocation11 + $0x138] sm:$0xff]  ;;  %v1165_v43 = vld [vmem:[#allocation11 + $0x130] sm:$0xff] }
 0x276   :  { %1440 = vmatprep.subr.mxu1 %v1136_v46  ;;  %1405 = vmatprep.mubr.f32.mxu0 %v1213_v49  ;;  %v1218_v46 = vrot.slane %v4981_v54, 1  ;;  %v1164_v49 = vld [vmem:[#allocation11 + $0x128] sm:$0xff]  ;;  %v1223_v54 = vrot.slane %v5004_v14, 1 }
 0x277   :  { %1441 = vmatpush1.msra.mxu1 %v1135_v50  ;;  %v1221_v50 = vrot.slane %v4987_v0, 1 }
 0x278   :  { %1442 = vmatprep.subr.mxu1 %v1134_v32  ;;  %v1216_v32 = vrot.slane %v4974_v30, 1  ;;  %v1231_v7 = vsel %vm644_vm1, %v1223_v54, %v1217_v63  ;;  %v1649_v63 = vld [vmem:[#allocation14 + $0xd8] sm:$0xff] }
 0x279   :  { %1443 = vmatpush1.msra.mxu1 %v1133_v59  ;;  %1406 = vmatmul.mubr.f32.gmra.mxu0 %v1212_v60  ;;  %v1161_v59 = vld [vmem:[#allocation11 + $0x110] sm:$0xff]  ;;  %v1227_v30 = vsel %vm644_vm1, %v1219_v53, %v1221_v50  ;;  %v1225_v14 = vsel %vm644_vm1, %v1221_v50, %v1223_v54 }
 0x27a   :  { %1444 = vmatprep.subr.mxu1 %v1132_v28  ;;  %1411 = vmatprep.mubr.f32.mxu0 %v1215_v62  ;;  %v1228_v60 = vsel %vm644_vm1, %v1216_v32, %v1218_v46  ;;  %v1220_v28 = vrot.slane %v4990_v3, 1  ;;  %v1160_v62 = vld [vmem:[#allocation11 + $0x108] sm:$0xff]  ;;  %v1235_v3 = vmul.f32 %v1227_v30, %v4910_v57  ;;  %v1237_v53 = vmul.f32 %v1225_v14, %v4926_v6  ;;  %v1584_v50 = vld [vmem:[#allocation13 + $0xd0] sm:$0xff]  ;;  %v1622_v14 = vld [vmem:[#allocation14] sm:$0xff] }
 0x27b   :  { %1445 = vmatpush1.msra.mxu1 %v1131_v1  ;;  %v1159_v1 = vld [vmem:[#allocation11 + $0x100] sm:$0xff]  ;;  %v1232_v0 = vmul.f32 %v1228_v60, %v4905_v55  ;;  %v1627_v60 = vld [vmem:[#allocation14 + $0x28] sm:$0xff]  ;;  %v1580_v54 = vld [vmem:[#allocation13 + $0xb0] sm:$0xff] }
 0x27c   :  { %1446 = vmatprep.subr.mxu1 %v1130_v61  ;;  %v1226_v61 = vsel %vm644_vm1, %v1218_v46, %v1220_v28  ;;  %v1585_v46 = vld [vmem:[#allocation13 + $0xd8] sm:$0xff]  ;;  %v1579_v30 = vld [vmem:[#allocation13 + $0xa8] sm:$0xff] }
 0x27d   :  { %1447 = vmatpush1.msra.mxu1 %v1129_v5  ;;  %1412 = vmatmul.mubr.f32.gmra.mxu0 %v1214_v8  ;;  %v1234_v45 = vmul.f32 %v1226_v61, %v4910_v57  ;;  %v1224_v5 = vsel %vm644_vm1, %v1220_v28, %v1222_v4  ;;  %v1581_v28 = vld [vmem:[#allocation13 + $0xb8] sm:$0xff] }
 0x27e   :  { %1448 = vmatprep.subr.mxu1 %v1128_v9  ;;  %v1236_v8 = vmul.f32 %v1224_v5, %v4926_v6  ;;  %v1239_v9 = vmul.f32 %v1231_v7, %v4948_v19  ;;  %v1577_v61 = vld [vmem:[#allocation13 + $0x98] sm:$0xff]  ;;  %v1575_v5 = vld [vmem:[#allocation13 + $0x88] sm:$0xff]  ;;  %v1684_v7 = vld [vmem:[#allocation14 + $0x1f0] sm:$0xff] }
 0x27f   :  { %1449 = vmatpush1.msra.mxu1 %v1127_v11  ;;  %v1230_v11 = vsel %vm644_vm1, %v1222_v4, %v1216_v32  ;;  %v1583_v32 = vld [vmem:[#allocation13 + $0xc8] sm:$0xff]  ;;  %v1578_v4 = vld [vmem:[#allocation13 + $0xa0] sm:$0xff] }
 0x280   :  { %1450 = vmatprep.subr.mxu1 %v1190_v13  ;;  %v1653_v13 = vld [vmem:[#allocation14 + $0xf8] sm:$0xff] }
 0x281   :  { %1451 = vmatpush2.msra.mxu1 %v1189_v44  ;;  %1799 = vmatprep.subr.mxu0 %v1653_v13  ;;  %v1238_v44 = vmul.f32 %v1230_v11, %v4948_v19  ;;  %v1573_v11 = vld [vmem:[#allocation13 + $0x78] sm:$0xff]  ;;  %v1682_v13 = vld [vmem:[#allocation14 + $0x1e0] sm:$0xff] }
 0x282   :  { %1452 = vmatprep.subr.mxu1 %v1188_v17  ;;  %v1652_v17 = vld [vmem:[#allocation14 + $0xf0] sm:$0xff] }
 0x283   :  { %1453 = vmatpush2.msra.mxu1 %v1187_v12  ;;  %v1651_v12 = vld [vmem:[#allocation14 + $0xe8] sm:$0xff]  ;;  %1800 = vmatpush1.msra.mxu0 %v1652_v17  ;;  %v1681_v17 = vld [vmem:[#allocation14 + $0x1d8] sm:$0xff] }
 0x284   :  { %1454 = vmatprep.subr.mxu1 %v1186_v48  ;;  %1801 = vmatprep.subr.mxu0 %v1651_v12  ;;  %v1648_v48 = vld [vmem:[#allocation14 + $0xd0] sm:$0xff]  ;;  %v1571_v12 = vld [vmem:[#allocation13 + $0x68] sm:$0xff] }
 0x285   :  { %1455 = vmatpush2.msra.mxu1 %v1185_v18  ;;  %1802 = vmatpush1.msra.mxu0 %v1650_v24  ;;  %v1647_v18 = vld [vmem:[#allocation14 + $0xc8] sm:$0xff]  ;;  %v1680_v24 = vld [vmem:[#allocation14 + $0x1d0] sm:$0xff] }
 0x286   :  { %1456 = vmatprep.subr.mxu1 %v1184_v21  ;;  %1803 = vmatprep.subr.mxu0 %v1649_v63  ;;  %v1646_v21 = vld [vmem:[#allocation14 + $0xc0] sm:$0xff] }
 0x287   :  { %1457 = vmatpush2.msra.mxu1 %v1183_v38  ;;  %1804 = vmatpush1.msra.mxu0 %v1648_v48  ;;  %v1645_v38 = vld [vmem:[#allocation14 + $0xb8] sm:$0xff]  ;;  %v1570_v63 = vld [vmem:[#allocation13 + $0x60] sm:$0xff]  ;;  %v1679_v48 = vld [vmem:[#allocation14 + $0x1c8] sm:$0xff] }
 0x288   :  { %1458 = vmatprep.subr.mxu1 %v1182_v22  ;;  %1805 = vmatprep.subr.mxu0 %v1647_v18  ;;  %v1644_v22 = vld [vmem:[#allocation14 + $0xb0] sm:$0xff]  ;;  %v1569_v18 = vld [vmem:[#allocation13 + $0x58] sm:$0xff] }
 0x289   :  { %1459 = vmatpush2.msra.mxu1 %v1181_v23  ;;  %1806 = vmatpush1.msra.mxu0 %v1646_v21  ;;  %v1643_v23 = vld [vmem:[#allocation14 + $0xa8] sm:$0xff]  ;;  %v1678_v21 = vld [vmem:[#allocation14 + $0x1c0] sm:$0xff] }
 0x28a   :  { %1460 = vmatprep.subr.mxu1 %v1180_v25  ;;  %1807 = vmatprep.subr.mxu0 %v1645_v38  ;;  %v1642_v25 = vld [vmem:[#allocation14 + $0xa0] sm:$0xff]  ;;  %v1568_v38 = vld [vmem:[#allocation13 + $0x50] sm:$0xff] }
 0x28b   :  { %1461 = vmatpush2.msra.mxu1 %v1179_v26  ;;  %1808 = vmatpush1.msra.mxu0 %v1644_v22  ;;  %v1641_v26 = vld [vmem:[#allocation14 + $0x98] sm:$0xff] }
 0x28c   :  { %1462 = vmatprep.subr.mxu1 %v1178_v27  ;;  %1809 = vmatprep.subr.mxu0 %v1643_v23  ;;  %v1640_v27 = vld [vmem:[#allocation14 + $0x90] sm:$0xff]  ;;  %v1677_v22 = vld [vmem:[#allocation14 + $0x1b8] sm:$0xff]  ;;  %v1567_v23 = vld [vmem:[#allocation13 + $0x48] sm:$0xff] }
 0x28d   :  { %1463 = vmatpush2.msra.mxu1 %v1177_v51  ;;  %1810 = vmatpush1.msra.mxu0 %v1642_v25  ;;  %v1639_v51 = vld [vmem:[#allocation14 + $0x88] sm:$0xff]  ;;  %v1676_v25 = vld [vmem:[#allocation14 + $0x1b0] sm:$0xff] }
 0x28e   :  { %1464 = vmatprep.subr.mxu1 %v1176_v29  ;;  %1811 = vmatprep.subr.mxu0 %v1641_v26  ;;  %v1638_v29 = vld [vmem:[#allocation14 + $0x80] sm:$0xff] }
 0x28f   :  { %1465 = vmatpush2.msra.mxu1 %v1175_v31  ;;  %1812 = vmatpush1.msra.mxu0 %v1640_v27  ;;  %v1637_v31 = vld [vmem:[#allocation14 + $0x78] sm:$0xff]  ;;  %v1566_v26 = vld [vmem:[#allocation13 + $0x40] sm:$0xff]  ;;  %v1675_v27 = vld [vmem:[#allocation14 + $0x1a8] sm:$0xff] }
 0x290   :  { %1466 = vmatprep.subr.mxu1 %v1174_v16  ;;  %1813 = vmatprep.subr.mxu0 %v1639_v51  ;;  %v1636_v16 = vld [vmem:[#allocation14 + $0x70] sm:$0xff]  ;;  %v1565_v51 = vld [vmem:[#allocation13 + $0x38] sm:$0xff] }
 0x291   :  { %1467 = vmatpush2.msra.mxu1 %v1173_v33  ;;  %1814 = vmatpush1.msra.mxu0 %v1638_v29  ;;  %v1635_v33 = vld [vmem:[#allocation14 + $0x68] sm:$0xff]  ;;  %v1674_v29 = vld [vmem:[#allocation14 + $0x1a0] sm:$0xff] }
 0x292   :  { %1468 = vmatprep.subr.mxu1 %v1172_v34  ;;  %1815 = vmatprep.subr.mxu0 %v1637_v31  ;;  %v1589_v34 = vld [vmem:[#allocation13 + $0xf8] sm:$0xff]  ;;  %v1564_v31 = vld [vmem:[#allocation13 + $0x30] sm:$0xff] }
 0x293   :  { %1469 = vmatpush2.msra.mxu1 %v1171_v35  ;;  %1816 = vmatpush1.msra.mxu0 %v1636_v16  ;;  %v1634_v35 = vld [vmem:[#allocation14 + $0x60] sm:$0xff]  ;;  %v1673_v16 = vld [vmem:[#allocation14 + $0x198] sm:$0xff] }
 0x294   :  { %1470 = vmatprep.subr.mxu1 %v1170_v36  ;;  %1817 = vmatprep.subr.mxu0 %v1635_v33  ;;  %v1588_v36 = vld [vmem:[#allocation13 + $0xf0] sm:$0xff]  ;;  %v1563_v33 = vld [vmem:[#allocation13 + $0x28] sm:$0xff] }
 0x295   :  { %1471 = vmatpush2.msra.mxu1 %v1169_v37  ;;  %1818 = vmatpush1.msra.mxu0 %v1634_v35  ;;  %v1633_v37 = vld [vmem:[#allocation14 + $0x58] sm:$0xff]  ;;  %v1562_v35 = vld [vmem:[#allocation13 + $0x20] sm:$0xff] }
 0x296   :  { %1472 = vmatprep.subr.mxu1 %v1168_v39  ;;  %v1587_v39 = vld [vmem:[#allocation13 + $0xe8] sm:$0xff]  ;;  %1819 = vmatprep.subr.mxu0 %v1633_v37  ;;  %v1561_v37 = vld [vmem:[#allocation13 + $0x18] sm:$0xff] }
 0x297   :  { %1473 = vmatpush2.msra.mxu1 %v1167_v40  ;;  %v1632_v40 = vld [vmem:[#allocation14 + $0x50] sm:$0xff] }
 0x298   :  { %1474 = vmatprep.subr.mxu1 %v1166_v41  ;;  %v1586_v41 = vld [vmem:[#allocation13 + $0xe0] sm:$0xff]  ;;  %1820 = vmatpush1.msra.mxu0 %v1632_v40  ;;  %v1560_v40 = vld [vmem:[#allocation13 + $0x10] sm:$0xff] }
 0x299   :  { %1475 = vmatpush2.msra.mxu1 %v1165_v43  ;;  %v1631_v43 = vld [vmem:[#allocation14 + $0x48] sm:$0xff] }
 0x29a   :  { %1476 = vmatprep.subr.mxu1 %v1164_v49  ;;  %v1630_v49 = vld [vmem:[#allocation14 + $0x40] sm:$0xff]  ;;  %1821 = vmatprep.subr.mxu0 %v1631_v43  ;;  %v1559_v43 = vld [vmem:[#allocation13 + $0x8] sm:$0xff] }
 0x29b   :  { %1477 = vmatpush2.msra.mxu1 %v1163_v56  ;;  %v1629_v56 = vld [vmem:[#allocation14 + $0x38] sm:$0xff]  ;;  %1822 = vmatpush1.msra.mxu0 %v1630_v49  ;;  %v1558_v49 = vld [vmem:[#allocation13] sm:$0xff] }
 0x29c   :  { %1478 = vmatprep.subr.mxu1 %v1162_v58  ;;  %v1628_v58 = vld [vmem:[#allocation14 + $0x30] sm:$0xff]  ;;  %1823 = vmatprep.subr.mxu0 %v1629_v56  ;;  %v1621_v56 = vld [vmem:[#allocation13 + $0x1f8] sm:$0xff] }
 0x29d   :  { %1479 = vmatpush2.msra.mxu1 %v1161_v59  ;;  %v1582_v59 = vld [vmem:[#allocation13 + $0xc0] sm:$0xff]  ;;  %1824 = vmatpush1.msra.mxu0 %v1628_v58  ;;  %v1620_v58 = vld [vmem:[#allocation13 + $0x1f0] sm:$0xff] }
 0x29e   :  { %1480 = vmatprep.subr.mxu1 %v1160_v62  ;;  %v1626_v62 = vld [vmem:[#allocation14 + $0x20] sm:$0xff]  ;;  %1825 = vmatprep.subr.mxu0 %v1627_v60  ;;  %v1619_v60 = vld [vmem:[#allocation13 + $0x1e8] sm:$0xff] }
 0x29f   :  { %1481 = vmatpush2.msra.mxu1 %v1159_v1  ;;  %v1625_v1 = vld [vmem:[#allocation14 + $0x18] sm:$0xff]  ;;  %1826 = vmatpush1.msra.mxu0 %v1626_v62  ;;  %v1618_v62 = vld [vmem:[#allocation13 + $0x1e0] sm:$0xff] }
 0x2a0   :  { %1483 = vmatmul.mubr.f32.vlgmr.msra.gmra.mxu1 %v1232_v0  ;;  %1888 = vmatprep.subr.mxu1 %v1589_v34  ;;  %v1624_v0 = vld [vmem:[#allocation14 + $0x10] sm:$0xff] }
 0x2a1   :  { %1488 = vmatprep.mubr.f32.mxu1 %v1235_v3  ;;  %1889 = vmatpush1.msra.mxu1 %v1588_v36  ;;  %v1623_v3 = vld [vmem:[#allocation14 + $0x8] sm:$0xff]  ;;  %v1672_v34 = vld [vmem:[#allocation14 + $0x190] sm:$0xff] }
 0x2a2   :  { %1890 = vmatprep.subr.mxu1 %v1587_v39  ;;  %1827 = vmatprep.subr.mxu0 %v1625_v1  ;;  %v1671_v36 = vld [vmem:[#allocation14 + $0x188] sm:$0xff]  ;;  %v1670_v39 = vld [vmem:[#allocation14 + $0x180] sm:$0xff]  ;;  %v1617_v1 = vld [vmem:[#allocation13 + $0x1d8] sm:$0xff] }
 0x2a3   :  { %1891 = vmatpush1.msra.mxu1 %v1586_v41  ;;  %1828 = vmatpush1.msra.mxu0 %v1624_v0  ;;  %v1669_v41 = vld [vmem:[#allocation14 + $0x178] sm:$0xff]  ;;  %v1616_v0 = vld [vmem:[#allocation13 + $0x1d0] sm:$0xff] }
 0x2a4   :  { %1489 = vmatmul.mubr.f32.gmra.mxu1 %v1234_v45  ;;  %1892 = vmatprep.subr.mxu1 %v1585_v46  ;;  %v1576_v45 = vld [vmem:[#allocation13 + $0x90] sm:$0xff] }
 0x2a5   :  { %1494 = vmatprep.mubr.f32.mxu1 %v1237_v53  ;;  %1893 = vmatpush1.msra.mxu1 %v1584_v50  ;;  %v1685_v53 = vld [vmem:[#allocation14 + $0x1f8] sm:$0xff]  ;;  %v1668_v46 = vld [vmem:[#allocation14 + $0x170] sm:$0xff]  ;;  %v1667_v50 = vld [vmem:[#allocation14 + $0x168] sm:$0xff] }
 0x2a6   :  { %1894 = vmatprep.subr.mxu1 %v1583_v32  ;;  %1829 = vmatprep.subr.mxu0 %v1623_v3  ;;  %v1666_v32 = vld [vmem:[#allocation14 + $0x160] sm:$0xff]  ;;  %v1615_v3 = vld [vmem:[#allocation13 + $0x1c8] sm:$0xff] }
 0x2a7   :  { %1895 = vmatpush1.msra.mxu1 %v1582_v59  ;;  %1830 = vmatpush1.msra.mxu0 %v1622_v14  ;;  %v1665_v59 = vld [vmem:[#allocation14 + $0x158] sm:$0xff]  ;;  %v1614_v14 = vld [vmem:[#allocation13 + $0x1c0] sm:$0xff] }
 0x2a8   :  { %1495 = vmatmul.mubr.f32.gmra.mxu1 %v1236_v8  ;;  %1896 = vmatprep.subr.mxu1 %v1581_v28  ;;  %v1574_v8 = vld [vmem:[#allocation13 + $0x80] sm:$0xff]  ;;  %v1664_v28 = vld [vmem:[#allocation14 + $0x150] sm:$0xff] }
 0x2a9   :  { %1500 = vmatprep.mubr.f32.mxu1 %v1239_v9  ;;  %1897 = vmatpush1.msra.mxu1 %v1580_v54  ;;  %v1683_v9 = vld [vmem:[#allocation14 + $0x1e8] sm:$0xff] }
 0x2aa   :  { %1898 = vmatprep.subr.mxu1 %v1579_v30  ;;  %1831 = vmatprep.subr.mxu0 %v1685_v53  ;;  %v1663_v54 = vld [vmem:[#allocation14 + $0x148] sm:$0xff]  ;;  %v1662_v30 = vld [vmem:[#allocation14 + $0x140] sm:$0xff]  ;;  %v1613_v53 = vld [vmem:[#allocation13 + $0x1b8] sm:$0xff] }
 0x2ab   :  { %1899 = vmatpush1.msra.mxu1 %v1578_v4  ;;  %1832 = vmatpush2.msra.mxu0 %v1684_v7  ;;  %v1661_v4 = vld [vmem:[#allocation14 + $0x138] sm:$0xff]  ;;  %v1612_v7 = vld [vmem:[#allocation13 + $0x1b0] sm:$0xff] }
 0x2ac   :  { %1501 = vmatmul.mubr.f32.gmra.mxu1 %v1238_v44  ;;  %1900 = vmatprep.subr.mxu1 %v1577_v61  ;;  %v1572_v44 = vld [vmem:[#allocation13 + $0x70] sm:$0xff] }
 0x2ad   :  { %1901 = vmatpush1.msra.mxu1 %v1576_v45  ;;  %1833 = vmatprep.subr.mxu0 %v1683_v9  ;;  %v1660_v61 = vld [vmem:[#allocation14 + $0x130] sm:$0xff]  ;;  %v1659_v45 = vld [vmem:[#allocation14 + $0x128] sm:$0xff] }
 0x2ae   :  { %1902 = vmatprep.subr.mxu1 %v1575_v5  ;;  %1834 = vmatpush2.msra.mxu0 %v1682_v13  ;;  %v1658_v5 = vld [vmem:[#allocation14 + $0x120] sm:$0xff]  ;;  %v1611_v9 = vld [vmem:[#allocation13 + $0x1a8] sm:$0xff] }
 0x2af   :  { %1903 = vmatpush1.msra.mxu1 %v1574_v8  ;;  %1835 = vmatprep.subr.mxu0 %v1681_v17  ;;  %v1657_v8 = vld [vmem:[#allocation14 + $0x118] sm:$0xff]  ;;  %v1610_v13 = vld [vmem:[#allocation13 + $0x1a0] sm:$0xff] }
 0x2b0   :  { %1904 = vmatprep.subr.mxu1 %v1573_v11  ;;  %1836 = vmatpush2.msra.mxu0 %v1680_v24  ;;  %v1656_v11 = vld [vmem:[#allocation14 + $0x110] sm:$0xff]  ;;  %v1609_v17 = vld [vmem:[#allocation13 + $0x198] sm:$0xff] }
 0x2b1   :  { %1905 = vmatpush1.msra.mxu1 %v1572_v44  ;;  %1837 = vmatprep.subr.mxu0 %v1679_v48  ;;  %v1655_v44 = vld [vmem:[#allocation14 + $0x108] sm:$0xff]  ;;  %v1608_v24 = vld [vmem:[#allocation13 + $0x190] sm:$0xff]  ;;  %v1717_v48 = vld [vmem:[#allocation16 + $0xf8] sm:$0xff] }
 0x2b2   :  { %1906 = vmatprep.subr.mxu1 %v1571_v12  ;;  %1838 = vmatpush2.msra.mxu0 %v1678_v21  ;;  %v1654_v12 = vld [vmem:[#allocation14 + $0x100] sm:$0xff]  ;;  %v1605_v21 = vld [vmem:[#allocation13 + $0x178] sm:$0xff] }
 0x2b3   :  { %1907 = vmatpush1.msra.mxu1 %v1570_v63  ;;  %1839 = vmatprep.subr.mxu0 %v1677_v22  ;;  %v1607_v63 = vld [vmem:[#allocation13 + $0x188] sm:$0xff] }
 0x2b4   :  { %1908 = vmatprep.subr.mxu1 %v1569_v18  ;;  %1840 = vmatpush2.msra.mxu0 %v1676_v25  ;;  %v1606_v18 = vld [vmem:[#allocation13 + $0x180] sm:$0xff]  ;;  %v1603_v22 = vld [vmem:[#allocation13 + $0x168] sm:$0xff]  ;;  %v1601_v25 = vld [vmem:[#allocation13 + $0x158] sm:$0xff] }
 0x2b5   :  { %1909 = vmatpush1.msra.mxu1 %v1568_v38  ;;  %1841 = vmatprep.subr.mxu0 %v1675_v27  ;;  %v1604_v38 = vld [vmem:[#allocation13 + $0x170] sm:$0xff]  ;;  %v1599_v27 = vld [vmem:[#allocation13 + $0x148] sm:$0xff] }
 0x2b6   :  { %1910 = vmatprep.subr.mxu1 %v1567_v23  ;;  %1842 = vmatpush2.msra.mxu0 %v1674_v29  ;;  %v1602_v23 = vld [vmem:[#allocation13 + $0x160] sm:$0xff]  ;;  %v1597_v29 = vld [vmem:[#allocation13 + $0x138] sm:$0xff] }
 0x2b7   :  { %1911 = vmatpush1.msra.mxu1 %v1566_v26  ;;  %1843 = vmatprep.subr.mxu0 %v1673_v16  ;;  %v1600_v26 = vld [vmem:[#allocation13 + $0x150] sm:$0xff]  ;;  %v1595_v16 = vld [vmem:[#allocation13 + $0x128] sm:$0xff] }
 0x2b8   :  { %1912 = vmatprep.subr.mxu1 %v1565_v51  ;;  %1844 = vmatpush2.msra.mxu0 %v1672_v34  ;;  %v1598_v51 = vld [vmem:[#allocation13 + $0x140] sm:$0xff]  ;;  %v1593_v34 = vld [vmem:[#allocation13 + $0x118] sm:$0xff] }
 0x2b9   :  { %1913 = vmatpush1.msra.mxu1 %v1564_v31  ;;  %1845 = vmatprep.subr.mxu0 %v1671_v36  ;;  %v1596_v31 = vld [vmem:[#allocation13 + $0x130] sm:$0xff]  ;;  %v1591_v36 = vld [vmem:[#allocation13 + $0x108] sm:$0xff] }
 0x2ba   :  { %1914 = vmatprep.subr.mxu1 %v1563_v33  ;;  %1846 = vmatpush2.msra.mxu0 %v1670_v39  ;;  %v1594_v33 = vld [vmem:[#allocation13 + $0x120] sm:$0xff] }
 0x2bb   :  { %1915 = vmatpush1.msra.mxu1 %v1562_v35  ;;  %1847 = vmatprep.subr.mxu0 %v1669_v41  ;;  %v1592_v35 = vld [vmem:[#allocation13 + $0x110] sm:$0xff] }
 0x2bc   :  { %1916 = vmatprep.subr.mxu1 %v1561_v37  ;;  %1848 = vmatpush2.msra.mxu0 %v1668_v46  ;;  %v1590_v37 = vld [vmem:[#allocation13 + $0x100] sm:$0xff] }
 0x2bd   :  { %1917 = vmatpush1.msra.mxu1 %v1560_v40  ;;  %1849 = vmatprep.subr.mxu0 %v1667_v50 }
 0x2be   :  { %1918 = vmatprep.subr.mxu1 %v1559_v43  ;;  %1850 = vmatpush2.msra.mxu0 %v1666_v32 }
 0x2bf   :  { %1919 = vmatpush1.msra.mxu1 %v1558_v49  ;;  %1851 = vmatprep.subr.mxu0 %v1665_v59 }
 0x2c0   :  { %1920 = vmatprep.subr.mxu1 %v1621_v56  ;;  %1852 = vmatpush2.msra.mxu0 %v1664_v28 }
 0x2c1   :  { %1921 = vmatpush2.msra.mxu1 %v1620_v58  ;;  %1853 = vmatprep.subr.mxu0 %v1663_v54 }
 0x2c2   :  { %1922 = vmatprep.subr.mxu1 %v1619_v60  ;;  %1854 = vmatpush2.msra.mxu0 %v1662_v30  ;;  %v1191_v60 = vld [vmem:[%s5530_s30] sm:$0x3] }
 0x2c3   :  { %1923 = vmatpush2.msra.mxu1 %v1618_v62  ;;  %1855 = vmatprep.subr.mxu0 %v1661_v4 }
 0x2c4   :  { %1924 = vmatprep.subr.mxu1 %v1617_v1  ;;  %1856 = vmatpush2.msra.mxu0 %v1660_v61  ;;  %v1519_v1 = vrot.slane %v1191_v60, %v4958_v47 }
 0x2c5   :  { %1925 = vmatpush2.msra.mxu1 %v1616_v0  ;;  %1857 = vmatprep.subr.mxu0 %v1659_v45 }
 0x2c6   :  { %1926 = vmatprep.subr.mxu1 %v1615_v3  ;;  %1858 = vmatpush2.msra.mxu0 %v1658_v5  ;;  %v5072_v3 = vrot.slane %v1191_v60, %v4962_v52  ;;  %v1710_v60 = vld [vmem:[#allocation16 + $0xc0] sm:$0xff] }
 0x2c7   :  { %1927 = vmatpush2.msra.mxu1 %v1614_v14  ;;  %1859 = vmatprep.subr.mxu0 %v1657_v8 }
 0x2c8   :  { %1928 = vmatprep.subr.mxu1 %v1613_v53  ;;  %1860 = vmatpush2.msra.mxu0 %v1656_v11 }
 0x2c9   :  { %1929 = vmatpush2.msra.mxu1 %v1612_v7  ;;  %1861 = vmatprep.subr.mxu0 %v1655_v44 }
 0x2ca   :  { %1930 = vmatprep.subr.mxu1 %v1611_v9  ;;  %1862 = vmatpush2.msra.mxu0 %v1654_v12 }
 0x2cb   :  { %1931 = vmatpush2.msra.mxu1 %v1610_v13  ;;  %1977 = vmatprep.subr.mxu0 %v1717_v48 }
 0x2cc   :  { %1932 = vmatprep.subr.mxu1 %v1609_v17 }
 0x2cd   :  { %1933 = vmatpush2.msra.mxu1 %v1608_v24 }
 0x2ce   :  { %1934 = vmatprep.subr.mxu1 %v1607_v63 }
 0x2cf   :  { %1935 = vmatpush2.msra.mxu1 %v1606_v18 }
 0x2d0   :  { %1936 = vmatprep.subr.mxu1 %v1605_v21 }
 0x2d1   :  { %1937 = vmatpush2.msra.mxu1 %v1604_v38 }
 0x2d2   :  { %1938 = vmatprep.subr.mxu1 %v1603_v22 }
 0x2d3   :  { %1939 = vmatpush2.msra.mxu1 %v1602_v23 }
 0x2d4   :  { %1940 = vmatprep.subr.mxu1 %v1601_v25  ;;  %v1716_v25 = vld [vmem:[#allocation16 + $0xf0] sm:$0xff] }
 0x2d5   :  { %1941 = vmatpush2.msra.mxu1 %v1600_v26 }
 0x2d6   :  { %1942 = vmatprep.subr.mxu1 %v1599_v27 }
 0x2d7   :  { %1943 = vmatpush2.msra.mxu1 %v1598_v51 }
 0x2d8   :  { %1944 = vmatprep.subr.mxu1 %v1597_v29 }
 0x2d9   :  { %1945 = vmatpush2.msra.mxu1 %v1596_v31  ;;  %v1715_v31 = vld [vmem:[#allocation16 + $0xe8] sm:$0xff] }
 0x2da   :  { %1946 = vmatprep.subr.mxu1 %v1595_v16 }
 0x2db   :  { %1947 = vmatpush2.msra.mxu1 %v1594_v33 }
 0x2dc   :  { %1948 = vmatprep.subr.mxu1 %v1593_v34  ;;  %v1714_v34 = vld [vmem:[#allocation16 + $0xe0] sm:$0xff] }
 0x2dd   :  { %1949 = vmatpush2.msra.mxu1 %v1592_v35 }
 0x2de   :  { %1950 = vmatprep.subr.mxu1 %v1591_v36 }
 0x2df   :  { %1951 = vmatpush2.msra.mxu1 %v1590_v37  ;;  %v1713_v37 = vld [vmem:[#allocation16 + $0xd8] sm:$0xff] }
 0x320   :  { %v1306_v39 = vpop.f32.mrf.mxu1 }
 0x322   :  { %v1308_v40 = vpop.f32.mrf.mxu1 }
 0x324   :  { %v1312_v41 = vpop.f32.mrf.mxu1 }
 0x326   :  { %v1314_v43 = vpop.f32.mrf.mxu1 }
 0x328   :  { %v1318_v49 = vpop.f32.mrf.mxu1 }
 0x32a   :  { %v1320_v56 = vpop.f32.mrf.mxu1 }
 0x32c   :  { %v1324_v58 = vpop.f32.mrf.mxu1 }
 0x32e   :  { %v1326_v28 = vpop.f32.mrf.mxu1 }
 0x331   :  { %v1395_v46 = vpop.f32.mrf.mxu0 }
 0x332   :  { %v1396_v54 = vadd.f32 %v1395_v46, %v1306_v39 }
 0x333   :  { %v1397_v50 = vpop.f32.mrf.mxu0 }
 0x334   :  { %v1398_v0 = vadd.f32 %v1397_v50, %v1308_v40 }
 0x335   :  { %v1401_v32 = vpop.f32.mrf.mxu0 }
 0x336   :  { %v1402_v45 = vadd.f32 %v1401_v32, %v1312_v41  ;;  %v1711_v32 = vld [vmem:[#allocation16 + $0xc8] sm:$0xff] }
 0x337   :  { %v1403_v59 = vpop.f32.mrf.mxu0 }
 0x338   :  { %v1404_v8 = vadd.f32 %v1403_v59, %v1314_v43 }
 0x339   :  { %v1407_v62 = vpop.f32.mrf.mxu0 }
 0x33a   :  { %v1408_v13 = vadd.f32 %v1407_v62, %v1318_v49  ;;  %v1712_v49 = vld [vmem:[#allocation16 + $0xd0] sm:$0xff] }
 0x33b   :  { %v1409_v61 = vpop.f32.mrf.mxu0 }
 0x33c   :  { %v1410_v21 = vadd.f32 %v1409_v61, %v1320_v56  ;;  %v1708_v61 = vld [vmem:[#allocation16 + $0xb0] sm:$0xff] }
 0x33d   :  { %v1413_v44 = vpop.f32.mrf.mxu0 }
 0x33e   :  { %v1414_v26 = vadd.f32 %v1413_v44, %v1324_v58  ;;  %v1705_v44 = vld [vmem:[#allocation16 + $0x98] sm:$0xff] }
 0x33f   :  { %v1415_v27 = vpop.f32.mrf.mxu0 }
 0x340   :  { %v1416_v40 = vadd.f32 %v1415_v27, %v1326_v28 }
 0x360   :  { %v1484_v30 = vpop.f32.mrf.mxu1 }
 0x361   :  { %v1507_v4 = vadd.f32 %v1484_v30, %v1396_v54  ;;  %v1709_v30 = vld [vmem:[#allocation16 + $0xb8] sm:$0xff] }
 0x362   :  { %v1486_v14 = vpop.f32.mrf.mxu1 }
 0x363   :  { %v1526_v53 = vadd.f32 %v1519_v1, %v1507_v4  ;;  %v1508_v5 = vadd.f32 %v1486_v14, %v1398_v0 }
 0x364   :  { %v1490_v7 = vpop.f32.mrf.mxu1 }
 0x365   :  { %v1527_v9 = vadd.f32 %v5072_v3, %v1508_v5  ;;  %v1509_v11 = vadd.f32 %v1490_v7, %v1402_v45  ;;  %vm1534_vm10 = vcmp.ge.f32.partialorder %v1526_v53, 0.0  ;;  %v1542_v17 = vmul.f32 0.2, %v1526_v53 }
 0x366   :  { %v1492_v12 = vpop.f32.mrf.mxu1 }
 0x367   :  { %v1528_v24 = vadd.f32 %v1519_v1, %v1509_v11  ;;  %v1510_v63 = vadd.f32 %v1492_v12, %v1404_v8  ;;  %vm1535_vm11 = vcmp.ge.f32.partialorder %v1527_v9, 0.0  ;;  %v1543_v48 = vmul.f32 0.2, %v1527_v9 }
 0x368   :  { %v1496_v18 = vpop.f32.mrf.mxu1  ;;  %v5080_v29 = vsel %vm1534_vm10, %v1526_v53, %v1542_v17  ;;  %v1707_v53 = vld [vmem:[#allocation16 + $0xa8] sm:$0xff] }
 0x369   :  { %v1529_v38 = vadd.f32 %v5072_v3, %v1510_v63  ;;  %v1511_v22 = vadd.f32 %v1496_v18, %v1408_v13  ;;  %v5076_v23 = vsel %vm1535_vm11, %v1527_v9, %v1543_v48  ;;  %vm1536_vm12 = vcmp.ge.f32.partialorder %v1528_v24, 0.0  ;;  %v1704_v63 = vld [vmem:[#allocation16 + $0x90] sm:$0xff] }
 0x36a   :  { %v1498_v51 = vpop.f32.mrf.mxu1  ;;  %1863 = vmatprep.mubr.f32.mxu0 %v5076_v23  ;;  %v1544_v39 = vmul.f32 0.2, %v1528_v24  ;;  %v1776_v4 = vrot.slane %v5076_v23, 1  ;;  %v1751_v11 = vrot.slane %v5080_v29, 7  ;;  %v1752_v12 = vrot.slane %v5076_v23, 7  ;;  %v2209_v23 = vld [vmem:[#allocation19 + $0xe0] sm:$0xff] }
 0x36b   :  { %v1530_v16 = vadd.f32 %v1519_v1, %v1511_v22  ;;  %v1512_v33 = vadd.f32 %v1498_v51, %v1410_v21  ;;  %1864 = vmatmul.mubr.f32.vlgmr.msra.gmra.mxu0 %v5080_v29  ;;  %vm1537_vm13 = vcmp.ge.f32.partialorder %v1529_v38, 0.0  ;;  %v1545_v35 = vmul.f32 0.2, %v1529_v38  ;;  %v1703_v21 = vld [vmem:[#allocation16 + $0x88] sm:$0xff]  ;;  %v1701_v51 = vld [vmem:[#allocation16 + $0x78] sm:$0xff] }
 0x36c   :  { %1978 = vmatpush1.msra.mxu0 %v1716_v25  ;;  %v1502_v36 = vpop.f32.mrf.mxu1  ;;  %v5088_v56 = vsel %vm1536_vm12, %v1528_v24, %v1544_v39  ;;  %v1702_v25 = vld [vmem:[#allocation16 + $0x80] sm:$0xff] }
 0x36d   :  { %v1531_v41 = vadd.f32 %v5072_v3, %v1512_v33  ;;  %v1513_v43 = vadd.f32 %v1502_v36, %v1414_v26  ;;  %1979 = vmatprep.subr.mxu0 %v1715_v31  ;;  %v5084_v46 = vsel %vm1537_vm13, %v1529_v38, %v1545_v35  ;;  %v1546_v28 = vmul.f32 0.2, %v1530_v16  ;;  %v1700_v33 = vld [vmem:[#allocation16 + $0x70] sm:$0xff]  ;;  %v1699_v35 = vld [vmem:[#allocation16 + $0x68] sm:$0xff]  ;;  %v1698_v39 = vld [vmem:[#allocation16 + $0x60] sm:$0xff] }
 0x36e   :  { %1980 = vmatpush1.msra.mxu0 %v1714_v34  ;;  %v1504_v50 = vpop.f32.mrf.mxu1  ;;  %1869 = vmatprep.mubr.f32.mxu0 %v5084_v46  ;;  %v1778_v62 = vrot.slane %v5084_v46, 1  ;;  %vm1538_vm15 = vcmp.ge.f32.partialorder %v1530_v16, 0.0  ;;  %v1754_v7 = vrot.slane %v5084_v46, 7  ;;  %v1753_v48 = vrot.slane %v5088_v56, 7 }
 0x36f   :  { %v1532_v58 = vadd.f32 %v1519_v1, %v1513_v43  ;;  %v1514_v59 = vadd.f32 %v1504_v50, %v1416_v40  ;;  %1981 = vmatprep.subr.mxu0 %v1713_v37  ;;  %1870 = vmatmul.mubr.f32.gmra.mxu0 %v5088_v56  ;;  %vm1539_vm14 = vcmp.ge.f32.partialorder %v1531_v41, 0.0  ;;  %v1547_v54 = vmul.f32 0.2, %v1531_v41  ;;  %v1696_v43 = vld [vmem:[#allocation16 + $0x50] sm:$0xff]  ;;  %v1695_v50 = vld [vmem:[#allocation16 + $0x48] sm:$0xff] }
 0x370   :  { %1982 = vmatpush1.msra.mxu0 %v1712_v49  ;;  %v5097_v45 = vsel %vm1538_vm15, %v1530_v16, %v1546_v28  ;;  %v1788_v9 = vsel %vm644_vm1, %v1776_v4, %v1778_v62  ;;  %v1764_v27 = vsel %vm599_vm0, %v1752_v12, %v1754_v7  ;;  %v1763_v37 = vsel %vm599_vm0, %v1751_v11, %v1753_v48  ;;  %v1693_v28 = vld [vmem:[#allocation16 + $0x38] sm:$0xff] }
 0x371   :  { %v1533_v0 = vadd.f32 %v5072_v3, %v1514_v59  ;;  %1983 = vmatprep.subr.mxu0 %v1711_v32  ;;  %v5094_v1 = vsel %vm1539_vm14, %v1531_v41, %v1547_v54  ;;  %vm1540_vm2 = vcmp.ge.f32.partialorder %v1532_v58, 0.0  ;;  %v1548_v14 = vmul.f32 0.2, %v1532_v58  ;;  %v1706_v3 = vld [vmem:[#allocation16 + $0xa0] sm:$0xff]  ;;  %v1697_v41 = vld [vmem:[#allocation16 + $0x58] sm:$0xff]  ;;  %v1692_v54 = vld [vmem:[#allocation16 + $0x30] sm:$0xff] }
 0x372   :  { %1984 = vmatpush1.msra.mxu0 %v1710_v60  ;;  %1875 = vmatprep.mubr.f32.mxu0 %v5094_v1  ;;  %v1792_v38 = vmul.f32 %v1788_v9, %v4905_v55  ;;  %v1756_v22 = vrot.slane %v5094_v1, 7  ;;  %v1755_v34 = vrot.slane %v5097_v45, 7  ;;  %v1770_v36 = vmul.f32 %v1764_v27, %v4890_v42  ;;  %v1694_v59 = vld [vmem:[#allocation16 + $0x40] sm:$0xff]  ;;  %v1687_v9 = vld [vmem:[#allocation16 + $0x8] sm:$0xff]  ;;  %v1737_v27 = vld [vmem:[#allocation16 + $0x198] sm:$0xff] }
 0x373   :  { %1985 = vmatprep.subr.mxu0 %v1709_v30  ;;  %vm1541_vm3 = vcmp.ge.f32.partialorder %v1533_v0, 0.0  ;;  %v1549_v5 = vmul.f32 0.2, %v1533_v0  ;;  %1876 = vmatmul.mubr.f32.gmra.mxu0 %v5097_v45  ;;  %v5101_v8 = vsel %vm1540_vm2, %v1532_v58, %v1548_v14  ;;  %v1769_v49 = vmul.f32 %v1763_v37, %v4890_v42  ;;  %v1729_v37 = vld [vmem:[#allocation16 + $0x158] sm:$0xff] }
 0x374   :  { %1986 = vmatpush1.msra.mxu0 %v1708_v61  ;;  %v1757_v17 = vrot.slane %v5101_v8, 7  ;;  %v1762_v40 = vsel %vm599_vm0, %v1754_v7, %v1756_v22  ;;  %v1761_v58 = vsel %vm599_vm0, %v1753_v48, %v1755_v34  ;;  %v1688_v7 = vld [vmem:[#allocation16 + $0x10] sm:$0xff] }
 0x375   :  { %v5110_v13 = vsel %vm1541_vm3, %v1533_v0, %v1549_v5  ;;  %1987 = vmatprep.subr.mxu0 %v1707_v53  ;;  %v1772_v32 = vmul.f32 %v1762_v40, %v4922_v2  ;;  %v1771_v30 = vmul.f32 %v1761_v58, %v4922_v2  ;;  %v1691_v0 = vld [vmem:[#allocation16 + $0x28] sm:$0xff]  ;;  %v1690_v53 = vld [vmem:[#allocation16 + $0x20] sm:$0xff]  ;;  %v1689_v5 = vld [vmem:[#allocation16 + $0x18] sm:$0xff]  ;;  %v1780_v58 = vrot.slane %v5094_v1, 1 }
 0x376   :  { %v1758_v24 = vrot.slane %v5110_v13, 7  ;;  %1881 = vmatprep.mubr.f32.mxu0 %v5110_v13  ;;  %1988 = vmatpush1.msra.mxu0 %v1706_v3  ;;  %v1765_v18 = vsel %vm599_vm0, %v1757_v17, %v1751_v11  ;;  %v1759_v14 = vsel %vm599_vm0, %v1755_v34, %v1757_v17  ;;  %v1686_v11 = vld [vmem:[#allocation16] sm:$0xff]  ;;  %v1747_v17 = vld [vmem:[#allocation16 + $0x1e8] sm:$0xff]  ;;  %v1744_v48 = vld [vmem:[#allocation16 + $0x1d0] sm:$0xff] }
 0x377   :  { %1989 = vmatprep.subr.mxu0 %v1705_v44  ;;  %1882 = vmatmul.mubr.f32.gmra.mxu0 %v5101_v8  ;;  %v1767_v16 = vmul.f32 %v1765_v18, %v4882_v20  ;;  %v1773_v3 = vmul.f32 %v1759_v14, %v4944_v15  ;;  %v1749_v44 = vld [vmem:[#allocation16 + $0x1f8] sm:$0xff]  ;;  %v1743_v18 = vld [vmem:[#allocation16 + $0x1c8] sm:$0xff]  ;;  %v1732_v34 = vld [vmem:[#allocation16 + $0x170] sm:$0xff] }
 0x378   :  { %v1766_v26 = vsel %vm599_vm0, %v1758_v24, %v1752_v12  ;;  %1990 = vmatpush1.msra.mxu0 %v1704_v63  ;;  %2041 = vmatprep.mubr.f32.mxu0 %v1792_v38  ;;  %v1760_v60 = vsel %vm599_vm0, %v1756_v22, %v1758_v24  ;;  %v1748_v12 = vld [vmem:[#allocation16 + $0x1f0] sm:$0xff]  ;;  %v1746_v24 = vld [vmem:[#allocation16 + $0x1e0] sm:$0xff]  ;;  %v1745_v63 = vld [vmem:[#allocation16 + $0x1d8] sm:$0xff] }
 0x379   :  { %v1768_v31 = vmul.f32 %v1766_v26, %v4882_v20  ;;  %1991 = vmatprep.subr.mxu0 %v1703_v21  ;;  %v1774_v61 = vmul.f32 %v1760_v60, %v4944_v15  ;;  %v1742_v21 = vld [vmem:[#allocation16 + $0x1c0] sm:$0xff]  ;;  %v1741_v38 = vld [vmem:[#allocation16 + $0x1b8] sm:$0xff]  ;;  %v1740_v22 = vld [vmem:[#allocation16 + $0x1b0] sm:$0xff]  ;;  %v1775_v60 = vrot.slane %v5080_v29, 1  ;;  %v1786_v29 = vsel %vm644_vm1, %v1778_v62, %v1780_v58 }
 0x37a   :  { %1992 = vmatpush1.msra.mxu0 %v1702_v25  ;;  %v1739_v25 = vld [vmem:[#allocation16 + $0x1a8] sm:$0xff]  ;;  %v1738_v26 = vld [vmem:[#allocation16 + $0x1a0] sm:$0xff] }
 0x37b   :  { %1952 = vmatprep.mubr.f32.mxu1 %v1768_v31  ;;  %1993 = vmatprep.subr.mxu0 %v1701_v51  ;;  %v1736_v51 = vld [vmem:[#allocation16 + $0x190] sm:$0xff]  ;;  %v1735_v31 = vld [vmem:[#allocation16 + $0x188] sm:$0xff]  ;;  %v1718_v14 = vld [vmem:[#allocation16 + $0x100] sm:$0xff] }
 0x37c   :  { %1953 = vmatmul.mubr.f32.vlgmr.msra.gmra.mxu1 %v1767_v16  ;;  %1994 = vmatpush1.msra.mxu0 %v1700_v33  ;;  %v1734_v16 = vld [vmem:[#allocation16 + $0x180] sm:$0xff]  ;;  %v1733_v33 = vld [vmem:[#allocation16 + $0x178] sm:$0xff]  ;;  %v1727_v40 = vld [vmem:[#allocation16 + $0x148] sm:$0xff] }
 0x37d   :  { %1958 = vmatprep.mubr.f32.mxu1 %v1770_v36  ;;  %1995 = vmatprep.subr.mxu0 %v1699_v35  ;;  %v1731_v35 = vld [vmem:[#allocation16 + $0x168] sm:$0xff]  ;;  %v1730_v36 = vld [vmem:[#allocation16 + $0x160] sm:$0xff] }
 0x37e   :  { %1996 = vmatpush1.msra.mxu0 %v1698_v39  ;;  %v1728_v39 = vld [vmem:[#allocation16 + $0x150] sm:$0xff] }
 0x37f   :  { %1997 = vmatprep.subr.mxu0 %v1697_v41  ;;  %v1726_v41 = vld [vmem:[#allocation16 + $0x140] sm:$0xff] }
 0x380   :  { %1959 = vmatmul.mubr.f32.gmra.mxu1 %v1769_v49  ;;  %1998 = vmatpush1.msra.mxu0 %v1696_v43  ;;  %v1725_v43 = vld [vmem:[#allocation16 + $0x138] sm:$0xff]  ;;  %v1724_v49 = vld [vmem:[#allocation16 + $0x130] sm:$0xff] }
 0x381   :  { %1964 = vmatprep.mubr.f32.mxu1 %v1772_v32  ;;  %1999 = vmatprep.subr.mxu0 %v1695_v50  ;;  %v1777_v50 = vrot.slane %v5088_v56, 1  ;;  %v1723_v32 = vld [vmem:[#allocation16 + $0x128] sm:$0xff]  ;;  %v1782_v56 = vrot.slane %v5110_v13, 1 }
 0x382   :  { %2000 = vmatpush1.msra.mxu0 %v1694_v59  ;;  %v1722_v59 = vld [vmem:[#allocation16 + $0x120] sm:$0xff] }
 0x383   :  { %2001 = vmatprep.subr.mxu0 %v1693_v28  ;;  %v1721_v28 = vld [vmem:[#allocation16 + $0x118] sm:$0xff]  ;;  %v1784_v13 = vsel %vm644_vm1, %v1780_v58, %v1782_v56  ;;  %v2143_v58 = vld [vmem:[#allocation17 + $0xd0] sm:$0xff] }
 0x384   :  { %1965 = vmatmul.mubr.f32.gmra.mxu1 %v1771_v30  ;;  %2002 = vmatpush1.msra.mxu0 %v1692_v54  ;;  %v1720_v54 = vld [vmem:[#allocation16 + $0x110] sm:$0xff]  ;;  %v1787_v30 = vsel %vm644_vm1, %v1775_v60, %v1777_v50  ;;  %v1796_v62 = vmul.f32 %v1784_v13, %v4926_v6  ;;  %v2181_v13 = vld [vmem:[#allocation19] sm:$0xff] }
 0x385   :  { %1970 = vmatprep.mubr.f32.mxu1 %v1774_v61  ;;  %2003 = vmatprep.subr.mxu0 %v1691_v0  ;;  %v1779_v0 = vrot.slane %v5097_v45, 1  ;;  %v1719_v61 = vld [vmem:[#allocation16 + $0x108] sm:$0xff]  ;;  %v1791_v1 = vmul.f32 %v1787_v30, %v4905_v55  ;;  %v1794_v45 = vmul.f32 %v1786_v29, %v4910_v57 }
 0x386   :  { %2004 = vmatpush1.msra.mxu0 %v1690_v53  ;;  %v1781_v53 = vrot.slane %v5101_v8, 1  ;;  %v1790_v8 = vsel %vm644_vm1, %v1782_v56, %v1776_v4  ;;  %v2208_v4 = vld [vmem:[#allocation19 + $0xd8] sm:$0xff]  ;;  %v2186_v30 = vld [vmem:[#allocation19 + $0x28] sm:$0xff]  ;;  %v2139_v56 = vld [vmem:[#allocation17 + $0xb0] sm:$0xff] }
 0x387   :  { %2005 = vmatprep.subr.mxu0 %v1689_v5  ;;  %v1785_v5 = vsel %vm644_vm1, %v1777_v50, %v1779_v0  ;;  %v2144_v50 = vld [vmem:[#allocation17 + $0xd8] sm:$0xff]  ;;  %v2138_v29 = vld [vmem:[#allocation17 + $0xa8] sm:$0xff] }
 0x388   :  { %1971 = vmatmul.mubr.f32.gmra.mxu1 %v1773_v3  ;;  %2006 = vmatpush1.msra.mxu0 %v1688_v7  ;;  %v1793_v46 = vmul.f32 %v1785_v5, %v4910_v57  ;;  %v1783_v7 = vsel %vm644_vm1, %v1779_v0, %v1781_v53  ;;  %v2140_v0 = vld [vmem:[#allocation17 + $0xb8] sm:$0xff] }
 0x389   :  { %2007 = vmatprep.subr.mxu0 %v1687_v9  ;;  %v1795_v3 = vmul.f32 %v1783_v7, %v4926_v6  ;;  %v1798_v9 = vmul.f32 %v1790_v8, %v4948_v19  ;;  %v2136_v5 = vld [vmem:[#allocation17 + $0x98] sm:$0xff]  ;;  %v2134_v7 = vld [vmem:[#allocation17 + $0x88] sm:$0xff]  ;;  %v2243_v8 = vld [vmem:[#allocation19 + $0x1f0] sm:$0xff] }
 0x38a   :  { %2008 = vmatpush1.msra.mxu0 %v1686_v11  ;;  %v1789_v11 = vsel %vm644_vm1, %v1781_v53, %v1775_v60  ;;  %v2142_v60 = vld [vmem:[#allocation17 + $0xc8] sm:$0xff]  ;;  %v2137_v53 = vld [vmem:[#allocation17 + $0xa0] sm:$0xff] }
 0x38b   :  { %2009 = vmatprep.subr.mxu0 %v1749_v44  ;;  %v2212_v44 = vld [vmem:[#allocation19 + $0xf8] sm:$0xff] }
 0x38c   :  { %2010 = vmatpush2.msra.mxu0 %v1748_v12  ;;  %2358 = vmatprep.subr.mxu1 %v2212_v44  ;;  %v1797_v12 = vmul.f32 %v1789_v11, %v4948_v19  ;;  %v2132_v11 = vld [vmem:[#allocation17 + $0x78] sm:$0xff]  ;;  %v2241_v44 = vld [vmem:[#allocation19 + $0x1e0] sm:$0xff] }
 0x38d   :  { %2011 = vmatprep.subr.mxu0 %v1747_v17  ;;  %v2211_v17 = vld [vmem:[#allocation19 + $0xf0] sm:$0xff] }
 0x38e   :  { %2012 = vmatpush2.msra.mxu0 %v1746_v24  ;;  %v2210_v24 = vld [vmem:[#allocation19 + $0xe8] sm:$0xff]  ;;  %2359 = vmatpush1.msra.mxu1 %v2211_v17  ;;  %v2240_v17 = vld [vmem:[#allocation19 + $0x1d8] sm:$0xff] }
 0x38f   :  { %2013 = vmatprep.subr.mxu0 %v1745_v63  ;;  %2360 = vmatprep.subr.mxu1 %v2210_v24  ;;  %v2207_v63 = vld [vmem:[#allocation19 + $0xd0] sm:$0xff]  ;;  %v2130_v24 = vld [vmem:[#allocation17 + $0x68] sm:$0xff] }
 0x390   :  { %2014 = vmatpush2.msra.mxu0 %v1744_v48  ;;  %2361 = vmatpush1.msra.mxu1 %v2209_v23  ;;  %v2206_v48 = vld [vmem:[#allocation19 + $0xc8] sm:$0xff]  ;;  %v2239_v23 = vld [vmem:[#allocation19 + $0x1d0] sm:$0xff] }
 0x391   :  { %2015 = vmatprep.subr.mxu0 %v1743_v18  ;;  %2362 = vmatprep.subr.mxu1 %v2208_v4  ;;  %v2205_v18 = vld [vmem:[#allocation19 + $0xc0] sm:$0xff] }
 0x392   :  { %2016 = vmatpush2.msra.mxu0 %v1742_v21  ;;  %2363 = vmatpush1.msra.mxu1 %v2207_v63  ;;  %v2204_v21 = vld [vmem:[#allocation19 + $0xb8] sm:$0xff]  ;;  %v2129_v4 = vld [vmem:[#allocation17 + $0x60] sm:$0xff]  ;;  %v2238_v63 = vld [vmem:[#allocation19 + $0x1c8] sm:$0xff] }
 0x393   :  { %2017 = vmatprep.subr.mxu0 %v1741_v38  ;;  %2364 = vmatprep.subr.mxu1 %v2206_v48  ;;  %v2203_v38 = vld [vmem:[#allocation19 + $0xb0] sm:$0xff]  ;;  %v2128_v48 = vld [vmem:[#allocation17 + $0x58] sm:$0xff] }
 0x394   :  { %2018 = vmatpush2.msra.mxu0 %v1740_v22  ;;  %2365 = vmatpush1.msra.mxu1 %v2205_v18  ;;  %v2202_v22 = vld [vmem:[#allocation19 + $0xa8] sm:$0xff]  ;;  %v2237_v18 = vld [vmem:[#allocation19 + $0x1c0] sm:$0xff] }
 0x395   :  { %2019 = vmatprep.subr.mxu0 %v1739_v25  ;;  %2366 = vmatprep.subr.mxu1 %v2204_v21  ;;  %v2201_v25 = vld [vmem:[#allocation19 + $0xa0] sm:$0xff]  ;;  %v2127_v21 = vld [vmem:[#allocation17 + $0x50] sm:$0xff] }
 0x396   :  { %2020 = vmatpush2.msra.mxu0 %v1738_v26  ;;  %2367 = vmatpush1.msra.mxu1 %v2203_v38  ;;  %v2200_v26 = vld [vmem:[#allocation19 + $0x98] sm:$0xff] }
 0x397   :  { %2021 = vmatprep.subr.mxu0 %v1737_v27  ;;  %2368 = vmatprep.subr.mxu1 %v2202_v22  ;;  %v2199_v27 = vld [vmem:[#allocation19 + $0x90] sm:$0xff]  ;;  %v2236_v38 = vld [vmem:[#allocation19 + $0x1b8] sm:$0xff]  ;;  %v2126_v22 = vld [vmem:[#allocation17 + $0x48] sm:$0xff] }
 0x398   :  { %2022 = vmatpush2.msra.mxu0 %v1736_v51  ;;  %2369 = vmatpush1.msra.mxu1 %v2201_v25  ;;  %v2198_v51 = vld [vmem:[#allocation19 + $0x88] sm:$0xff]  ;;  %v2235_v25 = vld [vmem:[#allocation19 + $0x1b0] sm:$0xff] }
 0x399   :  { %2023 = vmatprep.subr.mxu0 %v1735_v31  ;;  %2370 = vmatprep.subr.mxu1 %v2200_v26  ;;  %v2197_v31 = vld [vmem:[#allocation19 + $0x80] sm:$0xff] }
 0x39a   :  { %2024 = vmatpush2.msra.mxu0 %v1734_v16  ;;  %2371 = vmatpush1.msra.mxu1 %v2199_v27  ;;  %v2196_v16 = vld [vmem:[#allocation19 + $0x78] sm:$0xff]  ;;  %v2125_v26 = vld [vmem:[#allocation17 + $0x40] sm:$0xff]  ;;  %v2234_v27 = vld [vmem:[#allocation19 + $0x1a8] sm:$0xff] }
 0x39b   :  { %2025 = vmatprep.subr.mxu0 %v1733_v33  ;;  %2372 = vmatprep.subr.mxu1 %v2198_v51  ;;  %v2195_v33 = vld [vmem:[#allocation19 + $0x70] sm:$0xff]  ;;  %v2124_v51 = vld [vmem:[#allocation17 + $0x38] sm:$0xff] }
 0x39c   :  { %2026 = vmatpush2.msra.mxu0 %v1732_v34  ;;  %2373 = vmatpush1.msra.mxu1 %v2197_v31  ;;  %v2194_v34 = vld [vmem:[#allocation19 + $0x68] sm:$0xff]  ;;  %v2233_v31 = vld [vmem:[#allocation19 + $0x1a0] sm:$0xff] }
 0x39d   :  { %2027 = vmatprep.subr.mxu0 %v1731_v35  ;;  %2374 = vmatprep.subr.mxu1 %v2196_v16  ;;  %v2148_v35 = vld [vmem:[#allocation17 + $0xf8] sm:$0xff]  ;;  %v2123_v16 = vld [vmem:[#allocation17 + $0x30] sm:$0xff] }
 0x39e   :  { %2028 = vmatpush2.msra.mxu0 %v1730_v36  ;;  %2375 = vmatpush1.msra.mxu1 %v2195_v33  ;;  %v2193_v36 = vld [vmem:[#allocation19 + $0x60] sm:$0xff]  ;;  %v2232_v33 = vld [vmem:[#allocation19 + $0x198] sm:$0xff] }
 0x39f   :  { %2029 = vmatprep.subr.mxu0 %v1729_v37  ;;  %2376 = vmatprep.subr.mxu1 %v2194_v34  ;;  %v2147_v37 = vld [vmem:[#allocation17 + $0xf0] sm:$0xff]  ;;  %v2122_v34 = vld [vmem:[#allocation17 + $0x28] sm:$0xff] }
 0x3a0   :  { %2030 = vmatpush2.msra.mxu0 %v1728_v39  ;;  %2377 = vmatpush1.msra.mxu1 %v2193_v36  ;;  %v2192_v39 = vld [vmem:[#allocation19 + $0x58] sm:$0xff]  ;;  %v2121_v36 = vld [vmem:[#allocation17 + $0x20] sm:$0xff] }
 0x3a1   :  { %2031 = vmatprep.subr.mxu0 %v1727_v40  ;;  %v2146_v40 = vld [vmem:[#allocation17 + $0xe8] sm:$0xff]  ;;  %2378 = vmatprep.subr.mxu1 %v2192_v39  ;;  %v2120_v39 = vld [vmem:[#allocation17 + $0x18] sm:$0xff] }
 0x3a2   :  { %2032 = vmatpush2.msra.mxu0 %v1726_v41  ;;  %v2191_v41 = vld [vmem:[#allocation19 + $0x50] sm:$0xff] }
 0x3a3   :  { %2033 = vmatprep.subr.mxu0 %v1725_v43  ;;  %v2145_v43 = vld [vmem:[#allocation17 + $0xe0] sm:$0xff]  ;;  %2379 = vmatpush1.msra.mxu1 %v2191_v41  ;;  %v2119_v41 = vld [vmem:[#allocation17 + $0x10] sm:$0xff] }
 0x3a4   :  { %2034 = vmatpush2.msra.mxu0 %v1724_v49  ;;  %v2190_v49 = vld [vmem:[#allocation19 + $0x48] sm:$0xff] }
 0x3a5   :  { %2035 = vmatprep.subr.mxu0 %v1723_v32  ;;  %v2189_v32 = vld [vmem:[#allocation19 + $0x40] sm:$0xff]  ;;  %2380 = vmatprep.subr.mxu1 %v2190_v49  ;;  %v2118_v49 = vld [vmem:[#allocation17 + $0x8] sm:$0xff] }
 0x3a6   :  { %2036 = vmatpush2.msra.mxu0 %v1722_v59  ;;  %v2188_v59 = vld [vmem:[#allocation19 + $0x38] sm:$0xff]  ;;  %2381 = vmatpush1.msra.mxu1 %v2189_v32  ;;  %v2117_v32 = vld [vmem:[#allocation17] sm:$0xff] }
 0x3a7   :  { %2037 = vmatprep.subr.mxu0 %v1721_v28  ;;  %v2187_v28 = vld [vmem:[#allocation19 + $0x30] sm:$0xff]  ;;  %2382 = vmatprep.subr.mxu1 %v2188_v59  ;;  %v2180_v59 = vld [vmem:[#allocation17 + $0x1f8] sm:$0xff] }
 0x3a8   :  { %2038 = vmatpush2.msra.mxu0 %v1720_v54  ;;  %v2141_v54 = vld [vmem:[#allocation17 + $0xc0] sm:$0xff]  ;;  %2383 = vmatpush1.msra.mxu1 %v2187_v28  ;;  %v2179_v28 = vld [vmem:[#allocation17 + $0x1f0] sm:$0xff] }
 0x3a9   :  { %2039 = vmatprep.subr.mxu0 %v1719_v61  ;;  %v2185_v61 = vld [vmem:[#allocation19 + $0x20] sm:$0xff]  ;;  %2384 = vmatprep.subr.mxu1 %v2186_v30  ;;  %v2178_v30 = vld [vmem:[#allocation17 + $0x1e8] sm:$0xff] }
 0x3aa   :  { %2040 = vmatpush2.msra.mxu0 %v1718_v14  ;;  %v2184_v14 = vld [vmem:[#allocation19 + $0x18] sm:$0xff]  ;;  %2385 = vmatpush1.msra.mxu1 %v2185_v61  ;;  %v2177_v61 = vld [vmem:[#allocation17 + $0x1e0] sm:$0xff] }
 0x3ab   :  { %2042 = vmatmul.mubr.f32.vlgmr.msra.gmra.mxu0 %v1791_v1  ;;  %2447 = vmatprep.subr.mxu0 %v2148_v35  ;;  %v2183_v1 = vld [vmem:[#allocation19 + $0x10] sm:$0xff] }
 0x3ac   :  { %2047 = vmatprep.mubr.f32.mxu0 %v1794_v45  ;;  %2448 = vmatpush1.msra.mxu0 %v2147_v37  ;;  %v2182_v45 = vld [vmem:[#allocation19 + $0x8] sm:$0xff]  ;;  %v2231_v35 = vld [vmem:[#allocation19 + $0x190] sm:$0xff] }
 0x3ad   :  { %2449 = vmatprep.subr.mxu0 %v2146_v40  ;;  %2386 = vmatprep.subr.mxu1 %v2184_v14  ;;  %v2230_v37 = vld [vmem:[#allocation19 + $0x188] sm:$0xff]  ;;  %v2229_v40 = vld [vmem:[#allocation19 + $0x180] sm:$0xff]  ;;  %v2176_v14 = vld [vmem:[#allocation17 + $0x1d8] sm:$0xff] }
 0x3ae   :  { %2450 = vmatpush1.msra.mxu0 %v2145_v43  ;;  %2387 = vmatpush1.msra.mxu1 %v2183_v1  ;;  %v2228_v43 = vld [vmem:[#allocation19 + $0x178] sm:$0xff]  ;;  %v2175_v1 = vld [vmem:[#allocation17 + $0x1d0] sm:$0xff] }
 0x3af   :  { %2048 = vmatmul.mubr.f32.gmra.mxu0 %v1793_v46  ;;  %2451 = vmatprep.subr.mxu0 %v2144_v50  ;;  %v2135_v46 = vld [vmem:[#allocation17 + $0x90] sm:$0xff] }
 0x3b0   :  { %2053 = vmatprep.mubr.f32.mxu0 %v1796_v62  ;;  %2452 = vmatpush1.msra.mxu0 %v2143_v58  ;;  %v2244_v62 = vld [vmem:[#allocation19 + $0x1f8] sm:$0xff]  ;;  %v2227_v50 = vld [vmem:[#allocation19 + $0x170] sm:$0xff]  ;;  %v2226_v58 = vld [vmem:[#allocation19 + $0x168] sm:$0xff] }
 0x3b1   :  { %2453 = vmatprep.subr.mxu0 %v2142_v60  ;;  %2388 = vmatprep.subr.mxu1 %v2182_v45  ;;  %v2225_v60 = vld [vmem:[#allocation19 + $0x160] sm:$0xff]  ;;  %v2174_v45 = vld [vmem:[#allocation17 + $0x1c8] sm:$0xff] }
 0x3b2   :  { %2454 = vmatpush1.msra.mxu0 %v2141_v54  ;;  %2389 = vmatpush1.msra.mxu1 %v2181_v13  ;;  %v2224_v54 = vld [vmem:[#allocation19 + $0x158] sm:$0xff]  ;;  %v2173_v13 = vld [vmem:[#allocation17 + $0x1c0] sm:$0xff] }
 0x3b3   :  { %2054 = vmatmul.mubr.f32.gmra.mxu0 %v1795_v3  ;;  %2455 = vmatprep.subr.mxu0 %v2140_v0  ;;  %v2133_v3 = vld [vmem:[#allocation17 + $0x80] sm:$0xff]  ;;  %v2223_v0 = vld [vmem:[#allocation19 + $0x150] sm:$0xff] }
 0x3b4   :  { %2059 = vmatprep.mubr.f32.mxu0 %v1798_v9  ;;  %2456 = vmatpush1.msra.mxu0 %v2139_v56  ;;  %v2242_v9 = vld [vmem:[#allocation19 + $0x1e8] sm:$0xff] }
 0x3b5   :  { %2457 = vmatprep.subr.mxu0 %v2138_v29  ;;  %2390 = vmatprep.subr.mxu1 %v2244_v62  ;;  %v2222_v56 = vld [vmem:[#allocation19 + $0x148] sm:$0xff]  ;;  %v2221_v29 = vld [vmem:[#allocation19 + $0x140] sm:$0xff]  ;;  %v2172_v62 = vld [vmem:[#allocation17 + $0x1b8] sm:$0xff] }
 0x3b6   :  { %2458 = vmatpush1.msra.mxu0 %v2137_v53  ;;  %2391 = vmatpush2.msra.mxu1 %v2243_v8  ;;  %v2220_v53 = vld [vmem:[#allocation19 + $0x138] sm:$0xff]  ;;  %v2171_v8 = vld [vmem:[#allocation17 + $0x1b0] sm:$0xff] }
 0x3b7   :  { %2060 = vmatmul.mubr.f32.gmra.mxu0 %v1797_v12  ;;  %2459 = vmatprep.subr.mxu0 %v2136_v5  ;;  %v2131_v12 = vld [vmem:[#allocation17 + $0x70] sm:$0xff] }
 0x3b8   :  { %2460 = vmatpush1.msra.mxu0 %v2135_v46  ;;  %2392 = vmatprep.subr.mxu1 %v2242_v9  ;;  %v2219_v5 = vld [vmem:[#allocation19 + $0x130] sm:$0xff]  ;;  %v2218_v46 = vld [vmem:[#allocation19 + $0x128] sm:$0xff] }
 0x3b9   :  { %2461 = vmatprep.subr.mxu0 %v2134_v7  ;;  %2393 = vmatpush2.msra.mxu1 %v2241_v44  ;;  %v2217_v7 = vld [vmem:[#allocation19 + $0x120] sm:$0xff]  ;;  %v2170_v9 = vld [vmem:[#allocation17 + $0x1a8] sm:$0xff] }
 0x3ba   :  { %2462 = vmatpush1.msra.mxu0 %v2133_v3  ;;  %2394 = vmatprep.subr.mxu1 %v2240_v17  ;;  %v2216_v3 = vld [vmem:[#allocation19 + $0x118] sm:$0xff]  ;;  %v2169_v44 = vld [vmem:[#allocation17 + $0x1a0] sm:$0xff] }
 0x3bb   :  { %2463 = vmatprep.subr.mxu0 %v2132_v11  ;;  %2395 = vmatpush2.msra.mxu1 %v2239_v23  ;;  %v2215_v11 = vld [vmem:[#allocation19 + $0x110] sm:$0xff]  ;;  %v2168_v17 = vld [vmem:[#allocation17 + $0x198] sm:$0xff] }
 0x3bc   :  { %2464 = vmatpush1.msra.mxu0 %v2131_v12  ;;  %2396 = vmatprep.subr.mxu1 %v2238_v63  ;;  %v2214_v12 = vld [vmem:[#allocation19 + $0x108] sm:$0xff]  ;;  %v2167_v23 = vld [vmem:[#allocation17 + $0x190] sm:$0xff]  ;;  %v2276_v63 = vld [vmem:[#allocation20 + $0xf8] sm:$0xff] }
 0x3bd   :  { %2465 = vmatprep.subr.mxu0 %v2130_v24  ;;  %2397 = vmatpush2.msra.mxu1 %v2237_v18  ;;  %v2213_v24 = vld [vmem:[#allocation19 + $0x100] sm:$0xff]  ;;  %v2164_v18 = vld [vmem:[#allocation17 + $0x178] sm:$0xff] }
 0x3be   :  { %2466 = vmatpush1.msra.mxu0 %v2129_v4  ;;  %2398 = vmatprep.subr.mxu1 %v2236_v38  ;;  %v2166_v4 = vld [vmem:[#allocation17 + $0x188] sm:$0xff] }
 0x3bf   :  { %2467 = vmatprep.subr.mxu0 %v2128_v48  ;;  %2399 = vmatpush2.msra.mxu1 %v2235_v25  ;;  %v2165_v48 = vld [vmem:[#allocation17 + $0x180] sm:$0xff]  ;;  %v2162_v38 = vld [vmem:[#allocation17 + $0x168] sm:$0xff]  ;;  %v2160_v25 = vld [vmem:[#allocation17 + $0x158] sm:$0xff] }
 0x3c0   :  { %2468 = vmatpush1.msra.mxu0 %v2127_v21  ;;  %2400 = vmatprep.subr.mxu1 %v2234_v27  ;;  %v2163_v21 = vld [vmem:[#allocation17 + $0x170] sm:$0xff]  ;;  %v2158_v27 = vld [vmem:[#allocation17 + $0x148] sm:$0xff] }
 0x3c1   :  { %2469 = vmatprep.subr.mxu0 %v2126_v22  ;;  %2401 = vmatpush2.msra.mxu1 %v2233_v31  ;;  %v2161_v22 = vld [vmem:[#allocation17 + $0x160] sm:$0xff]  ;;  %v2156_v31 = vld [vmem:[#allocation17 + $0x138] sm:$0xff] }
 0x3c2   :  { %2470 = vmatpush1.msra.mxu0 %v2125_v26  ;;  %2402 = vmatprep.subr.mxu1 %v2232_v33  ;;  %v2159_v26 = vld [vmem:[#allocation17 + $0x150] sm:$0xff]  ;;  %v2154_v33 = vld [vmem:[#allocation17 + $0x128] sm:$0xff] }
 0x3c3   :  { %2471 = vmatprep.subr.mxu0 %v2124_v51  ;;  %2403 = vmatpush2.msra.mxu1 %v2231_v35  ;;  %v2157_v51 = vld [vmem:[#allocation17 + $0x140] sm:$0xff]  ;;  %v2152_v35 = vld [vmem:[#allocation17 + $0x118] sm:$0xff] }
 0x3c4   :  { %2472 = vmatpush1.msra.mxu0 %v2123_v16  ;;  %2404 = vmatprep.subr.mxu1 %v2230_v37  ;;  %v2155_v16 = vld [vmem:[#allocation17 + $0x130] sm:$0xff]  ;;  %v2150_v37 = vld [vmem:[#allocation17 + $0x108] sm:$0xff] }
 0x3c5   :  { %2473 = vmatprep.subr.mxu0 %v2122_v34  ;;  %2405 = vmatpush2.msra.mxu1 %v2229_v40  ;;  %v2153_v34 = vld [vmem:[#allocation17 + $0x120] sm:$0xff] }
 0x3c6   :  { %2474 = vmatpush1.msra.mxu0 %v2121_v36  ;;  %2406 = vmatprep.subr.mxu1 %v2228_v43  ;;  %v2151_v36 = vld [vmem:[#allocation17 + $0x110] sm:$0xff] }
 0x3c7   :  { %2475 = vmatprep.subr.mxu0 %v2120_v39  ;;  %2407 = vmatpush2.msra.mxu1 %v2227_v50  ;;  %v2149_v39 = vld [vmem:[#allocation17 + $0x100] sm:$0xff] }
 0x3c8   :  { %2476 = vmatpush1.msra.mxu0 %v2119_v41  ;;  %2408 = vmatprep.subr.mxu1 %v2226_v58 }
 0x3c9   :  { %2477 = vmatprep.subr.mxu0 %v2118_v49  ;;  %2409 = vmatpush2.msra.mxu1 %v2225_v60 }
 0x3ca   :  { %2478 = vmatpush1.msra.mxu0 %v2117_v32  ;;  %2410 = vmatprep.subr.mxu1 %v2224_v54 }
 0x3cb   :  { %2479 = vmatprep.subr.mxu0 %v2180_v59  ;;  %2411 = vmatpush2.msra.mxu1 %v2223_v0 }
 0x3cc   :  { %2480 = vmatpush2.msra.mxu0 %v2179_v28  ;;  %2412 = vmatprep.subr.mxu1 %v2222_v56 }
 0x3cd   :  { %2481 = vmatprep.subr.mxu0 %v2178_v30  ;;  %2413 = vmatpush2.msra.mxu1 %v2221_v29  ;;  %v1750_v30 = vld [vmem:[%s5531_s16] sm:$0x3] }
 0x3ce   :  { %2482 = vmatpush2.msra.mxu0 %v2177_v61  ;;  %2414 = vmatprep.subr.mxu1 %v2220_v53 }
 0x3cf   :  { %2483 = vmatprep.subr.mxu0 %v2176_v14  ;;  %2415 = vmatpush2.msra.mxu1 %v2219_v5  ;;  %v2078_v14 = vrot.slane %v1750_v30, %v4958_v47 }
 0x3d0   :  { %2484 = vmatpush2.msra.mxu0 %v2175_v1  ;;  %2416 = vmatprep.subr.mxu1 %v2218_v46 }
 0x3d1   :  { %2485 = vmatprep.subr.mxu0 %v2174_v45  ;;  %2417 = vmatpush2.msra.mxu1 %v2217_v7  ;;  %v5179_v45 = vrot.slane %v1750_v30, %v4962_v52  ;;  %v2269_v30 = vld [vmem:[#allocation20 + $0xc0] sm:$0xff] }
 0x3d2   :  { %2486 = vmatpush2.msra.mxu0 %v2173_v13  ;;  %2418 = vmatprep.subr.mxu1 %v2216_v3 }
 0x3d3   :  { %2487 = vmatprep.subr.mxu0 %v2172_v62  ;;  %2419 = vmatpush2.msra.mxu1 %v2215_v11 }
 0x3d4   :  { %2488 = vmatpush2.msra.mxu0 %v2171_v8  ;;  %2420 = vmatprep.subr.mxu1 %v2214_v12 }
 0x3d5   :  { %2489 = vmatprep.subr.mxu0 %v2170_v9  ;;  %2421 = vmatpush2.msra.mxu1 %v2213_v24 }
 0x3d6   :  { %2490 = vmatpush2.msra.mxu0 %v2169_v44  ;;  %2536 = vmatprep.subr.mxu1 %v2276_v63 }
 0x3d7   :  { %2491 = vmatprep.subr.mxu0 %v2168_v17 }
 0x3d8   :  { %2492 = vmatpush2.msra.mxu0 %v2167_v23 }
 0x3d9   :  { %2493 = vmatprep.subr.mxu0 %v2166_v4 }
 0x3da   :  { %2494 = vmatpush2.msra.mxu0 %v2165_v48 }
 0x3db   :  { %2495 = vmatprep.subr.mxu0 %v2164_v18 }
 0x3dc   :  { %2496 = vmatpush2.msra.mxu0 %v2163_v21 }
 0x3dd   :  { %2497 = vmatprep.subr.mxu0 %v2162_v38 }
 0x3de   :  { %2498 = vmatpush2.msra.mxu0 %v2161_v22 }
 0x3df   :  { %2499 = vmatprep.subr.mxu0 %v2160_v25  ;;  %v2275_v25 = vld [vmem:[#allocation20 + $0xf0] sm:$0xff] }
 0x3e0   :  { %2500 = vmatpush2.msra.mxu0 %v2159_v26 }
 0x3e1   :  { %2501 = vmatprep.subr.mxu0 %v2158_v27 }
 0x3e2   :  { %2502 = vmatpush2.msra.mxu0 %v2157_v51 }
 0x3e3   :  { %2503 = vmatprep.subr.mxu0 %v2156_v31 }
 0x3e4   :  { %2504 = vmatpush2.msra.mxu0 %v2155_v16  ;;  %v2274_v16 = vld [vmem:[#allocation20 + $0xe8] sm:$0xff] }
 0x3e5   :  { %2505 = vmatprep.subr.mxu0 %v2154_v33 }
 0x3e6   :  { %2506 = vmatpush2.msra.mxu0 %v2153_v34 }
 0x3e7   :  { %2507 = vmatprep.subr.mxu0 %v2152_v35  ;;  %v2273_v35 = vld [vmem:[#allocation20 + $0xe0] sm:$0xff] }
 0x3e8   :  { %2508 = vmatpush2.msra.mxu0 %v2151_v36 }
 0x3e9   :  { %2509 = vmatprep.subr.mxu0 %v2150_v37 }
 0x3ea   :  { %2510 = vmatpush2.msra.mxu0 %v2149_v39  ;;  %v2272_v39 = vld [vmem:[#allocation20 + $0xd8] sm:$0xff] }
 0x42b   :  { %v1865_v40 = vpop.f32.mrf.mxu0 }
 0x42d   :  { %v1867_v41 = vpop.f32.mrf.mxu0 }
 0x42f   :  { %v1871_v43 = vpop.f32.mrf.mxu0 }
 0x431   :  { %v1873_v49 = vpop.f32.mrf.mxu0 }
 0x433   :  { %v1877_v32 = vpop.f32.mrf.mxu0 }
 0x435   :  { %v1879_v59 = vpop.f32.mrf.mxu0 }
 0x437   :  { %v1883_v28 = vpop.f32.mrf.mxu0 }
 0x439   :  { %v1885_v0 = vpop.f32.mrf.mxu0 }
 0x43c   :  { %v1954_v50 = vpop.f32.mrf.mxu1 }
 0x43d   :  { %v1955_v56 = vadd.f32 %v1954_v50, %v1865_v40 }
 0x43e   :  { %v1956_v58 = vpop.f32.mrf.mxu1 }
 0x43f   :  { %v1957_v1 = vadd.f32 %v1956_v58, %v1867_v41 }
 0x440   :  { %v1960_v60 = vpop.f32.mrf.mxu1 }
 0x441   :  { %v1961_v46 = vadd.f32 %v1960_v60, %v1871_v43  ;;  %v2270_v60 = vld [vmem:[#allocation20 + $0xc8] sm:$0xff] }
 0x442   :  { %v1962_v54 = vpop.f32.mrf.mxu1 }
 0x443   :  { %v1963_v3 = vadd.f32 %v1962_v54, %v1873_v49 }
 0x444   :  { %v1966_v61 = vpop.f32.mrf.mxu1 }
 0x445   :  { %v1967_v44 = vadd.f32 %v1966_v61, %v1877_v32  ;;  %v2271_v32 = vld [vmem:[#allocation20 + $0xd0] sm:$0xff] }
 0x446   :  { %v1968_v5 = vpop.f32.mrf.mxu1 }
 0x447   :  { %v1969_v18 = vadd.f32 %v1968_v5, %v1879_v59  ;;  %v2267_v5 = vld [vmem:[#allocation20 + $0xb0] sm:$0xff] }
 0x448   :  { %v1972_v12 = vpop.f32.mrf.mxu1 }
 0x449   :  { %v1973_v26 = vadd.f32 %v1972_v12, %v1883_v28  ;;  %v2264_v12 = vld [vmem:[#allocation20 + $0x98] sm:$0xff] }
 0x44a   :  { %v1974_v27 = vpop.f32.mrf.mxu1 }
 0x44b   :  { %v1975_v41 = vadd.f32 %v1974_v27, %v1885_v0 }
 0x46b   :  { %v2043_v29 = vpop.f32.mrf.mxu0 }
 0x46c   :  { %v2066_v53 = vadd.f32 %v2043_v29, %v1955_v56  ;;  %v2268_v29 = vld [vmem:[#allocation20 + $0xb8] sm:$0xff] }
 0x46d   :  { %v2045_v13 = vpop.f32.mrf.mxu0 }
 0x46e   :  { %v2085_v62 = vadd.f32 %v2078_v14, %v2066_v53  ;;  %v2067_v7 = vadd.f32 %v2045_v13, %v1957_v1 }
 0x46f   :  { %v2049_v8 = vpop.f32.mrf.mxu0 }
 0x470   :  { %v2086_v9 = vadd.f32 %v5179_v45, %v2067_v7  ;;  %v2068_v11 = vadd.f32 %v2049_v8, %v1961_v46  ;;  %vm2093_vm4 = vcmp.ge.f32.partialorder %v2085_v62, 0.0  ;;  %v2101_v17 = vmul.f32 0.2, %v2085_v62 }
 0x471   :  { %v2051_v24 = vpop.f32.mrf.mxu0 }
 0x472   :  { %v2087_v23 = vadd.f32 %v2078_v14, %v2068_v11  ;;  %v2069_v4 = vadd.f32 %v2051_v24, %v1963_v3  ;;  %vm2094_vm5 = vcmp.ge.f32.partialorder %v2086_v9, 0.0  ;;  %v2102_v63 = vmul.f32 0.2, %v2086_v9 }
 0x473   :  { %v2055_v48 = vpop.f32.mrf.mxu0  ;;  %v5187_v31 = vsel %vm2093_vm4, %v2085_v62, %v2101_v17  ;;  %v2266_v62 = vld [vmem:[#allocation20 + $0xa8] sm:$0xff] }
 0x474   :  { %v2088_v21 = vadd.f32 %v5179_v45, %v2069_v4  ;;  %v2070_v38 = vadd.f32 %v2055_v48, %v1967_v44  ;;  %v5183_v22 = vsel %vm2094_vm5, %v2086_v9, %v2102_v63  ;;  %vm2095_vm6 = vcmp.ge.f32.partialorder %v2087_v23, 0.0  ;;  %v2263_v4 = vld [vmem:[#allocation20 + $0x90] sm:$0xff] }
 0x475   :  { %v2057_v51 = vpop.f32.mrf.mxu0  ;;  %2422 = vmatprep.mubr.f32.mxu1 %v5183_v22  ;;  %v2103_v40 = vmul.f32 0.2, %v2087_v23  ;;  %v2335_v53 = vrot.slane %v5183_v22, 1  ;;  %v2310_v11 = vrot.slane %v5187_v31, 7  ;;  %v2311_v24 = vrot.slane %v5183_v22, 7  ;;  %v2768_v22 = vld [vmem:[#allocation23 + $0xe0] sm:$0xff] }
 0x476   :  { %v2089_v33 = vadd.f32 %v2078_v14, %v2070_v38  ;;  %v2071_v34 = vadd.f32 %v2057_v51, %v1969_v18  ;;  %2423 = vmatmul.mubr.f32.vlgmr.msra.gmra.mxu1 %v5187_v31  ;;  %vm2096_vm7 = vcmp.ge.f32.partialorder %v2088_v21, 0.0  ;;  %v2104_v36 = vmul.f32 0.2, %v2088_v21  ;;  %v2262_v18 = vld [vmem:[#allocation20 + $0x88] sm:$0xff]  ;;  %v2260_v51 = vld [vmem:[#allocation20 + $0x78] sm:$0xff] }
 0x477   :  { %2537 = vmatpush1.msra.mxu1 %v2275_v25  ;;  %v2061_v37 = vpop.f32.mrf.mxu0  ;;  %v5195_v59 = vsel %vm2095_vm6, %v2087_v23, %v2103_v40  ;;  %v2261_v25 = vld [vmem:[#allocation20 + $0x80] sm:$0xff] }
 0x478   :  { %v2090_v43 = vadd.f32 %v5179_v45, %v2071_v34  ;;  %v2072_v49 = vadd.f32 %v2061_v37, %v1973_v26  ;;  %2538 = vmatprep.subr.mxu1 %v2274_v16  ;;  %v5191_v50 = vsel %vm2096_vm7, %v2088_v21, %v2104_v36  ;;  %v2105_v0 = vmul.f32 0.2, %v2089_v33  ;;  %v2259_v34 = vld [vmem:[#allocation20 + $0x70] sm:$0xff]  ;;  %v2258_v36 = vld [vmem:[#allocation20 + $0x68] sm:$0xff]  ;;  %v2257_v40 = vld [vmem:[#allocation20 + $0x60] sm:$0xff] }
 0x479   :  { %2539 = vmatpush1.msra.mxu1 %v2273_v35  ;;  %v2063_v58 = vpop.f32.mrf.mxu0  ;;  %2428 = vmatprep.mubr.f32.mxu1 %v5191_v50  ;;  %v2337_v61 = vrot.slane %v5191_v50, 1  ;;  %vm2097_vm9 = vcmp.ge.f32.partialorder %v2089_v33, 0.0  ;;  %v2313_v8 = vrot.slane %v5191_v50, 7  ;;  %v2312_v63 = vrot.slane %v5195_v59, 7 }
 0x47a   :  { %v2091_v28 = vadd.f32 %v2078_v14, %v2072_v49  ;;  %v2073_v54 = vadd.f32 %v2063_v58, %v1975_v41  ;;  %2540 = vmatprep.subr.mxu1 %v2272_v39  ;;  %2429 = vmatmul.mubr.f32.gmra.mxu1 %v5195_v59  ;;  %vm2098_vm8 = vcmp.ge.f32.partialorder %v2090_v43, 0.0  ;;  %v2106_v56 = vmul.f32 0.2, %v2090_v43  ;;  %v2255_v49 = vld [vmem:[#allocation20 + $0x50] sm:$0xff]  ;;  %v2254_v58 = vld [vmem:[#allocation20 + $0x48] sm:$0xff] }
 0x47b   :  { %2541 = vmatpush1.msra.mxu1 %v2271_v32  ;;  %v5204_v46 = vsel %vm2097_vm9, %v2089_v33, %v2105_v0  ;;  %v2347_v9 = vsel %vm644_vm1, %v2335_v53, %v2337_v61  ;;  %v2323_v27 = vsel %vm599_vm0, %v2311_v24, %v2313_v8  ;;  %v2322_v39 = vsel %vm599_vm0, %v2310_v11, %v2312_v63  ;;  %v2252_v0 = vld [vmem:[#allocation20 + $0x38] sm:$0xff] }
 0x47c   :  { %v2092_v1 = vadd.f32 %v5179_v45, %v2073_v54  ;;  %2542 = vmatprep.subr.mxu1 %v2270_v60  ;;  %v5201_v14 = vsel %vm2098_vm8, %v2090_v43, %v2106_v56  ;;  %vm2099_vm10 = vcmp.ge.f32.partialorder %v2091_v28, 0.0  ;;  %v2107_v13 = vmul.f32 0.2, %v2091_v28  ;;  %v2265_v45 = vld [vmem:[#allocation20 + $0xa0] sm:$0xff]  ;;  %v2256_v43 = vld [vmem:[#allocation20 + $0x58] sm:$0xff]  ;;  %v2251_v56 = vld [vmem:[#allocation20 + $0x30] sm:$0xff] }
 0x47d   :  { %2543 = vmatpush1.msra.mxu1 %v2269_v30  ;;  %2434 = vmatprep.mubr.f32.mxu1 %v5201_v14  ;;  %v2351_v21 = vmul.f32 %v2347_v9, %v4905_v55  ;;  %v2315_v38 = vrot.slane %v5201_v14, 7  ;;  %v2314_v35 = vrot.slane %v5204_v46, 7  ;;  %v2329_v37 = vmul.f32 %v2323_v27, %v4890_v42  ;;  %v2253_v54 = vld [vmem:[#allocation20 + $0x40] sm:$0xff]  ;;  %v2246_v9 = vld [vmem:[#allocation20 + $0x8] sm:$0xff]  ;;  %v2296_v27 = vld [vmem:[#allocation20 + $0x198] sm:$0xff] }
 0x47e   :  { %2544 = vmatprep.subr.mxu1 %v2268_v29  ;;  %vm2100_vm11 = vcmp.ge.f32.partialorder %v2092_v1, 0.0  ;;  %v2108_v7 = vmul.f32 0.2, %v2092_v1  ;;  %2435 = vmatmul.mubr.f32.gmra.mxu1 %v5204_v46  ;;  %v5208_v3 = vsel %vm2099_vm10, %v2091_v28, %v2107_v13  ;;  %v2328_v32 = vmul.f32 %v2322_v39, %v4890_v42  ;;  %v2288_v39 = vld [vmem:[#allocation20 + $0x158] sm:$0xff] }
 0x47f   :  { %2545 = vmatpush1.msra.mxu1 %v2267_v5  ;;  %v2316_v17 = vrot.slane %v5208_v3, 7  ;;  %v2321_v41 = vsel %vm599_vm0, %v2313_v8, %v2315_v38  ;;  %v2320_v28 = vsel %vm599_vm0, %v2312_v63, %v2314_v35  ;;  %v2247_v8 = vld [vmem:[#allocation20 + $0x10] sm:$0xff] }
 0x480   :  { %v5217_v44 = vsel %vm2100_vm11, %v2092_v1, %v2108_v7  ;;  %2546 = vmatprep.subr.mxu1 %v2266_v62  ;;  %v2331_v60 = vmul.f32 %v2321_v41, %v4922_v2  ;;  %v2330_v29 = vmul.f32 %v2320_v28, %v4922_v2  ;;  %v2250_v1 = vld [vmem:[#allocation20 + $0x28] sm:$0xff]  ;;  %v2249_v62 = vld [vmem:[#allocation20 + $0x20] sm:$0xff]  ;;  %v2248_v7 = vld [vmem:[#allocation20 + $0x18] sm:$0xff]  ;;  %v2339_v28 = vrot.slane %v5201_v14, 1 }
 0x481   :  { %v2317_v23 = vrot.slane %v5217_v44, 7  ;;  %2440 = vmatprep.mubr.f32.mxu1 %v5217_v44  ;;  %2547 = vmatpush1.msra.mxu1 %v2265_v45  ;;  %v2324_v48 = vsel %vm599_vm0, %v2316_v17, %v2310_v11  ;;  %v2318_v13 = vsel %vm599_vm0, %v2314_v35, %v2316_v17  ;;  %v2245_v11 = vld [vmem:[#allocation20] sm:$0xff]  ;;  %v2306_v17 = vld [vmem:[#allocation20 + $0x1e8] sm:$0xff]  ;;  %v2303_v63 = vld [vmem:[#allocation20 + $0x1d0] sm:$0xff] }
 0x482   :  { %2548 = vmatprep.subr.mxu1 %v2264_v12  ;;  %2441 = vmatmul.mubr.f32.gmra.mxu1 %v5208_v3  ;;  %v2326_v33 = vmul.f32 %v2324_v48, %v4882_v20  ;;  %v2332_v45 = vmul.f32 %v2318_v13, %v4944_v15  ;;  %v2308_v12 = vld [vmem:[#allocation20 + $0x1f8] sm:$0xff]  ;;  %v2302_v48 = vld [vmem:[#allocation20 + $0x1c8] sm:$0xff]  ;;  %v2291_v35 = vld [vmem:[#allocation20 + $0x170] sm:$0xff] }
 0x483   :  { %v2325_v26 = vsel %vm599_vm0, %v2317_v23, %v2311_v24  ;;  %2549 = vmatpush1.msra.mxu1 %v2263_v4  ;;  %2600 = vmatprep.mubr.f32.mxu1 %v2351_v21  ;;  %v2319_v30 = vsel %vm599_vm0, %v2315_v38, %v2317_v23  ;;  %v2307_v24 = vld [vmem:[#allocation20 + $0x1f0] sm:$0xff]  ;;  %v2305_v23 = vld [vmem:[#allocation20 + $0x1e0] sm:$0xff]  ;;  %v2304_v4 = vld [vmem:[#allocation20 + $0x1d8] sm:$0xff] }
 0x484   :  { %v2327_v16 = vmul.f32 %v2325_v26, %v4882_v20  ;;  %2550 = vmatprep.subr.mxu1 %v2262_v18  ;;  %v2333_v5 = vmul.f32 %v2319_v30, %v4944_v15  ;;  %v2301_v18 = vld [vmem:[#allocation20 + $0x1c0] sm:$0xff]  ;;  %v2300_v21 = vld [vmem:[#allocation20 + $0x1b8] sm:$0xff]  ;;  %v2299_v38 = vld [vmem:[#allocation20 + $0x1b0] sm:$0xff]  ;;  %v2334_v30 = vrot.slane %v5187_v31, 1  ;;  %v2345_v31 = vsel %vm644_vm1, %v2337_v61, %v2339_v28 }
 0x485   :  { %2551 = vmatpush1.msra.mxu1 %v2261_v25  ;;  %v2298_v25 = vld [vmem:[#allocation20 + $0x1a8] sm:$0xff]  ;;  %v2297_v26 = vld [vmem:[#allocation20 + $0x1a0] sm:$0xff] }
 0x486   :  { %2511 = vmatprep.mubr.f32.mxu0 %v2327_v16  ;;  %2552 = vmatprep.subr.mxu1 %v2260_v51  ;;  %v2295_v51 = vld [vmem:[#allocation20 + $0x190] sm:$0xff]  ;;  %v2294_v16 = vld [vmem:[#allocation20 + $0x188] sm:$0xff]  ;;  %v2277_v13 = vld [vmem:[#allocation20 + $0x100] sm:$0xff] }
 0x487   :  { %2512 = vmatmul.mubr.f32.vlgmr.msra.gmra.mxu0 %v2326_v33  ;;  %2553 = vmatpush1.msra.mxu1 %v2259_v34  ;;  %v2293_v33 = vld [vmem:[#allocation20 + $0x180] sm:$0xff]  ;;  %v2292_v34 = vld [vmem:[#allocation20 + $0x178] sm:$0xff]  ;;  %v2286_v41 = vld [vmem:[#allocation20 + $0x148] sm:$0xff] }
 0x488   :  { %2517 = vmatprep.mubr.f32.mxu0 %v2329_v37  ;;  %2554 = vmatprep.subr.mxu1 %v2258_v36  ;;  %v2290_v36 = vld [vmem:[#allocation20 + $0x168] sm:$0xff]  ;;  %v2289_v37 = vld [vmem:[#allocation20 + $0x160] sm:$0xff] }
 0x489   :  { %2555 = vmatpush1.msra.mxu1 %v2257_v40  ;;  %v2287_v40 = vld [vmem:[#allocation20 + $0x150] sm:$0xff] }
 0x48a   :  { %2556 = vmatprep.subr.mxu1 %v2256_v43  ;;  %v2285_v43 = vld [vmem:[#allocation20 + $0x140] sm:$0xff] }
 0x48b   :  { %2518 = vmatmul.mubr.f32.gmra.mxu0 %v2328_v32  ;;  %2557 = vmatpush1.msra.mxu1 %v2255_v49  ;;  %v2284_v49 = vld [vmem:[#allocation20 + $0x138] sm:$0xff]  ;;  %v2283_v32 = vld [vmem:[#allocation20 + $0x130] sm:$0xff] }
 0x48c   :  { %2523 = vmatprep.mubr.f32.mxu0 %v2331_v60  ;;  %2558 = vmatprep.subr.mxu1 %v2254_v58  ;;  %v2336_v58 = vrot.slane %v5195_v59, 1  ;;  %v2282_v60 = vld [vmem:[#allocation20 + $0x128] sm:$0xff]  ;;  %v2341_v59 = vrot.slane %v5217_v44, 1 }
 0x48d   :  { %2559 = vmatpush1.msra.mxu1 %v2253_v54  ;;  %v2281_v54 = vld [vmem:[#allocation20 + $0x120] sm:$0xff] }
 0x48e   :  { %2560 = vmatprep.subr.mxu1 %v2252_v0  ;;  %v2280_v0 = vld [vmem:[#allocation20 + $0x118] sm:$0xff]  ;;  %v2343_v44 = vsel %vm644_vm1, %v2339_v28, %v2341_v59  ;;  %v2702_v28 = vld [vmem:[#allocation22 + $0xd0] sm:$0xff] }
 0x48f   :  { %2524 = vmatmul.mubr.f32.gmra.mxu0 %v2330_v29  ;;  %2561 = vmatpush1.msra.mxu1 %v2251_v56  ;;  %v2279_v56 = vld [vmem:[#allocation20 + $0x110] sm:$0xff]  ;;  %v2346_v29 = vsel %vm644_vm1, %v2334_v30, %v2336_v58  ;;  %v2355_v61 = vmul.f32 %v2343_v44, %v4926_v6  ;;  %v2740_v44 = vld [vmem:[#allocation23] sm:$0xff] }
 0x490   :  { %2529 = vmatprep.mubr.f32.mxu0 %v2333_v5  ;;  %2562 = vmatprep.subr.mxu1 %v2250_v1  ;;  %v2338_v1 = vrot.slane %v5204_v46, 1  ;;  %v2278_v5 = vld [vmem:[#allocation20 + $0x108] sm:$0xff]  ;;  %v2350_v14 = vmul.f32 %v2346_v29, %v4905_v55  ;;  %v2353_v46 = vmul.f32 %v2345_v31, %v4910_v57 }
 0x491   :  { %2563 = vmatpush1.msra.mxu1 %v2249_v62  ;;  %v2340_v62 = vrot.slane %v5208_v3, 1  ;;  %v2349_v3 = vsel %vm644_vm1, %v2341_v59, %v2335_v53  ;;  %v2767_v53 = vld [vmem:[#allocation23 + $0xd8] sm:$0xff]  ;;  %v2745_v29 = vld [vmem:[#allocation23 + $0x28] sm:$0xff]  ;;  %v2698_v59 = vld [vmem:[#allocation22 + $0xb0] sm:$0xff] }
 0x492   :  { %2564 = vmatprep.subr.mxu1 %v2248_v7  ;;  %v2344_v7 = vsel %vm644_vm1, %v2336_v58, %v2338_v1  ;;  %v2703_v58 = vld [vmem:[#allocation22 + $0xd8] sm:$0xff]  ;;  %v2697_v31 = vld [vmem:[#allocation22 + $0xa8] sm:$0xff] }
 0x493   :  { %2530 = vmatmul.mubr.f32.gmra.mxu0 %v2332_v45  ;;  %2565 = vmatpush1.msra.mxu1 %v2247_v8  ;;  %v2352_v50 = vmul.f32 %v2344_v7, %v4910_v57  ;;  %v2342_v8 = vsel %vm644_vm1, %v2338_v1, %v2340_v62  ;;  %v2699_v1 = vld [vmem:[#allocation22 + $0xb8] sm:$0xff] }
 0x494   :  { %2566 = vmatprep.subr.mxu1 %v2246_v9  ;;  %v2354_v45 = vmul.f32 %v2342_v8, %v4926_v6  ;;  %v2357_v9 = vmul.f32 %v2349_v3, %v4948_v19  ;;  %v2695_v7 = vld [vmem:[#allocation22 + $0x98] sm:$0xff]  ;;  %v2693_v8 = vld [vmem:[#allocation22 + $0x88] sm:$0xff]  ;;  %v2802_v3 = vld [vmem:[#allocation23 + $0x1f0] sm:$0xff] }
 0x495   :  { %2567 = vmatpush1.msra.mxu1 %v2245_v11  ;;  %v2348_v11 = vsel %vm644_vm1, %v2340_v62, %v2334_v30  ;;  %v2701_v30 = vld [vmem:[#allocation22 + $0xc8] sm:$0xff]  ;;  %v2696_v62 = vld [vmem:[#allocation22 + $0xa0] sm:$0xff] }
 0x496   :  { %2568 = vmatprep.subr.mxu1 %v2308_v12  ;;  %v2771_v12 = vld [vmem:[#allocation23 + $0xf8] sm:$0xff] }
 0x497   :  { %2569 = vmatpush2.msra.mxu1 %v2307_v24  ;;  %2917 = vmatprep.subr.mxu0 %v2771_v12  ;;  %v2356_v24 = vmul.f32 %v2348_v11, %v4948_v19  ;;  %v2691_v11 = vld [vmem:[#allocation22 + $0x78] sm:$0xff]  ;;  %v2800_v12 = vld [vmem:[#allocation23 + $0x1e0] sm:$0xff] }
 0x498   :  { %2570 = vmatprep.subr.mxu1 %v2306_v17  ;;  %v2770_v17 = vld [vmem:[#allocation23 + $0xf0] sm:$0xff] }
 0x499   :  { %2571 = vmatpush2.msra.mxu1 %v2305_v23  ;;  %v2769_v23 = vld [vmem:[#allocation23 + $0xe8] sm:$0xff]  ;;  %2918 = vmatpush1.msra.mxu0 %v2770_v17  ;;  %v2799_v17 = vld [vmem:[#allocation23 + $0x1d8] sm:$0xff] }
 0x49a   :  { %2572 = vmatprep.subr.mxu1 %v2304_v4  ;;  %2919 = vmatprep.subr.mxu0 %v2769_v23  ;;  %v2766_v4 = vld [vmem:[#allocation23 + $0xd0] sm:$0xff]  ;;  %v2689_v23 = vld [vmem:[#allocation22 + $0x68] sm:$0xff] }
 0x49b   :  { %2573 = vmatpush2.msra.mxu1 %v2303_v63  ;;  %2920 = vmatpush1.msra.mxu0 %v2768_v22  ;;  %v2765_v63 = vld [vmem:[#allocation23 + $0xc8] sm:$0xff]  ;;  %v2798_v22 = vld [vmem:[#allocation23 + $0x1d0] sm:$0xff] }
 0x49c   :  { %2574 = vmatprep.subr.mxu1 %v2302_v48  ;;  %2921 = vmatprep.subr.mxu0 %v2767_v53  ;;  %v2764_v48 = vld [vmem:[#allocation23 + $0xc0] sm:$0xff] }
 0x49d   :  { %2575 = vmatpush2.msra.mxu1 %v2301_v18  ;;  %2922 = vmatpush1.msra.mxu0 %v2766_v4  ;;  %v2763_v18 = vld [vmem:[#allocation23 + $0xb8] sm:$0xff]  ;;  %v2688_v53 = vld [vmem:[#allocation22 + $0x60] sm:$0xff]  ;;  %v2797_v4 = vld [vmem:[#allocation23 + $0x1c8] sm:$0xff] }
 0x49e   :  { %2576 = vmatprep.subr.mxu1 %v2300_v21  ;;  %2923 = vmatprep.subr.mxu0 %v2765_v63  ;;  %v2762_v21 = vld [vmem:[#allocation23 + $0xb0] sm:$0xff]  ;;  %v2687_v63 = vld [vmem:[#allocation22 + $0x58] sm:$0xff] }
 0x49f   :  { %2577 = vmatpush2.msra.mxu1 %v2299_v38  ;;  %2924 = vmatpush1.msra.mxu0 %v2764_v48  ;;  %v2761_v38 = vld [vmem:[#allocation23 + $0xa8] sm:$0xff]  ;;  %v2796_v48 = vld [vmem:[#allocation23 + $0x1c0] sm:$0xff] }
 0x4a0   :  { %2578 = vmatprep.subr.mxu1 %v2298_v25  ;;  %2925 = vmatprep.subr.mxu0 %v2763_v18  ;;  %v2760_v25 = vld [vmem:[#allocation23 + $0xa0] sm:$0xff]  ;;  %v2686_v18 = vld [vmem:[#allocation22 + $0x50] sm:$0xff] }
 0x4a1   :  { %2579 = vmatpush2.msra.mxu1 %v2297_v26  ;;  %2926 = vmatpush1.msra.mxu0 %v2762_v21  ;;  %v2759_v26 = vld [vmem:[#allocation23 + $0x98] sm:$0xff] }
 0x4a2   :  { %2580 = vmatprep.subr.mxu1 %v2296_v27  ;;  %2927 = vmatprep.subr.mxu0 %v2761_v38  ;;  %v2758_v27 = vld [vmem:[#allocation23 + $0x90] sm:$0xff]  ;;  %v2795_v21 = vld [vmem:[#allocation23 + $0x1b8] sm:$0xff]  ;;  %v2685_v38 = vld [vmem:[#allocation22 + $0x48] sm:$0xff] }
 0x4a3   :  { %2581 = vmatpush2.msra.mxu1 %v2295_v51  ;;  %2928 = vmatpush1.msra.mxu0 %v2760_v25  ;;  %v2757_v51 = vld [vmem:[#allocation23 + $0x88] sm:$0xff]  ;;  %v2794_v25 = vld [vmem:[#allocation23 + $0x1b0] sm:$0xff] }
 0x4a4   :  { %2582 = vmatprep.subr.mxu1 %v2294_v16  ;;  %2929 = vmatprep.subr.mxu0 %v2759_v26  ;;  %v2756_v16 = vld [vmem:[#allocation23 + $0x80] sm:$0xff] }
 0x4a5   :  { %2583 = vmatpush2.msra.mxu1 %v2293_v33  ;;  %2930 = vmatpush1.msra.mxu0 %v2758_v27  ;;  %v2755_v33 = vld [vmem:[#allocation23 + $0x78] sm:$0xff]  ;;  %v2684_v26 = vld [vmem:[#allocation22 + $0x40] sm:$0xff]  ;;  %v2793_v27 = vld [vmem:[#allocation23 + $0x1a8] sm:$0xff] }
 0x4a6   :  { %2584 = vmatprep.subr.mxu1 %v2292_v34  ;;  %2931 = vmatprep.subr.mxu0 %v2757_v51  ;;  %v2754_v34 = vld [vmem:[#allocation23 + $0x70] sm:$0xff]  ;;  %v2683_v51 = vld [vmem:[#allocation22 + $0x38] sm:$0xff] }
 0x4a7   :  { %2585 = vmatpush2.msra.mxu1 %v2291_v35  ;;  %2932 = vmatpush1.msra.mxu0 %v2756_v16  ;;  %v2753_v35 = vld [vmem:[#allocation23 + $0x68] sm:$0xff]  ;;  %v2792_v16 = vld [vmem:[#allocation23 + $0x1a0] sm:$0xff] }
 0x4a8   :  { %2586 = vmatprep.subr.mxu1 %v2290_v36  ;;  %2933 = vmatprep.subr.mxu0 %v2755_v33  ;;  %v2707_v36 = vld [vmem:[#allocation22 + $0xf8] sm:$0xff]  ;;  %v2682_v33 = vld [vmem:[#allocation22 + $0x30] sm:$0xff] }
 0x4a9   :  { %2587 = vmatpush2.msra.mxu1 %v2289_v37  ;;  %2934 = vmatpush1.msra.mxu0 %v2754_v34  ;;  %v2752_v37 = vld [vmem:[#allocation23 + $0x60] sm:$0xff]  ;;  %v2791_v34 = vld [vmem:[#allocation23 + $0x198] sm:$0xff] }
 0x4aa   :  { %2588 = vmatprep.subr.mxu1 %v2288_v39  ;;  %2935 = vmatprep.subr.mxu0 %v2753_v35  ;;  %v2706_v39 = vld [vmem:[#allocation22 + $0xf0] sm:$0xff]  ;;  %v2681_v35 = vld [vmem:[#allocation22 + $0x28] sm:$0xff] }
 0x4ab   :  { %2589 = vmatpush2.msra.mxu1 %v2287_v40  ;;  %2936 = vmatpush1.msra.mxu0 %v2752_v37  ;;  %v2751_v40 = vld [vmem:[#allocation23 + $0x58] sm:$0xff]  ;;  %v2680_v37 = vld [vmem:[#allocation22 + $0x20] sm:$0xff] }
 0x4ac   :  { %2590 = vmatprep.subr.mxu1 %v2286_v41  ;;  %v2705_v41 = vld [vmem:[#allocation22 + $0xe8] sm:$0xff]  ;;  %2937 = vmatprep.subr.mxu0 %v2751_v40  ;;  %v2679_v40 = vld [vmem:[#allocation22 + $0x18] sm:$0xff] }
 0x4ad   :  { %2591 = vmatpush2.msra.mxu1 %v2285_v43  ;;  %v2750_v43 = vld [vmem:[#allocation23 + $0x50] sm:$0xff] }
 0x4ae   :  { %2592 = vmatprep.subr.mxu1 %v2284_v49  ;;  %v2704_v49 = vld [vmem:[#allocation22 + $0xe0] sm:$0xff]  ;;  %2938 = vmatpush1.msra.mxu0 %v2750_v43  ;;  %v2678_v43 = vld [vmem:[#allocation22 + $0x10] sm:$0xff] }
 0x4af   :  { %2593 = vmatpush2.msra.mxu1 %v2283_v32  ;;  %v2749_v32 = vld [vmem:[#allocation23 + $0x48] sm:$0xff] }
 0x4b0   :  { %2594 = vmatprep.subr.mxu1 %v2282_v60  ;;  %v2748_v60 = vld [vmem:[#allocation23 + $0x40] sm:$0xff]  ;;  %2939 = vmatprep.subr.mxu0 %v2749_v32  ;;  %v2677_v32 = vld [vmem:[#allocation22 + $0x8] sm:$0xff] }
 0x4b1   :  { %2595 = vmatpush2.msra.mxu1 %v2281_v54  ;;  %v2747_v54 = vld [vmem:[#allocation23 + $0x38] sm:$0xff]  ;;  %2940 = vmatpush1.msra.mxu0 %v2748_v60  ;;  %v2676_v60 = vld [vmem:[#allocation22] sm:$0xff] }
 0x4b2   :  { %2596 = vmatprep.subr.mxu1 %v2280_v0  ;;  %v2746_v0 = vld [vmem:[#allocation23 + $0x30] sm:$0xff]  ;;  %2941 = vmatprep.subr.mxu0 %v2747_v54  ;;  %v2739_v54 = vld [vmem:[#allocation22 + $0x1f8] sm:$0xff] }
 0x4b3   :  { %2597 = vmatpush2.msra.mxu1 %v2279_v56  ;;  %v2700_v56 = vld [vmem:[#allocation22 + $0xc0] sm:$0xff]  ;;  %2942 = vmatpush1.msra.mxu0 %v2746_v0  ;;  %v2738_v0 = vld [vmem:[#allocation22 + $0x1f0] sm:$0xff] }
 0x4b4   :  { %2598 = vmatprep.subr.mxu1 %v2278_v5  ;;  %v2744_v5 = vld [vmem:[#allocation23 + $0x20] sm:$0xff]  ;;  %2943 = vmatprep.subr.mxu0 %v2745_v29  ;;  %v2737_v29 = vld [vmem:[#allocation22 + $0x1e8] sm:$0xff] }
 0x4b5   :  { %2599 = vmatpush2.msra.mxu1 %v2277_v13  ;;  %v2743_v13 = vld [vmem:[#allocation23 + $0x18] sm:$0xff]  ;;  %2944 = vmatpush1.msra.mxu0 %v2744_v5  ;;  %v2736_v5 = vld [vmem:[#allocation22 + $0x1e0] sm:$0xff] }
 0x4b6   :  { %2601 = vmatmul.mubr.f32.vlgmr.msra.gmra.mxu1 %v2350_v14  ;;  %3006 = vmatprep.subr.mxu1 %v2707_v36  ;;  %v2742_v14 = vld [vmem:[#allocation23 + $0x10] sm:$0xff] }
 0x4b7   :  { %2606 = vmatprep.mubr.f32.mxu1 %v2353_v46  ;;  %3007 = vmatpush1.msra.mxu1 %v2706_v39  ;;  %v2741_v46 = vld [vmem:[#allocation23 + $0x8] sm:$0xff]  ;;  %v2790_v36 = vld [vmem:[#allocation23 + $0x190] sm:$0xff] }
 0x4b8   :  { %3008 = vmatprep.subr.mxu1 %v2705_v41  ;;  %2945 = vmatprep.subr.mxu0 %v2743_v13  ;;  %v2789_v39 = vld [vmem:[#allocation23 + $0x188] sm:$0xff]  ;;  %v2788_v41 = vld [vmem:[#allocation23 + $0x180] sm:$0xff]  ;;  %v2735_v13 = vld [vmem:[#allocation22 + $0x1d8] sm:$0xff] }
 0x4b9   :  { %3009 = vmatpush1.msra.mxu1 %v2704_v49  ;;  %2946 = vmatpush1.msra.mxu0 %v2742_v14  ;;  %v2787_v49 = vld [vmem:[#allocation23 + $0x178] sm:$0xff]  ;;  %v2734_v14 = vld [vmem:[#allocation22 + $0x1d0] sm:$0xff] }
 0x4ba   :  { %2607 = vmatmul.mubr.f32.gmra.mxu1 %v2352_v50  ;;  %3010 = vmatprep.subr.mxu1 %v2703_v58  ;;  %v2694_v50 = vld [vmem:[#allocation22 + $0x90] sm:$0xff] }
 0x4bb   :  { %2612 = vmatprep.mubr.f32.mxu1 %v2355_v61  ;;  %3011 = vmatpush1.msra.mxu1 %v2702_v28  ;;  %v2803_v61 = vld [vmem:[#allocation23 + $0x1f8] sm:$0xff]  ;;  %v2786_v58 = vld [vmem:[#allocation23 + $0x170] sm:$0xff]  ;;  %v2785_v28 = vld [vmem:[#allocation23 + $0x168] sm:$0xff] }
 0x4bc   :  { %3012 = vmatprep.subr.mxu1 %v2701_v30  ;;  %2947 = vmatprep.subr.mxu0 %v2741_v46  ;;  %v2784_v30 = vld [vmem:[#allocation23 + $0x160] sm:$0xff]  ;;  %v2733_v46 = vld [vmem:[#allocation22 + $0x1c8] sm:$0xff] }
 0x4bd   :  { %3013 = vmatpush1.msra.mxu1 %v2700_v56  ;;  %2948 = vmatpush1.msra.mxu0 %v2740_v44  ;;  %v2783_v56 = vld [vmem:[#allocation23 + $0x158] sm:$0xff]  ;;  %v2732_v44 = vld [vmem:[#allocation22 + $0x1c0] sm:$0xff] }
 0x4be   :  { %2613 = vmatmul.mubr.f32.gmra.mxu1 %v2354_v45  ;;  %3014 = vmatprep.subr.mxu1 %v2699_v1  ;;  %v2692_v45 = vld [vmem:[#allocation22 + $0x80] sm:$0xff]  ;;  %v2782_v1 = vld [vmem:[#allocation23 + $0x150] sm:$0xff] }
 0x4bf   :  { %2618 = vmatprep.mubr.f32.mxu1 %v2357_v9  ;;  %3015 = vmatpush1.msra.mxu1 %v2698_v59  ;;  %v2801_v9 = vld [vmem:[#allocation23 + $0x1e8] sm:$0xff] }
 0x4c0   :  { %3016 = vmatprep.subr.mxu1 %v2697_v31  ;;  %2949 = vmatprep.subr.mxu0 %v2803_v61  ;;  %v2781_v59 = vld [vmem:[#allocation23 + $0x148] sm:$0xff]  ;;  %v2780_v31 = vld [vmem:[#allocation23 + $0x140] sm:$0xff]  ;;  %v2731_v61 = vld [vmem:[#allocation22 + $0x1b8] sm:$0xff] }
 0x4c1   :  { %3017 = vmatpush1.msra.mxu1 %v2696_v62  ;;  %2950 = vmatpush2.msra.mxu0 %v2802_v3  ;;  %v2779_v62 = vld [vmem:[#allocation23 + $0x138] sm:$0xff]  ;;  %v2730_v3 = vld [vmem:[#allocation22 + $0x1b0] sm:$0xff] }
 0x4c2   :  { %2619 = vmatmul.mubr.f32.gmra.mxu1 %v2356_v24  ;;  %3018 = vmatprep.subr.mxu1 %v2695_v7  ;;  %v2690_v24 = vld [vmem:[#allocation22 + $0x70] sm:$0xff] }
 0x4c3   :  { %3019 = vmatpush1.msra.mxu1 %v2694_v50  ;;  %2951 = vmatprep.subr.mxu0 %v2801_v9  ;;  %v2778_v7 = vld [vmem:[#allocation23 + $0x130] sm:$0xff]  ;;  %v2777_v50 = vld [vmem:[#allocation23 + $0x128] sm:$0xff] }
 0x4c4   :  { %3020 = vmatprep.subr.mxu1 %v2693_v8  ;;  %2952 = vmatpush2.msra.mxu0 %v2800_v12  ;;  %v2776_v8 = vld [vmem:[#allocation23 + $0x120] sm:$0xff]  ;;  %v2729_v9 = vld [vmem:[#allocation22 + $0x1a8] sm:$0xff] }
 0x4c5   :  { %3021 = vmatpush1.msra.mxu1 %v2692_v45  ;;  %2953 = vmatprep.subr.mxu0 %v2799_v17  ;;  %v2775_v45 = vld [vmem:[#allocation23 + $0x118] sm:$0xff]  ;;  %v2728_v12 = vld [vmem:[#allocation22 + $0x1a0] sm:$0xff] }
 0x4c6   :  { %3022 = vmatprep.subr.mxu1 %v2691_v11  ;;  %2954 = vmatpush2.msra.mxu0 %v2798_v22  ;;  %v2774_v11 = vld [vmem:[#allocation23 + $0x110] sm:$0xff]  ;;  %v2727_v17 = vld [vmem:[#allocation22 + $0x198] sm:$0xff] }
 0x4c7   :  { %3023 = vmatpush1.msra.mxu1 %v2690_v24  ;;  %2955 = vmatprep.subr.mxu0 %v2797_v4  ;;  %v2773_v24 = vld [vmem:[#allocation23 + $0x108] sm:$0xff]  ;;  %v2726_v22 = vld [vmem:[#allocation22 + $0x190] sm:$0xff]  ;;  %v2835_v4 = vld [vmem:[#allocation25 + $0xf8] sm:$0xff] }
 0x4c8   :  { %3024 = vmatprep.subr.mxu1 %v2689_v23  ;;  %2956 = vmatpush2.msra.mxu0 %v2796_v48  ;;  %v2772_v23 = vld [vmem:[#allocation23 + $0x100] sm:$0xff]  ;;  %v2723_v48 = vld [vmem:[#allocation22 + $0x178] sm:$0xff] }
 0x4c9   :  { %3025 = vmatpush1.msra.mxu1 %v2688_v53  ;;  %2957 = vmatprep.subr.mxu0 %v2795_v21  ;;  %v2725_v53 = vld [vmem:[#allocation22 + $0x188] sm:$0xff] }
 0x4ca   :  { %3026 = vmatprep.subr.mxu1 %v2687_v63  ;;  %2958 = vmatpush2.msra.mxu0 %v2794_v25  ;;  %v2724_v63 = vld [vmem:[#allocation22 + $0x180] sm:$0xff]  ;;  %v2721_v21 = vld [vmem:[#allocation22 + $0x168] sm:$0xff]  ;;  %v2719_v25 = vld [vmem:[#allocation22 + $0x158] sm:$0xff] }
 0x4cb   :  { %3027 = vmatpush1.msra.mxu1 %v2686_v18  ;;  %2959 = vmatprep.subr.mxu0 %v2793_v27  ;;  %v2722_v18 = vld [vmem:[#allocation22 + $0x170] sm:$0xff]  ;;  %v2717_v27 = vld [vmem:[#allocation22 + $0x148] sm:$0xff] }
 0x4cc   :  { %3028 = vmatprep.subr.mxu1 %v2685_v38  ;;  %2960 = vmatpush2.msra.mxu0 %v2792_v16  ;;  %v2720_v38 = vld [vmem:[#allocation22 + $0x160] sm:$0xff]  ;;  %v2715_v16 = vld [vmem:[#allocation22 + $0x138] sm:$0xff] }
 0x4cd   :  { %3029 = vmatpush1.msra.mxu1 %v2684_v26  ;;  %2961 = vmatprep.subr.mxu0 %v2791_v34  ;;  %v2718_v26 = vld [vmem:[#allocation22 + $0x150] sm:$0xff]  ;;  %v2713_v34 = vld [vmem:[#allocation22 + $0x128] sm:$0xff] }
 0x4ce   :  { %3030 = vmatprep.subr.mxu1 %v2683_v51  ;;  %2962 = vmatpush2.msra.mxu0 %v2790_v36  ;;  %v2716_v51 = vld [vmem:[#allocation22 + $0x140] sm:$0xff]  ;;  %v2711_v36 = vld [vmem:[#allocation22 + $0x118] sm:$0xff] }
 0x4cf   :  { %3031 = vmatpush1.msra.mxu1 %v2682_v33  ;;  %2963 = vmatprep.subr.mxu0 %v2789_v39  ;;  %v2714_v33 = vld [vmem:[#allocation22 + $0x130] sm:$0xff]  ;;  %v2709_v39 = vld [vmem:[#allocation22 + $0x108] sm:$0xff] }
 0x4d0   :  { %3032 = vmatprep.subr.mxu1 %v2681_v35  ;;  %2964 = vmatpush2.msra.mxu0 %v2788_v41  ;;  %v2712_v35 = vld [vmem:[#allocation22 + $0x120] sm:$0xff] }
 0x4d1   :  { %3033 = vmatpush1.msra.mxu1 %v2680_v37  ;;  %2965 = vmatprep.subr.mxu0 %v2787_v49  ;;  %v2710_v37 = vld [vmem:[#allocation22 + $0x110] sm:$0xff] }
 0x4d2   :  { %3034 = vmatprep.subr.mxu1 %v2679_v40  ;;  %2966 = vmatpush2.msra.mxu0 %v2786_v58  ;;  %v2708_v40 = vld [vmem:[#allocation22 + $0x100] sm:$0xff] }
 0x4d3   :  { %3035 = vmatpush1.msra.mxu1 %v2678_v43  ;;  %2967 = vmatprep.subr.mxu0 %v2785_v28 }
 0x4d4   :  { %3036 = vmatprep.subr.mxu1 %v2677_v32  ;;  %2968 = vmatpush2.msra.mxu0 %v2784_v30 }
 0x4d5   :  { %3037 = vmatpush1.msra.mxu1 %v2676_v60  ;;  %2969 = vmatprep.subr.mxu0 %v2783_v56 }
 0x4d6   :  { %3038 = vmatprep.subr.mxu1 %v2739_v54  ;;  %2970 = vmatpush2.msra.mxu0 %v2782_v1 }
 0x4d7   :  { %3039 = vmatpush2.msra.mxu1 %v2738_v0  ;;  %2971 = vmatprep.subr.mxu0 %v2781_v59 }
 0x4d8   :  { %3040 = vmatprep.subr.mxu1 %v2737_v29  ;;  %2972 = vmatpush2.msra.mxu0 %v2780_v31  ;;  %v2309_v29 = vld [vmem:[%s5532_s25] sm:$0x3] }
 0x4d9   :  { %3041 = vmatpush2.msra.mxu1 %v2736_v5  ;;  %2973 = vmatprep.subr.mxu0 %v2779_v62 }
 0x4da   :  { %3042 = vmatprep.subr.mxu1 %v2735_v13  ;;  %2974 = vmatpush2.msra.mxu0 %v2778_v7  ;;  %v2637_v13 = vrot.slane %v2309_v29, %v4958_v47 }
 0x4db   :  { %3043 = vmatpush2.msra.mxu1 %v2734_v14  ;;  %2975 = vmatprep.subr.mxu0 %v2777_v50 }
 0x4dc   :  { %3044 = vmatprep.subr.mxu1 %v2733_v46  ;;  %2976 = vmatpush2.msra.mxu0 %v2776_v8  ;;  %v5286_v46 = vrot.slane %v2309_v29, %v4962_v52  ;;  %v2828_v29 = vld [vmem:[#allocation25 + $0xc0] sm:$0xff] }
 0x4dd   :  { %3045 = vmatpush2.msra.mxu1 %v2732_v44  ;;  %2977 = vmatprep.subr.mxu0 %v2775_v45 }
 0x4de   :  { %3046 = vmatprep.subr.mxu1 %v2731_v61  ;;  %2978 = vmatpush2.msra.mxu0 %v2774_v11 }
 0x4df   :  { %3047 = vmatpush2.msra.mxu1 %v2730_v3  ;;  %2979 = vmatprep.subr.mxu0 %v2773_v24 }
 0x4e0   :  { %3048 = vmatprep.subr.mxu1 %v2729_v9  ;;  %2980 = vmatpush2.msra.mxu0 %v2772_v23 }
 0x4e1   :  { %3049 = vmatpush2.msra.mxu1 %v2728_v12  ;;  %3095 = vmatprep.subr.mxu0 %v2835_v4 }
 0x4e2   :  { %3050 = vmatprep.subr.mxu1 %v2727_v17 }
 0x4e3   :  { %3051 = vmatpush2.msra.mxu1 %v2726_v22 }
 0x4e4   :  { %3052 = vmatprep.subr.mxu1 %v2725_v53 }
 0x4e5   :  { %3053 = vmatpush2.msra.mxu1 %v2724_v63 }
 0x4e6   :  { %3054 = vmatprep.subr.mxu1 %v2723_v48 }
 0x4e7   :  { %3055 = vmatpush2.msra.mxu1 %v2722_v18 }
 0x4e8   :  { %3056 = vmatprep.subr.mxu1 %v2721_v21 }
 0x4e9   :  { %3057 = vmatpush2.msra.mxu1 %v2720_v38 }
 0x4ea   :  { %3058 = vmatprep.subr.mxu1 %v2719_v25  ;;  %v2834_v25 = vld [vmem:[#allocation25 + $0xf0] sm:$0xff] }
 0x4eb   :  { %3059 = vmatpush2.msra.mxu1 %v2718_v26 }
 0x4ec   :  { %3060 = vmatprep.subr.mxu1 %v2717_v27 }
 0x4ed   :  { %3061 = vmatpush2.msra.mxu1 %v2716_v51 }
 0x4ee   :  { %3062 = vmatprep.subr.mxu1 %v2715_v16 }
 0x4ef   :  { %3063 = vmatpush2.msra.mxu1 %v2714_v33  ;;  %v2833_v33 = vld [vmem:[#allocation25 + $0xe8] sm:$0xff] }
 0x4f0   :  { %3064 = vmatprep.subr.mxu1 %v2713_v34 }
 0x4f1   :  { %3065 = vmatpush2.msra.mxu1 %v2712_v35 }
 0x4f2   :  { %3066 = vmatprep.subr.mxu1 %v2711_v36  ;;  %v2832_v36 = vld [vmem:[#allocation25 + $0xe0] sm:$0xff] }
 0x4f3   :  { %3067 = vmatpush2.msra.mxu1 %v2710_v37 }
 0x4f4   :  { %3068 = vmatprep.subr.mxu1 %v2709_v39 }
 0x4f5   :  { %3069 = vmatpush2.msra.mxu1 %v2708_v40  ;;  %v2831_v40 = vld [vmem:[#allocation25 + $0xd8] sm:$0xff] }
 0x536   :  { %v2424_v41 = vpop.f32.mrf.mxu1 }
 0x538   :  { %v2426_v43 = vpop.f32.mrf.mxu1 }
 0x53a   :  { %v2430_v49 = vpop.f32.mrf.mxu1 }
 0x53c   :  { %v2432_v32 = vpop.f32.mrf.mxu1 }
 0x53e   :  { %v2436_v60 = vpop.f32.mrf.mxu1 }
 0x540   :  { %v2438_v54 = vpop.f32.mrf.mxu1 }
 0x542   :  { %v2442_v0 = vpop.f32.mrf.mxu1 }
 0x544   :  { %v2444_v1 = vpop.f32.mrf.mxu1 }
 0x547   :  { %v2513_v58 = vpop.f32.mrf.mxu0 }
 0x548   :  { %v2514_v59 = vadd.f32 %v2513_v58, %v2424_v41 }
 0x549   :  { %v2515_v28 = vpop.f32.mrf.mxu0 }
 0x54a   :  { %v2516_v14 = vadd.f32 %v2515_v28, %v2426_v43 }
 0x54b   :  { %v2519_v30 = vpop.f32.mrf.mxu0 }
 0x54c   :  { %v2520_v50 = vadd.f32 %v2519_v30, %v2430_v49  ;;  %v2829_v30 = vld [vmem:[#allocation25 + $0xc8] sm:$0xff] }
 0x54d   :  { %v2521_v56 = vpop.f32.mrf.mxu0 }
 0x54e   :  { %v2522_v45 = vadd.f32 %v2521_v56, %v2432_v32 }
 0x54f   :  { %v2525_v5 = vpop.f32.mrf.mxu0 }
 0x550   :  { %v2526_v12 = vadd.f32 %v2525_v5, %v2436_v60  ;;  %v2830_v60 = vld [vmem:[#allocation25 + $0xd0] sm:$0xff] }
 0x551   :  { %v2527_v7 = vpop.f32.mrf.mxu0 }
 0x552   :  { %v2528_v48 = vadd.f32 %v2527_v7, %v2438_v54  ;;  %v2826_v7 = vld [vmem:[#allocation25 + $0xb0] sm:$0xff] }
 0x553   :  { %v2531_v24 = vpop.f32.mrf.mxu0 }
 0x554   :  { %v2532_v26 = vadd.f32 %v2531_v24, %v2442_v0  ;;  %v2823_v24 = vld [vmem:[#allocation25 + $0x98] sm:$0xff] }
 0x555   :  { %v2533_v27 = vpop.f32.mrf.mxu0 }
 0x556   :  { %v2534_v43 = vadd.f32 %v2533_v27, %v2444_v1 }
 0x576   :  { %v2602_v31 = vpop.f32.mrf.mxu1 }
 0x577   :  { %v2625_v62 = vadd.f32 %v2602_v31, %v2514_v59  ;;  %v2827_v31 = vld [vmem:[#allocation25 + $0xb8] sm:$0xff] }
 0x578   :  { %v2604_v44 = vpop.f32.mrf.mxu1 }
 0x579   :  { %v2644_v61 = vadd.f32 %v2637_v13, %v2625_v62  ;;  %v2626_v8 = vadd.f32 %v2604_v44, %v2516_v14 }
 0x57a   :  { %v2608_v3 = vpop.f32.mrf.mxu1 }
 0x57b   :  { %v2645_v9 = vadd.f32 %v5286_v46, %v2626_v8  ;;  %v2627_v11 = vadd.f32 %v2608_v3, %v2520_v50  ;;  %vm2652_vm12 = vcmp.ge.f32.partialorder %v2644_v61, 0.0  ;;  %v2660_v17 = vmul.f32 0.2, %v2644_v61 }
 0x57c   :  { %v2610_v23 = vpop.f32.mrf.mxu1 }
 0x57d   :  { %v2646_v22 = vadd.f32 %v2637_v13, %v2627_v11  ;;  %v2628_v53 = vadd.f32 %v2610_v23, %v2522_v45  ;;  %vm2653_vm13 = vcmp.ge.f32.partialorder %v2645_v9, 0.0  ;;  %v2661_v4 = vmul.f32 0.2, %v2645_v9 }
 0x57e   :  { %v2614_v63 = vpop.f32.mrf.mxu1  ;;  %v5294_v16 = vsel %vm2652_vm12, %v2644_v61, %v2660_v17  ;;  %v2825_v61 = vld [vmem:[#allocation25 + $0xa8] sm:$0xff] }
 0x57f   :  { %v2647_v18 = vadd.f32 %v5286_v46, %v2628_v53  ;;  %v2629_v21 = vadd.f32 %v2614_v63, %v2526_v12  ;;  %v5290_v38 = vsel %vm2653_vm13, %v2645_v9, %v2661_v4  ;;  %vm2654_vm14 = vcmp.ge.f32.partialorder %v2646_v22, 0.0  ;;  %v2822_v53 = vld [vmem:[#allocation25 + $0x90] sm:$0xff] }
 0x580   :  { %v2616_v51 = vpop.f32.mrf.mxu1  ;;  %2981 = vmatprep.mubr.f32.mxu0 %v5290_v38  ;;  %v2662_v41 = vmul.f32 0.2, %v2646_v22  ;;  %v2894_v62 = vrot.slane %v5290_v38, 1  ;;  %v2869_v11 = vrot.slane %v5294_v16, 7  ;;  %v2870_v23 = vrot.slane %v5290_v38, 7  ;;  %v3327_v38 = vld [vmem:[#allocation28 + $0xe0] sm:$0xff] }
 0x581   :  { %v2648_v34 = vadd.f32 %v2637_v13, %v2629_v21  ;;  %v2630_v35 = vadd.f32 %v2616_v51, %v2528_v48  ;;  %2982 = vmatmul.mubr.f32.vlgmr.msra.gmra.mxu0 %v5294_v16  ;;  %vm2655_vm15 = vcmp.ge.f32.partialorder %v2647_v18, 0.0  ;;  %v2663_v37 = vmul.f32 0.2, %v2647_v18  ;;  %v2821_v48 = vld [vmem:[#allocation25 + $0x88] sm:$0xff]  ;;  %v2819_v51 = vld [vmem:[#allocation25 + $0x78] sm:$0xff] }
 0x582   :  { %3096 = vmatpush1.msra.mxu0 %v2834_v25  ;;  %v2620_v39 = vpop.f32.mrf.mxu1  ;;  %v5302_v54 = vsel %vm2654_vm14, %v2646_v22, %v2662_v41  ;;  %v2820_v25 = vld [vmem:[#allocation25 + $0x80] sm:$0xff] }
 0x583   :  { %v2649_v49 = vadd.f32 %v5286_v46, %v2630_v35  ;;  %v2631_v32 = vadd.f32 %v2620_v39, %v2532_v26  ;;  %3097 = vmatprep.subr.mxu0 %v2833_v33  ;;  %v5298_v58 = vsel %vm2655_vm15, %v2647_v18, %v2663_v37  ;;  %v2664_v1 = vmul.f32 0.2, %v2648_v34  ;;  %v2818_v35 = vld [vmem:[#allocation25 + $0x70] sm:$0xff]  ;;  %v2817_v37 = vld [vmem:[#allocation25 + $0x68] sm:$0xff]  ;;  %v2816_v41 = vld [vmem:[#allocation25 + $0x60] sm:$0xff] }
 0x584   :  { %3098 = vmatpush1.msra.mxu0 %v2832_v36  ;;  %v2622_v28 = vpop.f32.mrf.mxu1  ;;  %2987 = vmatprep.mubr.f32.mxu0 %v5298_v58  ;;  %v2896_v5 = vrot.slane %v5298_v58, 1  ;;  %vm2656_vm3 = vcmp.ge.f32.partialorder %v2648_v34, 0.0  ;;  %v2872_v3 = vrot.slane %v5298_v58, 7  ;;  %v2871_v4 = vrot.slane %v5302_v54, 7 }
 0x585   :  { %v2650_v0 = vadd.f32 %v2637_v13, %v2631_v32  ;;  %v2632_v56 = vadd.f32 %v2622_v28, %v2534_v43  ;;  %3099 = vmatprep.subr.mxu0 %v2831_v40  ;;  %2988 = vmatmul.mubr.f32.gmra.mxu0 %v5302_v54  ;;  %vm2657_vm2 = vcmp.ge.f32.partialorder %v2649_v49, 0.0  ;;  %v2665_v59 = vmul.f32 0.2, %v2649_v49  ;;  %v2814_v32 = vld [vmem:[#allocation25 + $0x50] sm:$0xff]  ;;  %v2813_v28 = vld [vmem:[#allocation25 + $0x48] sm:$0xff] }
 0x586   :  { %3100 = vmatpush1.msra.mxu0 %v2830_v60  ;;  %v5311_v50 = vsel %vm2656_vm3, %v2648_v34, %v2664_v1  ;;  %v2906_v9 = vsel %vm644_vm1, %v2894_v62, %v2896_v5  ;;  %v2882_v27 = vsel %vm599_vm0, %v2870_v23, %v2872_v3  ;;  %v2881_v40 = vsel %vm599_vm0, %v2869_v11, %v2871_v4  ;;  %v2811_v1 = vld [vmem:[#allocation25 + $0x38] sm:$0xff] }
 0x587   :  { %v2651_v14 = vadd.f32 %v5286_v46, %v2632_v56  ;;  %3101 = vmatprep.subr.mxu0 %v2829_v30  ;;  %v5308_v13 = vsel %vm2657_vm2, %v2649_v49, %v2665_v59  ;;  %vm2658_vm4 = vcmp.ge.f32.partialorder %v2650_v0, 0.0  ;;  %v2666_v44 = vmul.f32 0.2, %v2650_v0  ;;  %v2824_v46 = vld [vmem:[#allocation25 + $0xa0] sm:$0xff]  ;;  %v2815_v49 = vld [vmem:[#allocation25 + $0x58] sm:$0xff]  ;;  %v2810_v59 = vld [vmem:[#allocation25 + $0x30] sm:$0xff] }
 0x588   :  { %3102 = vmatpush1.msra.mxu0 %v2828_v29  ;;  %2993 = vmatprep.mubr.f32.mxu0 %v5308_v13  ;;  %v2910_v18 = vmul.f32 %v2906_v9, %v4905_v55  ;;  %v2874_v21 = vrot.slane %v5308_v13, 7  ;;  %v2873_v36 = vrot.slane %v5311_v50, 7  ;;  %v2888_v39 = vmul.f32 %v2882_v27, %v4890_v42  ;;  %v2812_v56 = vld [vmem:[#allocation25 + $0x40] sm:$0xff]  ;;  %v2805_v9 = vld [vmem:[#allocation25 + $0x8] sm:$0xff]  ;;  %v2855_v27 = vld [vmem:[#allocation25 + $0x198] sm:$0xff] }
 0x589   :  { %3103 = vmatprep.subr.mxu0 %v2827_v31  ;;  %vm2659_vm5 = vcmp.ge.f32.partialorder %v2651_v14, 0.0  ;;  %v2667_v8 = vmul.f32 0.2, %v2651_v14  ;;  %2994 = vmatmul.mubr.f32.gmra.mxu0 %v5311_v50  ;;  %v5315_v45 = vsel %vm2658_vm4, %v2650_v0, %v2666_v44  ;;  %v2887_v60 = vmul.f32 %v2881_v40, %v4890_v42  ;;  %v2847_v40 = vld [vmem:[#allocation25 + $0x158] sm:$0xff] }
 0x58a   :  { %3104 = vmatpush1.msra.mxu0 %v2826_v7  ;;  %v2875_v17 = vrot.slane %v5315_v45, 7  ;;  %v2880_v43 = vsel %vm599_vm0, %v2872_v3, %v2874_v21  ;;  %v2879_v0 = vsel %vm599_vm0, %v2871_v4, %v2873_v36  ;;  %v2806_v3 = vld [vmem:[#allocation25 + $0x10] sm:$0xff] }
 0x58b   :  { %v5324_v12 = vsel %vm2659_vm5, %v2651_v14, %v2667_v8  ;;  %3105 = vmatprep.subr.mxu0 %v2825_v61  ;;  %v2890_v30 = vmul.f32 %v2880_v43, %v4922_v2  ;;  %v2889_v31 = vmul.f32 %v2879_v0, %v4922_v2  ;;  %v2809_v14 = vld [vmem:[#allocation25 + $0x28] sm:$0xff]  ;;  %v2808_v61 = vld [vmem:[#allocation25 + $0x20] sm:$0xff]  ;;  %v2807_v8 = vld [vmem:[#allocation25 + $0x18] sm:$0xff]  ;;  %v2898_v0 = vrot.slane %v5308_v13, 1 }
 0x58c   :  { %v2876_v22 = vrot.slane %v5324_v12, 7  ;;  %2999 = vmatprep.mubr.f32.mxu0 %v5324_v12  ;;  %3106 = vmatpush1.msra.mxu0 %v2824_v46  ;;  %v2883_v63 = vsel %vm599_vm0, %v2875_v17, %v2869_v11  ;;  %v2877_v44 = vsel %vm599_vm0, %v2873_v36, %v2875_v17  ;;  %v2804_v11 = vld [vmem:[#allocation25] sm:$0xff]  ;;  %v2865_v17 = vld [vmem:[#allocation25 + $0x1e8] sm:$0xff]  ;;  %v2862_v4 = vld [vmem:[#allocation25 + $0x1d0] sm:$0xff] }
 0x58d   :  { %3107 = vmatprep.subr.mxu0 %v2823_v24  ;;  %3000 = vmatmul.mubr.f32.gmra.mxu0 %v5315_v45  ;;  %v2885_v34 = vmul.f32 %v2883_v63, %v4882_v20  ;;  %v2891_v46 = vmul.f32 %v2877_v44, %v4944_v15  ;;  %v2867_v24 = vld [vmem:[#allocation25 + $0x1f8] sm:$0xff]  ;;  %v2861_v63 = vld [vmem:[#allocation25 + $0x1c8] sm:$0xff]  ;;  %v2850_v36 = vld [vmem:[#allocation25 + $0x170] sm:$0xff] }
 0x58e   :  { %v2884_v26 = vsel %vm599_vm0, %v2876_v22, %v2870_v23  ;;  %3108 = vmatpush1.msra.mxu0 %v2822_v53  ;;  %3159 = vmatprep.mubr.f32.mxu0 %v2910_v18  ;;  %v2878_v29 = vsel %vm599_vm0, %v2874_v21, %v2876_v22  ;;  %v2866_v23 = vld [vmem:[#allocation25 + $0x1f0] sm:$0xff]  ;;  %v2864_v22 = vld [vmem:[#allocation25 + $0x1e0] sm:$0xff]  ;;  %v2863_v53 = vld [vmem:[#allocation25 + $0x1d8] sm:$0xff] }
 0x58f   :  { %v2886_v33 = vmul.f32 %v2884_v26, %v4882_v20  ;;  %3109 = vmatprep.subr.mxu0 %v2821_v48  ;;  %v2892_v7 = vmul.f32 %v2878_v29, %v4944_v15  ;;  %v2860_v48 = vld [vmem:[#allocation25 + $0x1c0] sm:$0xff]  ;;  %v2859_v18 = vld [vmem:[#allocation25 + $0x1b8] sm:$0xff]  ;;  %v2858_v21 = vld [vmem:[#allocation25 + $0x1b0] sm:$0xff]  ;;  %v2893_v29 = vrot.slane %v5294_v16, 1  ;;  %v2904_v16 = vsel %vm644_vm1, %v2896_v5, %v2898_v0 }
 0x590   :  { %3110 = vmatpush1.msra.mxu0 %v2820_v25  ;;  %v2857_v25 = vld [vmem:[#allocation25 + $0x1a8] sm:$0xff]  ;;  %v2856_v26 = vld [vmem:[#allocation25 + $0x1a0] sm:$0xff] }
 0x591   :  { %3070 = vmatprep.mubr.f32.mxu1 %v2886_v33  ;;  %3111 = vmatprep.subr.mxu0 %v2819_v51  ;;  %v2854_v51 = vld [vmem:[#allocation25 + $0x190] sm:$0xff]  ;;  %v2853_v33 = vld [vmem:[#allocation25 + $0x188] sm:$0xff]  ;;  %v2836_v44 = vld [vmem:[#allocation25 + $0x100] sm:$0xff] }
 0x592   :  { %3071 = vmatmul.mubr.f32.vlgmr.msra.gmra.mxu1 %v2885_v34  ;;  %3112 = vmatpush1.msra.mxu0 %v2818_v35  ;;  %v2852_v34 = vld [vmem:[#allocation25 + $0x180] sm:$0xff]  ;;  %v2851_v35 = vld [vmem:[#allocation25 + $0x178] sm:$0xff]  ;;  %v2845_v43 = vld [vmem:[#allocation25 + $0x148] sm:$0xff] }
 0x593   :  { %3076 = vmatprep.mubr.f32.mxu1 %v2888_v39  ;;  %3113 = vmatprep.subr.mxu0 %v2817_v37  ;;  %v2849_v37 = vld [vmem:[#allocation25 + $0x168] sm:$0xff]  ;;  %v2848_v39 = vld [vmem:[#allocation25 + $0x160] sm:$0xff] }
 0x594   :  { %3114 = vmatpush1.msra.mxu0 %v2816_v41  ;;  %v2846_v41 = vld [vmem:[#allocation25 + $0x150] sm:$0xff] }
 0x595   :  { %3115 = vmatprep.subr.mxu0 %v2815_v49  ;;  %v2844_v49 = vld [vmem:[#allocation25 + $0x140] sm:$0xff] }
 0x596   :  { %3077 = vmatmul.mubr.f32.gmra.mxu1 %v2887_v60  ;;  %3116 = vmatpush1.msra.mxu0 %v2814_v32  ;;  %v2843_v32 = vld [vmem:[#allocation25 + $0x138] sm:$0xff]  ;;  %v2842_v60 = vld [vmem:[#allocation25 + $0x130] sm:$0xff] }
 0x597   :  { %3082 = vmatprep.mubr.f32.mxu1 %v2890_v30  ;;  %3117 = vmatprep.subr.mxu0 %v2813_v28  ;;  %v2895_v28 = vrot.slane %v5302_v54, 1  ;;  %v2841_v30 = vld [vmem:[#allocation25 + $0x128] sm:$0xff]  ;;  %v2900_v54 = vrot.slane %v5324_v12, 1 }
 0x598   :  { %3118 = vmatpush1.msra.mxu0 %v2812_v56  ;;  %v2840_v56 = vld [vmem:[#allocation25 + $0x120] sm:$0xff] }
 0x599   :  { %3119 = vmatprep.subr.mxu0 %v2811_v1  ;;  %v2839_v1 = vld [vmem:[#allocation25 + $0x118] sm:$0xff]  ;;  %v2902_v12 = vsel %vm644_vm1, %v2898_v0, %v2900_v54  ;;  %v3261_v0 = vld [vmem:[#allocation26 + $0xd0] sm:$0xff] }
 0x59a   :  { %3083 = vmatmul.mubr.f32.gmra.mxu1 %v2889_v31  ;;  %3120 = vmatpush1.msra.mxu0 %v2810_v59  ;;  %v2838_v59 = vld [vmem:[#allocation25 + $0x110] sm:$0xff]  ;;  %v2905_v31 = vsel %vm644_vm1, %v2893_v29, %v2895_v28  ;;  %v2914_v5 = vmul.f32 %v2902_v12, %v4926_v6  ;;  %v3299_v12 = vld [vmem:[#allocation28] sm:$0xff] }
 0x59b   :  { %3088 = vmatprep.mubr.f32.mxu1 %v2892_v7  ;;  %3121 = vmatprep.subr.mxu0 %v2809_v14  ;;  %v2897_v14 = vrot.slane %v5311_v50, 1  ;;  %v2837_v7 = vld [vmem:[#allocation25 + $0x108] sm:$0xff]  ;;  %v2909_v13 = vmul.f32 %v2905_v31, %v4905_v55  ;;  %v2912_v50 = vmul.f32 %v2904_v16, %v4910_v57 }
 0x59c   :  { %3122 = vmatpush1.msra.mxu0 %v2808_v61  ;;  %v2899_v61 = vrot.slane %v5315_v45, 1  ;;  %v2908_v45 = vsel %vm644_vm1, %v2900_v54, %v2894_v62  ;;  %v3326_v62 = vld [vmem:[#allocation28 + $0xd8] sm:$0xff]  ;;  %v3304_v31 = vld [vmem:[#allocation28 + $0x28] sm:$0xff]  ;;  %v3257_v54 = vld [vmem:[#allocation26 + $0xb0] sm:$0xff] }
 0x59d   :  { %3123 = vmatprep.subr.mxu0 %v2807_v8  ;;  %v2903_v8 = vsel %vm644_vm1, %v2895_v28, %v2897_v14  ;;  %v3262_v28 = vld [vmem:[#allocation26 + $0xd8] sm:$0xff]  ;;  %v3256_v16 = vld [vmem:[#allocation26 + $0xa8] sm:$0xff] }
 0x59e   :  { %3089 = vmatmul.mubr.f32.gmra.mxu1 %v2891_v46  ;;  %3124 = vmatpush1.msra.mxu0 %v2806_v3  ;;  %v2911_v58 = vmul.f32 %v2903_v8, %v4910_v57  ;;  %v2901_v3 = vsel %vm644_vm1, %v2897_v14, %v2899_v61  ;;  %v3258_v14 = vld [vmem:[#allocation26 + $0xb8] sm:$0xff] }
 0x59f   :  { %3125 = vmatprep.subr.mxu0 %v2805_v9  ;;  %v2913_v46 = vmul.f32 %v2901_v3, %v4926_v6  ;;  %v2916_v9 = vmul.f32 %v2908_v45, %v4948_v19  ;;  %v3254_v8 = vld [vmem:[#allocation26 + $0x98] sm:$0xff]  ;;  %v3252_v3 = vld [vmem:[#allocation26 + $0x88] sm:$0xff]  ;;  %v3361_v45 = vld [vmem:[#allocation28 + $0x1f0] sm:$0xff] }
 0x5a0   :  { %3126 = vmatpush1.msra.mxu0 %v2804_v11  ;;  %v2907_v11 = vsel %vm644_vm1, %v2899_v61, %v2893_v29  ;;  %v3260_v29 = vld [vmem:[#allocation26 + $0xc8] sm:$0xff]  ;;  %v3255_v61 = vld [vmem:[#allocation26 + $0xa0] sm:$0xff] }
 0x5a1   :  { %3127 = vmatprep.subr.mxu0 %v2867_v24  ;;  %v3330_v24 = vld [vmem:[#allocation28 + $0xf8] sm:$0xff] }
 0x5a2   :  { %3128 = vmatpush2.msra.mxu0 %v2866_v23  ;;  %3476 = vmatprep.subr.mxu1 %v3330_v24  ;;  %v2915_v23 = vmul.f32 %v2907_v11, %v4948_v19  ;;  %v3250_v11 = vld [vmem:[#allocation26 + $0x78] sm:$0xff]  ;;  %v3359_v24 = vld [vmem:[#allocation28 + $0x1e0] sm:$0xff] }
 0x5a3   :  { %3129 = vmatprep.subr.mxu0 %v2865_v17  ;;  %v3329_v17 = vld [vmem:[#allocation28 + $0xf0] sm:$0xff] }
 0x5a4   :  { %3130 = vmatpush2.msra.mxu0 %v2864_v22  ;;  %v3328_v22 = vld [vmem:[#allocation28 + $0xe8] sm:$0xff]  ;;  %3477 = vmatpush1.msra.mxu1 %v3329_v17  ;;  %v3358_v17 = vld [vmem:[#allocation28 + $0x1d8] sm:$0xff] }
 0x5a5   :  { %3131 = vmatprep.subr.mxu0 %v2863_v53  ;;  %3478 = vmatprep.subr.mxu1 %v3328_v22  ;;  %v3325_v53 = vld [vmem:[#allocation28 + $0xd0] sm:$0xff]  ;;  %v3248_v22 = vld [vmem:[#allocation26 + $0x68] sm:$0xff] }
 0x5a6   :  { %3132 = vmatpush2.msra.mxu0 %v2862_v4  ;;  %3479 = vmatpush1.msra.mxu1 %v3327_v38  ;;  %v3324_v4 = vld [vmem:[#allocation28 + $0xc8] sm:$0xff]  ;;  %v3357_v38 = vld [vmem:[#allocation28 + $0x1d0] sm:$0xff] }
 0x5a7   :  { %3133 = vmatprep.subr.mxu0 %v2861_v63  ;;  %3480 = vmatprep.subr.mxu1 %v3326_v62  ;;  %v3323_v63 = vld [vmem:[#allocation28 + $0xc0] sm:$0xff] }
 0x5a8   :  { %3134 = vmatpush2.msra.mxu0 %v2860_v48  ;;  %3481 = vmatpush1.msra.mxu1 %v3325_v53  ;;  %v3322_v48 = vld [vmem:[#allocation28 + $0xb8] sm:$0xff]  ;;  %v3247_v62 = vld [vmem:[#allocation26 + $0x60] sm:$0xff]  ;;  %v3356_v53 = vld [vmem:[#allocation28 + $0x1c8] sm:$0xff] }
 0x5a9   :  { %3135 = vmatprep.subr.mxu0 %v2859_v18  ;;  %3482 = vmatprep.subr.mxu1 %v3324_v4  ;;  %v3321_v18 = vld [vmem:[#allocation28 + $0xb0] sm:$0xff]  ;;  %v3246_v4 = vld [vmem:[#allocation26 + $0x58] sm:$0xff] }
 0x5aa   :  { %3136 = vmatpush2.msra.mxu0 %v2858_v21  ;;  %3483 = vmatpush1.msra.mxu1 %v3323_v63  ;;  %v3320_v21 = vld [vmem:[#allocation28 + $0xa8] sm:$0xff]  ;;  %v3355_v63 = vld [vmem:[#allocation28 + $0x1c0] sm:$0xff] }
 0x5ab   :  { %3137 = vmatprep.subr.mxu0 %v2857_v25  ;;  %3484 = vmatprep.subr.mxu1 %v3322_v48  ;;  %v3319_v25 = vld [vmem:[#allocation28 + $0xa0] sm:$0xff]  ;;  %v3245_v48 = vld [vmem:[#allocation26 + $0x50] sm:$0xff] }
 0x5ac   :  { %3138 = vmatpush2.msra.mxu0 %v2856_v26  ;;  %3485 = vmatpush1.msra.mxu1 %v3321_v18  ;;  %v3318_v26 = vld [vmem:[#allocation28 + $0x98] sm:$0xff] }
 0x5ad   :  { %3139 = vmatprep.subr.mxu0 %v2855_v27  ;;  %3486 = vmatprep.subr.mxu1 %v3320_v21  ;;  %v3317_v27 = vld [vmem:[#allocation28 + $0x90] sm:$0xff]  ;;  %v3354_v18 = vld [vmem:[#allocation28 + $0x1b8] sm:$0xff]  ;;  %v3244_v21 = vld [vmem:[#allocation26 + $0x48] sm:$0xff] }
 0x5ae   :  { %3140 = vmatpush2.msra.mxu0 %v2854_v51  ;;  %3487 = vmatpush1.msra.mxu1 %v3319_v25  ;;  %v3316_v51 = vld [vmem:[#allocation28 + $0x88] sm:$0xff]  ;;  %v3353_v25 = vld [vmem:[#allocation28 + $0x1b0] sm:$0xff] }
 0x5af   :  { %3141 = vmatprep.subr.mxu0 %v2853_v33  ;;  %3488 = vmatprep.subr.mxu1 %v3318_v26  ;;  %v3315_v33 = vld [vmem:[#allocation28 + $0x80] sm:$0xff] }
 0x5b0   :  { %3142 = vmatpush2.msra.mxu0 %v2852_v34  ;;  %3489 = vmatpush1.msra.mxu1 %v3317_v27  ;;  %v3314_v34 = vld [vmem:[#allocation28 + $0x78] sm:$0xff]  ;;  %v3243_v26 = vld [vmem:[#allocation26 + $0x40] sm:$0xff]  ;;  %v3352_v27 = vld [vmem:[#allocation28 + $0x1a8] sm:$0xff] }
 0x5b1   :  { %3143 = vmatprep.subr.mxu0 %v2851_v35  ;;  %3490 = vmatprep.subr.mxu1 %v3316_v51  ;;  %v3313_v35 = vld [vmem:[#allocation28 + $0x70] sm:$0xff]  ;;  %v3242_v51 = vld [vmem:[#allocation26 + $0x38] sm:$0xff] }
 0x5b2   :  { %3144 = vmatpush2.msra.mxu0 %v2850_v36  ;;  %3491 = vmatpush1.msra.mxu1 %v3315_v33  ;;  %v3312_v36 = vld [vmem:[#allocation28 + $0x68] sm:$0xff]  ;;  %v3351_v33 = vld [vmem:[#allocation28 + $0x1a0] sm:$0xff] }
 0x5b3   :  { %3145 = vmatprep.subr.mxu0 %v2849_v37  ;;  %3492 = vmatprep.subr.mxu1 %v3314_v34  ;;  %v3266_v37 = vld [vmem:[#allocation26 + $0xf8] sm:$0xff]  ;;  %v3241_v34 = vld [vmem:[#allocation26 + $0x30] sm:$0xff] }
 0x5b4   :  { %3146 = vmatpush2.msra.mxu0 %v2848_v39  ;;  %3493 = vmatpush1.msra.mxu1 %v3313_v35  ;;  %v3311_v39 = vld [vmem:[#allocation28 + $0x60] sm:$0xff]  ;;  %v3350_v35 = vld [vmem:[#allocation28 + $0x198] sm:$0xff] }
 0x5b5   :  { %3147 = vmatprep.subr.mxu0 %v2847_v40  ;;  %3494 = vmatprep.subr.mxu1 %v3312_v36  ;;  %v3265_v40 = vld [vmem:[#allocation26 + $0xf0] sm:$0xff]  ;;  %v3240_v36 = vld [vmem:[#allocation26 + $0x28] sm:$0xff] }
 0x5b6   :  { %3148 = vmatpush2.msra.mxu0 %v2846_v41  ;;  %3495 = vmatpush1.msra.mxu1 %v3311_v39  ;;  %v3310_v41 = vld [vmem:[#allocation28 + $0x58] sm:$0xff]  ;;  %v3239_v39 = vld [vmem:[#allocation26 + $0x20] sm:$0xff] }
 0x5b7   :  { %3149 = vmatprep.subr.mxu0 %v2845_v43  ;;  %v3264_v43 = vld [vmem:[#allocation26 + $0xe8] sm:$0xff]  ;;  %3496 = vmatprep.subr.mxu1 %v3310_v41  ;;  %v3238_v41 = vld [vmem:[#allocation26 + $0x18] sm:$0xff] }
 0x5b8   :  { %3150 = vmatpush2.msra.mxu0 %v2844_v49  ;;  %v3309_v49 = vld [vmem:[#allocation28 + $0x50] sm:$0xff] }
 0x5b9   :  { %3151 = vmatprep.subr.mxu0 %v2843_v32  ;;  %v3263_v32 = vld [vmem:[#allocation26 + $0xe0] sm:$0xff]  ;;  %3497 = vmatpush1.msra.mxu1 %v3309_v49  ;;  %v3237_v49 = vld [vmem:[#allocation26 + $0x10] sm:$0xff] }
 0x5ba   :  { %3152 = vmatpush2.msra.mxu0 %v2842_v60  ;;  %v3308_v60 = vld [vmem:[#allocation28 + $0x48] sm:$0xff] }
 0x5bb   :  { %3153 = vmatprep.subr.mxu0 %v2841_v30  ;;  %v3307_v30 = vld [vmem:[#allocation28 + $0x40] sm:$0xff]  ;;  %3498 = vmatprep.subr.mxu1 %v3308_v60  ;;  %v3236_v60 = vld [vmem:[#allocation26 + $0x8] sm:$0xff] }
 0x5bc   :  { %3154 = vmatpush2.msra.mxu0 %v2840_v56  ;;  %v3306_v56 = vld [vmem:[#allocation28 + $0x38] sm:$0xff]  ;;  %3499 = vmatpush1.msra.mxu1 %v3307_v30  ;;  %v3235_v30 = vld [vmem:[#allocation26] sm:$0xff] }
 0x5bd   :  { %3155 = vmatprep.subr.mxu0 %v2839_v1  ;;  %v3305_v1 = vld [vmem:[#allocation28 + $0x30] sm:$0xff]  ;;  %3500 = vmatprep.subr.mxu1 %v3306_v56  ;;  %v3298_v56 = vld [vmem:[#allocation26 + $0x1f8] sm:$0xff] }
 0x5be   :  { %3156 = vmatpush2.msra.mxu0 %v2838_v59  ;;  %v3259_v59 = vld [vmem:[#allocation26 + $0xc0] sm:$0xff]  ;;  %3501 = vmatpush1.msra.mxu1 %v3305_v1  ;;  %v3297_v1 = vld [vmem:[#allocation26 + $0x1f0] sm:$0xff] }
 0x5bf   :  { %3157 = vmatprep.subr.mxu0 %v2837_v7  ;;  %v3303_v7 = vld [vmem:[#allocation28 + $0x20] sm:$0xff]  ;;  %3502 = vmatprep.subr.mxu1 %v3304_v31  ;;  %v3296_v31 = vld [vmem:[#allocation26 + $0x1e8] sm:$0xff] }
 0x5c0   :  { %3158 = vmatpush2.msra.mxu0 %v2836_v44  ;;  %v3302_v44 = vld [vmem:[#allocation28 + $0x18] sm:$0xff]  ;;  %3503 = vmatpush1.msra.mxu1 %v3303_v7  ;;  %v3295_v7 = vld [vmem:[#allocation26 + $0x1e0] sm:$0xff] }
 0x5c1   :  { %3160 = vmatmul.mubr.f32.vlgmr.msra.gmra.mxu0 %v2909_v13  ;;  %3565 = vmatprep.subr.mxu0 %v3266_v37  ;;  %v3301_v13 = vld [vmem:[#allocation28 + $0x10] sm:$0xff] }
 0x5c2   :  { %3165 = vmatprep.mubr.f32.mxu0 %v2912_v50  ;;  %3566 = vmatpush1.msra.mxu0 %v3265_v40  ;;  %v3300_v50 = vld [vmem:[#allocation28 + $0x8] sm:$0xff]  ;;  %v3349_v37 = vld [vmem:[#allocation28 + $0x190] sm:$0xff] }
 0x5c3   :  { %3567 = vmatprep.subr.mxu0 %v3264_v43  ;;  %3504 = vmatprep.subr.mxu1 %v3302_v44  ;;  %v3348_v40 = vld [vmem:[#allocation28 + $0x188] sm:$0xff]  ;;  %v3347_v43 = vld [vmem:[#allocation28 + $0x180] sm:$0xff]  ;;  %v3294_v44 = vld [vmem:[#allocation26 + $0x1d8] sm:$0xff] }
 0x5c4   :  { %3568 = vmatpush1.msra.mxu0 %v3263_v32  ;;  %3505 = vmatpush1.msra.mxu1 %v3301_v13  ;;  %v3346_v32 = vld [vmem:[#allocation28 + $0x178] sm:$0xff]  ;;  %v3293_v13 = vld [vmem:[#allocation26 + $0x1d0] sm:$0xff] }
 0x5c5   :  { %3166 = vmatmul.mubr.f32.gmra.mxu0 %v2911_v58  ;;  %3569 = vmatprep.subr.mxu0 %v3262_v28  ;;  %v3253_v58 = vld [vmem:[#allocation26 + $0x90] sm:$0xff] }
 0x5c6   :  { %3171 = vmatprep.mubr.f32.mxu0 %v2914_v5  ;;  %3570 = vmatpush1.msra.mxu0 %v3261_v0  ;;  %v3362_v5 = vld [vmem:[#allocation28 + $0x1f8] sm:$0xff]  ;;  %v3345_v28 = vld [vmem:[#allocation28 + $0x170] sm:$0xff]  ;;  %v3344_v0 = vld [vmem:[#allocation28 + $0x168] sm:$0xff] }
 0x5c7   :  { %3571 = vmatprep.subr.mxu0 %v3260_v29  ;;  %3506 = vmatprep.subr.mxu1 %v3300_v50  ;;  %v3343_v29 = vld [vmem:[#allocation28 + $0x160] sm:$0xff]  ;;  %v3292_v50 = vld [vmem:[#allocation26 + $0x1c8] sm:$0xff] }
 0x5c8   :  { %3572 = vmatpush1.msra.mxu0 %v3259_v59  ;;  %3507 = vmatpush1.msra.mxu1 %v3299_v12  ;;  %v3342_v59 = vld [vmem:[#allocation28 + $0x158] sm:$0xff]  ;;  %v3291_v12 = vld [vmem:[#allocation26 + $0x1c0] sm:$0xff] }
 0x5c9   :  { %3172 = vmatmul.mubr.f32.gmra.mxu0 %v2913_v46  ;;  %3573 = vmatprep.subr.mxu0 %v3258_v14  ;;  %v3251_v46 = vld [vmem:[#allocation26 + $0x80] sm:$0xff]  ;;  %v3341_v14 = vld [vmem:[#allocation28 + $0x150] sm:$0xff] }
 0x5ca   :  { %3177 = vmatprep.mubr.f32.mxu0 %v2916_v9  ;;  %3574 = vmatpush1.msra.mxu0 %v3257_v54  ;;  %v3360_v9 = vld [vmem:[#allocation28 + $0x1e8] sm:$0xff] }
 0x5cb   :  { %3575 = vmatprep.subr.mxu0 %v3256_v16  ;;  %3508 = vmatprep.subr.mxu1 %v3362_v5  ;;  %v3340_v54 = vld [vmem:[#allocation28 + $0x148] sm:$0xff]  ;;  %v3339_v16 = vld [vmem:[#allocation28 + $0x140] sm:$0xff]  ;;  %v3290_v5 = vld [vmem:[#allocation26 + $0x1b8] sm:$0xff] }
 0x5cc   :  { %3576 = vmatpush1.msra.mxu0 %v3255_v61  ;;  %3509 = vmatpush2.msra.mxu1 %v3361_v45  ;;  %v3338_v61 = vld [vmem:[#allocation28 + $0x138] sm:$0xff]  ;;  %v3289_v45 = vld [vmem:[#allocation26 + $0x1b0] sm:$0xff] }
 0x5cd   :  { %3178 = vmatmul.mubr.f32.gmra.mxu0 %v2915_v23  ;;  %3577 = vmatprep.subr.mxu0 %v3254_v8  ;;  %v3249_v23 = vld [vmem:[#allocation26 + $0x70] sm:$0xff] }
 0x5ce   :  { %3578 = vmatpush1.msra.mxu0 %v3253_v58  ;;  %3510 = vmatprep.subr.mxu1 %v3360_v9  ;;  %v3337_v8 = vld [vmem:[#allocation28 + $0x130] sm:$0xff]  ;;  %v3336_v58 = vld [vmem:[#allocation28 + $0x128] sm:$0xff] }
 0x5cf   :  { %3579 = vmatprep.subr.mxu0 %v3252_v3  ;;  %3511 = vmatpush2.msra.mxu1 %v3359_v24  ;;  %v3335_v3 = vld [vmem:[#allocation28 + $0x120] sm:$0xff]  ;;  %v3288_v9 = vld [vmem:[#allocation26 + $0x1a8] sm:$0xff] }
 0x5d0   :  { %3580 = vmatpush1.msra.mxu0 %v3251_v46  ;;  %3512 = vmatprep.subr.mxu1 %v3358_v17  ;;  %v3334_v46 = vld [vmem:[#allocation28 + $0x118] sm:$0xff]  ;;  %v3287_v24 = vld [vmem:[#allocation26 + $0x1a0] sm:$0xff] }
 0x5d1   :  { %3581 = vmatprep.subr.mxu0 %v3250_v11  ;;  %3513 = vmatpush2.msra.mxu1 %v3357_v38  ;;  %v3333_v11 = vld [vmem:[#allocation28 + $0x110] sm:$0xff]  ;;  %v3286_v17 = vld [vmem:[#allocation26 + $0x198] sm:$0xff] }
 0x5d2   :  { %3582 = vmatpush1.msra.mxu0 %v3249_v23  ;;  %3514 = vmatprep.subr.mxu1 %v3356_v53  ;;  %v3332_v23 = vld [vmem:[#allocation28 + $0x108] sm:$0xff]  ;;  %v3285_v38 = vld [vmem:[#allocation26 + $0x190] sm:$0xff]  ;;  %v3394_v53 = vld [vmem:[#allocation29 + $0xf8] sm:$0xff] }
 0x5d3   :  { %3583 = vmatprep.subr.mxu0 %v3248_v22  ;;  %3515 = vmatpush2.msra.mxu1 %v3355_v63  ;;  %v3331_v22 = vld [vmem:[#allocation28 + $0x100] sm:$0xff]  ;;  %v3282_v63 = vld [vmem:[#allocation26 + $0x178] sm:$0xff] }
 0x5d4   :  { %3584 = vmatpush1.msra.mxu0 %v3247_v62  ;;  %3516 = vmatprep.subr.mxu1 %v3354_v18  ;;  %v3284_v62 = vld [vmem:[#allocation26 + $0x188] sm:$0xff] }
 0x5d5   :  { %3585 = vmatprep.subr.mxu0 %v3246_v4  ;;  %3517 = vmatpush2.msra.mxu1 %v3353_v25  ;;  %v3283_v4 = vld [vmem:[#allocation26 + $0x180] sm:$0xff]  ;;  %v3280_v18 = vld [vmem:[#allocation26 + $0x168] sm:$0xff]  ;;  %v3278_v25 = vld [vmem:[#allocation26 + $0x158] sm:$0xff] }
 0x5d6   :  { %3586 = vmatpush1.msra.mxu0 %v3245_v48  ;;  %3518 = vmatprep.subr.mxu1 %v3352_v27  ;;  %v3281_v48 = vld [vmem:[#allocation26 + $0x170] sm:$0xff]  ;;  %v3276_v27 = vld [vmem:[#allocation26 + $0x148] sm:$0xff] }
 0x5d7   :  { %3587 = vmatprep.subr.mxu0 %v3244_v21  ;;  %3519 = vmatpush2.msra.mxu1 %v3351_v33  ;;  %v3279_v21 = vld [vmem:[#allocation26 + $0x160] sm:$0xff]  ;;  %v3274_v33 = vld [vmem:[#allocation26 + $0x138] sm:$0xff] }
 0x5d8   :  { %3588 = vmatpush1.msra.mxu0 %v3243_v26  ;;  %3520 = vmatprep.subr.mxu1 %v3350_v35  ;;  %v3277_v26 = vld [vmem:[#allocation26 + $0x150] sm:$0xff]  ;;  %v3272_v35 = vld [vmem:[#allocation26 + $0x128] sm:$0xff] }
 0x5d9   :  { %3589 = vmatprep.subr.mxu0 %v3242_v51  ;;  %3521 = vmatpush2.msra.mxu1 %v3349_v37  ;;  %v3275_v51 = vld [vmem:[#allocation26 + $0x140] sm:$0xff]  ;;  %v3270_v37 = vld [vmem:[#allocation26 + $0x118] sm:$0xff] }
 0x5da   :  { %3590 = vmatpush1.msra.mxu0 %v3241_v34  ;;  %3522 = vmatprep.subr.mxu1 %v3348_v40  ;;  %v3273_v34 = vld [vmem:[#allocation26 + $0x130] sm:$0xff]  ;;  %v3268_v40 = vld [vmem:[#allocation26 + $0x108] sm:$0xff] }
 0x5db   :  { %3591 = vmatprep.subr.mxu0 %v3240_v36  ;;  %3523 = vmatpush2.msra.mxu1 %v3347_v43  ;;  %v3271_v36 = vld [vmem:[#allocation26 + $0x120] sm:$0xff] }
 0x5dc   :  { %3592 = vmatpush1.msra.mxu0 %v3239_v39  ;;  %3524 = vmatprep.subr.mxu1 %v3346_v32  ;;  %v3269_v39 = vld [vmem:[#allocation26 + $0x110] sm:$0xff] }
 0x5dd   :  { %3593 = vmatprep.subr.mxu0 %v3238_v41  ;;  %3525 = vmatpush2.msra.mxu1 %v3345_v28  ;;  %v3267_v41 = vld [vmem:[#allocation26 + $0x100] sm:$0xff] }
 0x5de   :  { %3594 = vmatpush1.msra.mxu0 %v3237_v49  ;;  %3526 = vmatprep.subr.mxu1 %v3344_v0 }
 0x5df   :  { %3595 = vmatprep.subr.mxu0 %v3236_v60  ;;  %3527 = vmatpush2.msra.mxu1 %v3343_v29 }
 0x5e0   :  { %3596 = vmatpush1.msra.mxu0 %v3235_v30  ;;  %3528 = vmatprep.subr.mxu1 %v3342_v59 }
 0x5e1   :  { %3597 = vmatprep.subr.mxu0 %v3298_v56  ;;  %3529 = vmatpush2.msra.mxu1 %v3341_v14 }
 0x5e2   :  { %3598 = vmatpush2.msra.mxu0 %v3297_v1  ;;  %3530 = vmatprep.subr.mxu1 %v3340_v54 }
 0x5e3   :  { %3599 = vmatprep.subr.mxu0 %v3296_v31  ;;  %3531 = vmatpush2.msra.mxu1 %v3339_v16  ;;  %v2868_v31 = vld [vmem:[%s5533_s8] sm:$0x3] }
 0x5e4   :  { %3600 = vmatpush2.msra.mxu0 %v3295_v7  ;;  %3532 = vmatprep.subr.mxu1 %v3338_v61 }
 0x5e5   :  { %3601 = vmatprep.subr.mxu0 %v3294_v44  ;;  %3533 = vmatpush2.msra.mxu1 %v3337_v8  ;;  %v3196_v44 = vrot.slane %v2868_v31, %v4958_v47 }
 0x5e6   :  { %3602 = vmatpush2.msra.mxu0 %v3293_v13  ;;  %3534 = vmatprep.subr.mxu1 %v3336_v58 }
 0x5e7   :  { %3603 = vmatprep.subr.mxu0 %v3292_v50  ;;  %3535 = vmatpush2.msra.mxu1 %v3335_v3  ;;  %v5393_v50 = vrot.slane %v2868_v31, %v4962_v52  ;;  %v3387_v31 = vld [vmem:[#allocation29 + $0xc0] sm:$0xff] }
 0x5e8   :  { %3604 = vmatpush2.msra.mxu0 %v3291_v12  ;;  %3536 = vmatprep.subr.mxu1 %v3334_v46 }
 0x5e9   :  { %3605 = vmatprep.subr.mxu0 %v3290_v5  ;;  %3537 = vmatpush2.msra.mxu1 %v3333_v11 }
 0x5ea   :  { %3606 = vmatpush2.msra.mxu0 %v3289_v45  ;;  %3538 = vmatprep.subr.mxu1 %v3332_v23 }
 0x5eb   :  { %3607 = vmatprep.subr.mxu0 %v3288_v9  ;;  %3539 = vmatpush2.msra.mxu1 %v3331_v22 }
 0x5ec   :  { %3608 = vmatpush2.msra.mxu0 %v3287_v24  ;;  %3654 = vmatprep.subr.mxu1 %v3394_v53 }
 0x5ed   :  { %3609 = vmatprep.subr.mxu0 %v3286_v17 }
 0x5ee   :  { %3610 = vmatpush2.msra.mxu0 %v3285_v38 }
 0x5ef   :  { %3611 = vmatprep.subr.mxu0 %v3284_v62 }
 0x5f0   :  { %3612 = vmatpush2.msra.mxu0 %v3283_v4 }
 0x5f1   :  { %3613 = vmatprep.subr.mxu0 %v3282_v63 }
 0x5f2   :  { %3614 = vmatpush2.msra.mxu0 %v3281_v48 }
 0x5f3   :  { %3615 = vmatprep.subr.mxu0 %v3280_v18 }
 0x5f4   :  { %3616 = vmatpush2.msra.mxu0 %v3279_v21 }
 0x5f5   :  { %3617 = vmatprep.subr.mxu0 %v3278_v25  ;;  %v3393_v25 = vld [vmem:[#allocation29 + $0xf0] sm:$0xff] }
 0x5f6   :  { %3618 = vmatpush2.msra.mxu0 %v3277_v26 }
 0x5f7   :  { %3619 = vmatprep.subr.mxu0 %v3276_v27 }
 0x5f8   :  { %3620 = vmatpush2.msra.mxu0 %v3275_v51 }
 0x5f9   :  { %3621 = vmatprep.subr.mxu0 %v3274_v33 }
 0x5fa   :  { %3622 = vmatpush2.msra.mxu0 %v3273_v34  ;;  %v3392_v34 = vld [vmem:[#allocation29 + $0xe8] sm:$0xff] }
 0x5fb   :  { %3623 = vmatprep.subr.mxu0 %v3272_v35 }
 0x5fc   :  { %3624 = vmatpush2.msra.mxu0 %v3271_v36 }
 0x5fd   :  { %3625 = vmatprep.subr.mxu0 %v3270_v37  ;;  %v3391_v37 = vld [vmem:[#allocation29 + $0xe0] sm:$0xff] }
 0x5fe   :  { %3626 = vmatpush2.msra.mxu0 %v3269_v39 }
 0x5ff   :  { %3627 = vmatprep.subr.mxu0 %v3268_v40 }
 0x600   :  { %3628 = vmatpush2.msra.mxu0 %v3267_v41  ;;  %v3390_v41 = vld [vmem:[#allocation29 + $0xd8] sm:$0xff] }
 0x641   :  { %v2983_v43 = vpop.f32.mrf.mxu0 }
 0x643   :  { %v2985_v49 = vpop.f32.mrf.mxu0 }
 0x645   :  { %v2989_v32 = vpop.f32.mrf.mxu0 }
 0x647   :  { %v2991_v60 = vpop.f32.mrf.mxu0 }
 0x649   :  { %v2995_v30 = vpop.f32.mrf.mxu0 }
 0x64b   :  { %v2997_v56 = vpop.f32.mrf.mxu0 }
 0x64d   :  { %v3001_v1 = vpop.f32.mrf.mxu0 }
 0x64f   :  { %v3003_v14 = vpop.f32.mrf.mxu0 }
 0x652   :  { %v3072_v28 = vpop.f32.mrf.mxu1 }
 0x653   :  { %v3073_v54 = vadd.f32 %v3072_v28, %v2983_v43 }
 0x654   :  { %v3074_v0 = vpop.f32.mrf.mxu1 }
 0x655   :  { %v3075_v13 = vadd.f32 %v3074_v0, %v2985_v49 }
 0x656   :  { %v3078_v29 = vpop.f32.mrf.mxu1 }
 0x657   :  { %v3079_v58 = vadd.f32 %v3078_v29, %v2989_v32  ;;  %v3388_v29 = vld [vmem:[#allocation29 + $0xc8] sm:$0xff] }
 0x658   :  { %v3080_v59 = vpop.f32.mrf.mxu1 }
 0x659   :  { %v3081_v46 = vadd.f32 %v3080_v59, %v2991_v60 }
 0x65a   :  { %v3084_v7 = vpop.f32.mrf.mxu1 }
 0x65b   :  { %v3085_v24 = vadd.f32 %v3084_v7, %v2995_v30  ;;  %v3389_v30 = vld [vmem:[#allocation29 + $0xd0] sm:$0xff] }
 0x65c   :  { %v3086_v8 = vpop.f32.mrf.mxu1 }
 0x65d   :  { %v3087_v63 = vadd.f32 %v3086_v8, %v2997_v56  ;;  %v3385_v8 = vld [vmem:[#allocation29 + $0xb0] sm:$0xff] }
 0x65e   :  { %v3090_v23 = vpop.f32.mrf.mxu1 }
 0x65f   :  { %v3091_v26 = vadd.f32 %v3090_v23, %v3001_v1  ;;  %v3382_v23 = vld [vmem:[#allocation29 + $0x98] sm:$0xff] }
 0x660   :  { %v3092_v27 = vpop.f32.mrf.mxu1 }
 0x661   :  { %v3093_v49 = vadd.f32 %v3092_v27, %v3003_v14 }
 0x681   :  { %v3161_v16 = vpop.f32.mrf.mxu0 }
 0x682   :  { %v3184_v61 = vadd.f32 %v3161_v16, %v3073_v54  ;;  %v3386_v16 = vld [vmem:[#allocation29 + $0xb8] sm:$0xff] }
 0x683   :  { %v3163_v12 = vpop.f32.mrf.mxu0 }
 0x684   :  { %v3203_v5 = vadd.f32 %v3196_v44, %v3184_v61  ;;  %v3185_v3 = vadd.f32 %v3163_v12, %v3075_v13 }
 0x685   :  { %v3167_v45 = vpop.f32.mrf.mxu0 }
 0x686   :  { %v3204_v9 = vadd.f32 %v5393_v50, %v3185_v3  ;;  %v3186_v11 = vadd.f32 %v3167_v45, %v3079_v58  ;;  %vm3211_vm6 = vcmp.ge.f32.partialorder %v3203_v5, 0.0  ;;  %v3219_v17 = vmul.f32 0.2, %v3203_v5 }
 0x687   :  { %v3169_v22 = vpop.f32.mrf.mxu0 }
 0x688   :  { %v3205_v38 = vadd.f32 %v3196_v44, %v3186_v11  ;;  %v3187_v62 = vadd.f32 %v3169_v22, %v3081_v46  ;;  %vm3212_vm7 = vcmp.ge.f32.partialorder %v3204_v9, 0.0  ;;  %v3220_v53 = vmul.f32 0.2, %v3204_v9 }
 0x689   :  { %v3173_v4 = vpop.f32.mrf.mxu0  ;;  %v5401_v33 = vsel %vm3211_vm6, %v3203_v5, %v3219_v17  ;;  %v3384_v5 = vld [vmem:[#allocation29 + $0xa8] sm:$0xff] }
 0x68a   :  { %v3206_v48 = vadd.f32 %v5393_v50, %v3187_v62  ;;  %v3188_v18 = vadd.f32 %v3173_v4, %v3085_v24  ;;  %v5397_v21 = vsel %vm3212_vm7, %v3204_v9, %v3220_v53  ;;  %vm3213_vm8 = vcmp.ge.f32.partialorder %v3205_v38, 0.0  ;;  %v3381_v62 = vld [vmem:[#allocation29 + $0x90] sm:$0xff] }
 0x68b   :  { %v3175_v51 = vpop.f32.mrf.mxu0  ;;  %3540 = vmatprep.mubr.f32.mxu1 %v5397_v21  ;;  %v3221_v43 = vmul.f32 0.2, %v3205_v38  ;;  %v3453_v61 = vrot.slane %v5397_v21, 1  ;;  %v3428_v11 = vrot.slane %v5401_v33, 7  ;;  %v3429_v22 = vrot.slane %v5397_v21, 7  ;;  %v3808_v21 = vld [vmem:[#allocation31 + $0x70] sm:$0xff] }
 0x68c   :  { %v3207_v35 = vadd.f32 %v3196_v44, %v3188_v18  ;;  %v3189_v36 = vadd.f32 %v3175_v51, %v3087_v63  ;;  %3541 = vmatmul.mubr.f32.vlgmr.msra.gmra.mxu1 %v5401_v33  ;;  %vm3214_vm9 = vcmp.ge.f32.partialorder %v3206_v48, 0.0  ;;  %v3222_v39 = vmul.f32 0.2, %v3206_v48  ;;  %v3380_v63 = vld [vmem:[#allocation29 + $0x88] sm:$0xff]  ;;  %v3378_v51 = vld [vmem:[#allocation29 + $0x78] sm:$0xff] }
 0x68d   :  { %3655 = vmatpush1.msra.mxu1 %v3393_v25  ;;  %v3179_v40 = vpop.f32.mrf.mxu0  ;;  %v5409_v56 = vsel %vm3213_vm8, %v3205_v38, %v3221_v43  ;;  %v3379_v25 = vld [vmem:[#allocation29 + $0x80] sm:$0xff] }
 0x68e   :  { %v3208_v32 = vadd.f32 %v5393_v50, %v3189_v36  ;;  %v3190_v60 = vadd.f32 %v3179_v40, %v3091_v26  ;;  %3656 = vmatprep.subr.mxu1 %v3392_v34  ;;  %v5405_v28 = vsel %vm3214_vm9, %v3206_v48, %v3222_v39  ;;  %v3223_v14 = vmul.f32 0.2, %v3207_v35  ;;  %v3377_v36 = vld [vmem:[#allocation29 + $0x70] sm:$0xff]  ;;  %v3376_v39 = vld [vmem:[#allocation29 + $0x68] sm:$0xff]  ;;  %v3375_v43 = vld [vmem:[#allocation29 + $0x60] sm:$0xff] }
 0x68f   :  { %3657 = vmatpush1.msra.mxu1 %v3391_v37  ;;  %v3181_v0 = vpop.f32.mrf.mxu0  ;;  %3546 = vmatprep.mubr.f32.mxu1 %v5405_v28  ;;  %v3455_v7 = vrot.slane %v5405_v28, 1  ;;  %vm3215_vm11 = vcmp.ge.f32.partialorder %v3207_v35, 0.0  ;;  %v3431_v45 = vrot.slane %v5405_v28, 7  ;;  %v3430_v53 = vrot.slane %v5409_v56, 7 }
 0x690   :  { %v3209_v1 = vadd.f32 %v3196_v44, %v3190_v60  ;;  %v3191_v59 = vadd.f32 %v3181_v0, %v3093_v49  ;;  %3658 = vmatprep.subr.mxu1 %v3390_v41  ;;  %3547 = vmatmul.mubr.f32.gmra.mxu1 %v5409_v56  ;;  %vm3216_vm10 = vcmp.ge.f32.partialorder %v3208_v32, 0.0  ;;  %v3224_v54 = vmul.f32 0.2, %v3208_v32 }
 0x691   :  { %3659 = vmatpush1.msra.mxu1 %v3389_v30  ;;  %v5418_v58 = vsel %vm3215_vm11, %v3207_v35, %v3223_v14  ;;  %v3465_v9 = vsel %vm644_vm1, %v3453_v61, %v3455_v7  ;;  %v3441_v27 = vsel %vm599_vm0, %v3429_v22, %v3431_v45  ;;  %v3440_v41 = vsel %vm599_vm0, %v3428_v11, %v3430_v53  ;;  %v3372_v30 = vld [vmem:[#allocation29 + $0x48] sm:$0xff]  ;;  %v3369_v14 = vld [vmem:[#allocation29 + $0x30] sm:$0xff] }
 0x692   :  { %v3210_v13 = vadd.f32 %v5393_v50, %v3191_v59  ;;  %3660 = vmatprep.subr.mxu1 %v3388_v29  ;;  %v5415_v44 = vsel %vm3216_vm10, %v3208_v32, %v3224_v54  ;;  %vm3217_vm12 = vcmp.ge.f32.partialorder %v3209_v1, 0.0  ;;  %v3225_v12 = vmul.f32 0.2, %v3209_v1  ;;  %v3383_v50 = vld [vmem:[#allocation29 + $0xa0] sm:$0xff]  ;;  %v3373_v32 = vld [vmem:[#allocation29 + $0x50] sm:$0xff]  ;;  %v3368_v54 = vld [vmem:[#allocation29 + $0x28] sm:$0xff] }
 0x693   :  { %3661 = vmatpush1.msra.mxu1 %v3387_v31  ;;  %3552 = vmatprep.mubr.f32.mxu1 %v5415_v44  ;;  %v3469_v48 = vmul.f32 %v3465_v9, %v4905_v55  ;;  %v3433_v18 = vrot.slane %v5415_v44, 7  ;;  %v3432_v37 = vrot.slane %v5418_v58, 7  ;;  %v3447_v40 = vmul.f32 %v3441_v27, %v4890_v42  ;;  %v3370_v31 = vld [vmem:[#allocation29 + $0x38] sm:$0xff]  ;;  %v3425_v9 = vld [vmem:[#allocation29 + $0x1f0] sm:$0xff] }
 0x694   :  { %3662 = vmatprep.subr.mxu1 %v3386_v16  ;;  %vm3218_vm13 = vcmp.ge.f32.partialorder %v3210_v13, 0.0  ;;  %v3226_v3 = vmul.f32 0.2, %v3210_v13  ;;  %3553 = vmatmul.mubr.f32.gmra.mxu1 %v5418_v58  ;;  %v5422_v46 = vsel %vm3217_vm12, %v3209_v1, %v3225_v12  ;;  %v3446_v60 = vmul.f32 %v3440_v41, %v4890_v42  ;;  %v3371_v1 = vld [vmem:[#allocation29 + $0x40] sm:$0xff]  ;;  %v3366_v12 = vld [vmem:[#allocation29 + $0x18] sm:$0xff] }
 0x695   :  { %3663 = vmatpush1.msra.mxu1 %v3385_v8  ;;  %v3434_v17 = vrot.slane %v5422_v46, 7  ;;  %v3439_v49 = vsel %vm599_vm0, %v3431_v45, %v3433_v18  ;;  %v3438_v29 = vsel %vm599_vm0, %v3430_v53, %v3432_v37  ;;  %v3367_v8 = vld [vmem:[#allocation29 + $0x20] sm:$0xff]  ;;  %v3364_v45 = vld [vmem:[#allocation29 + $0x8] sm:$0xff]  ;;  %v3417_v53 = vld [vmem:[#allocation29 + $0x1b0] sm:$0xff] }
 0x696   :  { %v5431_v24 = vsel %vm3218_vm13, %v3210_v13, %v3226_v3  ;;  %3664 = vmatprep.subr.mxu1 %v3384_v5  ;;  %v3449_v0 = vmul.f32 %v3439_v49, %v4922_v2  ;;  %v3448_v42 = vmul.f32 %v3438_v29, %v4922_v2  ;;  %v3365_v5 = vld [vmem:[#allocation29 + $0x10] sm:$0xff]  ;;  %v3363_v2 = vld [vmem:[#allocation29] sm:$0xff]  ;;  %v3410_v27 = vld [vmem:[#allocation29 + $0x178] sm:$0xff]  ;;  %v3454_v49 = vrot.slane %v5409_v56, 1 }
 0x697   :  { %v3435_v38 = vrot.slane %v5431_v24, 7  ;;  %3558 = vmatprep.mubr.f32.mxu1 %v5431_v24  ;;  %3665 = vmatpush1.msra.mxu1 %v3383_v50  ;;  %v3442_v4 = vsel %vm599_vm0, %v3434_v17, %v3428_v11  ;;  %v3436_v13 = vsel %vm599_vm0, %v3432_v37, %v3434_v17  ;;  %v3426_v50 = vld [vmem:[#allocation29 + $0x1f8] sm:$0xff]  ;;  %v3424_v11 = vld [vmem:[#allocation29 + $0x1e8] sm:$0xff]  ;;  %v3405_v37 = vld [vmem:[#allocation29 + $0x150] sm:$0xff]  ;;  %v3459_v56 = vrot.slane %v5431_v24, 1 }
 0x698   :  { %3666 = vmatprep.subr.mxu1 %v3382_v23  ;;  %3559 = vmatmul.mubr.f32.gmra.mxu1 %v5422_v46  ;;  %v3444_v35 = vmul.f32 %v3442_v4, %v4882_v20  ;;  %v3450_v3 = vmul.f32 %v3436_v13, %v4944_v15  ;;  %v3423_v23 = vld [vmem:[#allocation29 + $0x1e0] sm:$0xff]  ;;  %v3422_v17 = vld [vmem:[#allocation29 + $0x1d8] sm:$0xff]  ;;  %v3416_v4 = vld [vmem:[#allocation29 + $0x1a8] sm:$0xff] }
 0x699   :  { %v3443_v26 = vsel %vm599_vm0, %v3435_v38, %v3429_v22  ;;  %3667 = vmatpush1.msra.mxu1 %v3381_v62  ;;  %3718 = vmatprep.mubr.f32.mxu1 %v3469_v48  ;;  %v3437_v59 = vsel %vm599_vm0, %v3433_v18, %v3435_v38  ;;  %v3421_v22 = vld [vmem:[#allocation29 + $0x1d0] sm:$0xff]  ;;  %v3420_v38 = vld [vmem:[#allocation29 + $0x1c8] sm:$0xff]  ;;  %v3418_v62 = vld [vmem:[#allocation29 + $0x1b8] sm:$0xff] }
 0x69a   :  { %v3445_v34 = vmul.f32 %v3443_v26, %v4882_v20  ;;  %3668 = vmatprep.subr.mxu1 %v3380_v63  ;;  %v3374_v20 = vld [vmem:[#allocation29 + $0x58] sm:$0xff]  ;;  %v3451_v16 = vmul.f32 %v3437_v59, %v4944_v15  ;;  %v3419_v15 = vld [vmem:[#allocation29 + $0x1c0] sm:$0xff]  ;;  %v3413_v18 = vld [vmem:[#allocation29 + $0x190] sm:$0xff]  ;;  %v3456_v59 = vrot.slane %v5418_v58, 1 }
 0x69b   :  { %3669 = vmatpush1.msra.mxu1 %v3379_v25  ;;  %v3415_v63 = vld [vmem:[#allocation29 + $0x1a0] sm:$0xff]  ;;  %v3414_v48 = vld [vmem:[#allocation29 + $0x198] sm:$0xff]  ;;  %v3412_v25 = vld [vmem:[#allocation29 + $0x188] sm:$0xff] }
 0x69c   :  { %3629 = vmatprep.mubr.f32.mxu0 %v3445_v34  ;;  %3670 = vmatprep.subr.mxu1 %v3378_v51  ;;  %v3411_v26 = vld [vmem:[#allocation29 + $0x180] sm:$0xff]  ;;  %v3409_v51 = vld [vmem:[#allocation29 + $0x170] sm:$0xff]  ;;  %v3408_v34 = vld [vmem:[#allocation29 + $0x168] sm:$0xff] }
 0x69d   :  { %3630 = vmatmul.mubr.f32.vlgmr.msra.gmra.mxu0 %v3444_v35  ;;  %3671 = vmatpush1.msra.mxu1 %v3377_v36  ;;  %v3407_v35 = vld [vmem:[#allocation29 + $0x160] sm:$0xff]  ;;  %v3406_v36 = vld [vmem:[#allocation29 + $0x158] sm:$0xff]  ;;  %v3397_v29 = vld [vmem:[#allocation29 + $0x110] sm:$0xff] }
 0x69e   :  { %3635 = vmatprep.mubr.f32.mxu0 %v3447_v40  ;;  %3672 = vmatprep.subr.mxu1 %v3376_v39  ;;  %v3404_v39 = vld [vmem:[#allocation29 + $0x148] sm:$0xff]  ;;  %v3403_v40 = vld [vmem:[#allocation29 + $0x140] sm:$0xff]  ;;  %v3402_v41 = vld [vmem:[#allocation29 + $0x138] sm:$0xff] }
 0x69f   :  { %3673 = vmatpush1.msra.mxu1 %v3375_v43  ;;  %v3401_v43 = vld [vmem:[#allocation29 + $0x130] sm:$0xff] }
 0x6a0   :  { %3674 = vmatprep.subr.mxu1 %v3374_v20  ;;  %v3400_v20 = vld [vmem:[#allocation29 + $0x128] sm:$0xff] }
 0x6a1   :  { %3636 = vmatmul.mubr.f32.gmra.mxu0 %v3446_v60  ;;  %3675 = vmatpush1.msra.mxu1 %v3373_v32  ;;  %v3457_v32 = vrot.slane %v5415_v44, 1  ;;  %v3399_v60 = vld [vmem:[#allocation29 + $0x120] sm:$0xff] }
 0x6a2   :  { %3641 = vmatprep.mubr.f32.mxu0 %v3449_v0  ;;  %3676 = vmatprep.subr.mxu1 %v3372_v30  ;;  %v3452_v30 = vrot.slane %v5401_v33, 1  ;;  %v3398_v0 = vld [vmem:[#allocation29 + $0x118] sm:$0xff] }
 0x6a3   :  { %3677 = vmatpush1.msra.mxu1 %v3371_v1  ;;  %v3463_v33 = vsel %vm644_vm1, %v3455_v7, %v3457_v32  ;;  %v3461_v24 = vsel %vm644_vm1, %v3457_v32, %v3459_v56 }
 0x6a4   :  { %3678 = vmatprep.subr.mxu1 %v3370_v31  ;;  %v3464_v1 = vsel %vm644_vm1, %v3452_v30, %v3454_v49  ;;  %v3396_v31 = vld [vmem:[#allocation29 + $0x108] sm:$0xff]  ;;  %v3471_v58 = vmul.f32 %v3463_v33, %v4910_v57  ;;  %v3473_v7 = vmul.f32 %v3461_v24, %v4926_v6 }
 0x6a5   :  { %3642 = vmatmul.mubr.f32.gmra.mxu0 %v3448_v42  ;;  %3679 = vmatpush1.msra.mxu1 %v3369_v14  ;;  %v3395_v14 = vld [vmem:[#allocation29 + $0x100] sm:$0xff]  ;;  %v3468_v44 = vmul.f32 %v3464_v1, %v4905_v55  ;;  %v3458_v42 = vrot.slane %v5422_v46, 1  ;;  %v3467_v46 = vsel %vm644_vm1, %v3459_v56, %v3453_v61  ;;  %v3823_v61 = vld [vmem:[#allocation31 + $0xe8] sm:$0xff] }
 0x6a6   :  { %3647 = vmatprep.mubr.f32.mxu0 %v3451_v16  ;;  %3680 = vmatprep.subr.mxu1 %v3368_v54  ;;  %v3462_v54 = vsel %vm644_vm1, %v3454_v49, %v3456_v59  ;;  %v3475_v13 = vmul.f32 %v3467_v46, %v4948_v19  ;;  %v3427_v1 = vld [vmem:[%s4724_s12] sm:$0x3]  ;;  %s4585_s12 = smov [#allocation32]  }
 0x6a7   :  { %3681 = vmatpush1.msra.mxu1 %v3367_v8  ;;  %v3470_v28 = vmul.f32 %v3462_v54, %v4910_v57  ;;  %v3460_v55 = vsel %vm644_vm1, %v3456_v59, %v3458_v42  ;;  %v3466_v8 = vsel %vm644_vm1, %v3458_v42, %v3452_v30  ;;  %s3927_s22 = sshll.u32 %s4585_s12, 4  ;;  %s3928_s22 = int_to_ptr.vmem [resolvable:$true] %s3927_s22 }
 0x6a8   :  { %3682 = vmatprep.subr.mxu1 %v3366_v12  ;;  %v3472_v16 = vmul.f32 %v3460_v55, %v4926_v6  ;;  %v3474_v57 = vmul.f32 %v3466_v8, %v4948_v19  ;;  %v3825_v12 = vld [vmem:[#allocation31 + $0xf8] sm:$0xff]  ;;  %v3807_v6 = vld [vmem:[#allocation31 + $0x68] sm:$0xff]  ;;  %p4495_p12 = scmp.lt.s32.totalorder %s3928_s22, %s3928_s22 }
 0x6a9   :  { %3648 = vmatmul.mubr.f32.gmra.mxu0 %v3450_v3  ;;  %3683 = vmatpush1.msra.mxu1 %v3365_v5  ;;  %v3809_v5 = vld [vmem:[#allocation31 + $0x78] sm:$0xff]  ;;  %v3824_v3 = vld [vmem:[#allocation31 + $0xf0] sm:$0xff] }
 0x6aa   :  { %3684 = vmatprep.subr.mxu1 %v3364_v45  ;;  %3978 = vmatprep.subr.mxu0 %v3825_v12  ;;  %v3806_v45 = vld [vmem:[#allocation31 + $0x60] sm:$0xff]  ;;  %v3821_v19 = vld [vmem:[#allocation31 + $0xd8] sm:$0xff] }
 0x6ab   :  { %3685 = vmatpush1.msra.mxu1 %v3363_v2  ;;  %3979 = vmatpush3.msra.mxu0 %v3809_v5  ;;  %v3805_v2 = vld [vmem:[#allocation31 + $0x58] sm:$0xff] }
 0x6ac   :  { %3686 = vmatprep.subr.mxu1 %v3426_v50  ;;  %3980 = vmatprep.subr.mxu0 %v3824_v3  ;;  %v3820_v50 = vld [vmem:[#allocation31 + $0xd0] sm:$0xff] }
 0x6ad   :  { %3687 = vmatpush2.msra.mxu1 %v3425_v9  ;;  %3981 = vmatpush3.msra.mxu0 %v3808_v21  ;;  %v3804_v9 = vld [vmem:[#allocation31 + $0x50] sm:$0xff] }
 0x6ae   :  { %3688 = vmatprep.subr.mxu1 %v3424_v11  ;;  %3982 = vmatprep.subr.mxu0 %v3823_v61  ;;  %v3819_v11 = vld [vmem:[#allocation31 + $0xc8] sm:$0xff] }
 0x6af   :  { %3689 = vmatpush2.msra.mxu1 %v3423_v23  ;;  %3983 = vmatpush3.msra.mxu0 %v3807_v6  ;;  %v3803_v23 = vld [vmem:[#allocation31 + $0x48] sm:$0xff] }
 0x6b0   :  { %3690 = vmatprep.subr.mxu1 %v3422_v17  ;;  %3984 = vmatprep.subr.mxu0 %v3822_v10  ;;  %v3818_v17 = vld [vmem:[#allocation31 + $0xc0] sm:$0xff] }
 0x6b1   :  { %3691 = vmatpush2.msra.mxu1 %v3421_v22  ;;  %3985 = vmatpush3.msra.mxu0 %v3806_v45  ;;  %v3802_v22 = vld [vmem:[#allocation31 + $0x40] sm:$0xff] }
 0x6b2   :  { %3692 = vmatprep.subr.mxu1 %v3420_v38  ;;  %3986 = vmatprep.subr.mxu0 %v3821_v19  ;;  %v3817_v38 = vld [vmem:[#allocation31 + $0xb8] sm:$0xff] }
 0x6b3   :  { %3693 = vmatpush2.msra.mxu1 %v3419_v15  ;;  %3987 = vmatpush3.msra.mxu0 %v3805_v2  ;;  %v3801_v15 = vld [vmem:[#allocation31 + $0x38] sm:$0xff] }
 0x6b4   :  { %3694 = vmatprep.subr.mxu1 %v3418_v62  ;;  %3988 = vmatprep.subr.mxu0 %v3820_v50  ;;  %v3816_v62 = vld [vmem:[#allocation31 + $0xb0] sm:$0xff] }
 0x6b5   :  { %3695 = vmatpush2.msra.mxu1 %v3417_v53  ;;  %3989 = vmatpush3.msra.mxu0 %v3804_v9  ;;  %v3800_v53 = vld [vmem:[#allocation31 + $0x30] sm:$0xff] }
 0x6b6   :  { %3696 = vmatprep.subr.mxu1 %v3416_v4  ;;  %3990 = vmatprep.subr.mxu0 %v3819_v11  ;;  %v3815_v4 = vld [vmem:[#allocation31 + $0xa8] sm:$0xff] }
 0x6b7   :  { %3697 = vmatpush2.msra.mxu1 %v3415_v63  ;;  %3991 = vmatpush3.msra.mxu0 %v3803_v23  ;;  %v3799_v63 = vld [vmem:[#allocation31 + $0x28] sm:$0xff] }
 0x6b8   :  { %3698 = vmatprep.subr.mxu1 %v3414_v48  ;;  %3992 = vmatprep.subr.mxu0 %v3818_v17  ;;  %v3814_v48 = vld [vmem:[#allocation31 + $0xa0] sm:$0xff] }
 0x6b9   :  { %3699 = vmatpush2.msra.mxu1 %v3413_v18  ;;  %3993 = vmatpush3.msra.mxu0 %v3802_v22  ;;  %v3798_v18 = vld [vmem:[#allocation31 + $0x20] sm:$0xff] }
 0x6ba   :  { %3700 = vmatprep.subr.mxu1 %v3412_v25  ;;  %3994 = vmatprep.subr.mxu0 %v3817_v38  ;;  %v3813_v25 = vld [vmem:[#allocation31 + $0x98] sm:$0xff] }
 0x6bb   :  { %3701 = vmatpush2.msra.mxu1 %v3411_v26  ;;  %3995 = vmatpush3.msra.mxu0 %v3801_v15  ;;  %v3797_v26 = vld [vmem:[#allocation31 + $0x18] sm:$0xff] }
 0x6bc   :  { %3702 = vmatprep.subr.mxu1 %v3410_v27  ;;  %3996 = vmatprep.subr.mxu0 %v3816_v62  ;;  %v3812_v27 = vld [vmem:[#allocation31 + $0x90] sm:$0xff] }
 0x6bd   :  { %3703 = vmatpush2.msra.mxu1 %v3409_v51  ;;  %3997 = vmatpush3.msra.mxu0 %v3800_v53  ;;  %v3796_v51 = vld [vmem:[#allocation31 + $0x10] sm:$0xff] }
 0x6be   :  { %3704 = vmatprep.subr.mxu1 %v3408_v34  ;;  %3998 = vmatprep.subr.mxu0 %v3815_v4  ;;  %v3811_v34 = vld [vmem:[#allocation31 + $0x88] sm:$0xff] }
 0x6bf   :  { %3705 = vmatpush2.msra.mxu1 %v3407_v35  ;;  %3999 = vmatpush3.msra.mxu0 %v3799_v63  ;;  %v3795_v35 = vld [vmem:[#allocation31 + $0x8] sm:$0xff] }
 0x6c0   :  { %3706 = vmatprep.subr.mxu1 %v3406_v36  ;;  %4000 = vmatprep.subr.mxu0 %v3814_v48  ;;  %v3810_v36 = vld [vmem:[#allocation31 + $0x80] sm:$0xff] }
 0x6c1   :  { %3707 = vmatpush2.msra.mxu1 %v3405_v37  ;;  %4001 = vmatpush3.msra.mxu0 %v3798_v18  ;;  %v3794_v37 = vld [vmem:[#allocation31] sm:$0xff] }
 0x6c2   :  { %3708 = vmatprep.subr.mxu1 %v3404_v39  ;;  %4002 = vmatprep.subr.mxu0 %v3813_v25 }
 0x6c3   :  { %3709 = vmatpush2.msra.mxu1 %v3403_v40  ;;  %4003 = vmatpush3.msra.mxu0 %v3797_v26 }
 0x6c4   :  { %3710 = vmatprep.subr.mxu1 %v3402_v41  ;;  %4004 = vmatprep.subr.mxu0 %v3812_v27 }
 0x6c5   :  { %3711 = vmatpush2.msra.mxu1 %v3401_v43  ;;  %4005 = vmatpush3.msra.mxu0 %v3796_v51 }
 0x6c6   :  { %3712 = vmatprep.subr.mxu1 %v3400_v20  ;;  %4006 = vmatprep.subr.mxu0 %v3811_v34 }
 0x6c7   :  { %3713 = vmatpush2.msra.mxu1 %v3399_v60  ;;  %4007 = vmatpush3.msra.mxu0 %v3795_v35 }
 0x6c8   :  { %3714 = vmatprep.subr.mxu1 %v3398_v0  ;;  %4008 = vmatprep.subr.mxu0 %v3810_v36 }
 0x6c9   :  { %3715 = vmatpush2.msra.mxu1 %v3397_v29  ;;  %4009 = vmatpush3.msra.mxu0 %v3794_v37 }
 0x6ca   :  { %3716 = vmatprep.subr.mxu1 %v3396_v31 }
 0x6cb   :  { %3717 = vmatpush2.msra.mxu1 %v3395_v14  ;;  %v3755_v14 = vrot.slane %v3427_v1, %v4958_v47 }
 0x6cc   :  { %3719 = vmatmul.mubr.f32.vlgmr.msra.gmra.mxu1 %v3468_v44  ;;  %4022 = vmatprep.subr.mxu1 %v3825_v12 }
 0x6cd   :  { %3724 = vmatprep.mubr.f32.mxu1 %v3471_v58  ;;  %4038 = vmatpush3.msra.mxu1 %v3809_v5  ;;  %v3759_v58 = vrot.slane %v3427_v1, %v4962_v52 }
 0x6ce   :  { %4023 = vmatprep.subr.mxu1 %v3824_v3 }
 0x6cf   :  { %4039 = vmatpush3.msra.mxu1 %v3808_v21 }
 0x6d0   :  { %3725 = vmatmul.mubr.f32.gmra.mxu1 %v3470_v28  ;;  %4024 = vmatprep.subr.mxu1 %v3823_v61 }
 0x6d1   :  { %3730 = vmatprep.mubr.f32.mxu1 %v3473_v7  ;;  %4040 = vmatpush3.msra.mxu1 %v3807_v6 }
 0x6d2   :  { %4025 = vmatprep.subr.mxu1 %v3822_v10 }
 0x6d3   :  { %4041 = vmatpush3.msra.mxu1 %v3806_v45 }
 0x6d4   :  { %3731 = vmatmul.mubr.f32.gmra.mxu1 %v3472_v16  ;;  %4026 = vmatprep.subr.mxu1 %v3821_v19 }
 0x6d5   :  { %3736 = vmatprep.mubr.f32.mxu1 %v3475_v13  ;;  %4042 = vmatpush3.msra.mxu1 %v3805_v2 }
 0x6d6   :  { %4027 = vmatprep.subr.mxu1 %v3820_v50 }
 0x6d7   :  { %4043 = vmatpush3.msra.mxu1 %v3804_v9 }
 0x6d8   :  { %3737 = vmatmul.mubr.f32.gmra.mxu1 %v3474_v57  ;;  %4028 = vmatprep.subr.mxu1 %v3819_v11 }
 0x6d9   :  { %4044 = vmatpush3.msra.mxu1 %v3803_v23 }
 0x6da   :  { %4029 = vmatprep.subr.mxu1 %v3818_v17 }
 0x6db   :  { %4045 = vmatpush3.msra.mxu1 %v3802_v22 }
 0x6dc   :  { %4030 = vmatprep.subr.mxu1 %v3817_v38 }
 0x6dd   :  { %4046 = vmatpush3.msra.mxu1 %v3801_v15 }
 0x6de   :  { %4031 = vmatprep.subr.mxu1 %v3816_v62 }
 0x6df   :  { %4047 = vmatpush3.msra.mxu1 %v3800_v53 }
 0x6e0   :  { %4032 = vmatprep.subr.mxu1 %v3815_v4 }
 0x6e1   :  { %4048 = vmatpush3.msra.mxu1 %v3799_v63 }
 0x6e2   :  { %4033 = vmatprep.subr.mxu1 %v3814_v48 }
 0x6e3   :  { %4049 = vmatpush3.msra.mxu1 %v3798_v18 }
 0x6e4   :  { %4034 = vmatprep.subr.mxu1 %v3813_v25 }
 0x6e5   :  { %4050 = vmatpush3.msra.mxu1 %v3797_v26 }
 0x6e6   :  { %4035 = vmatprep.subr.mxu1 %v3812_v27 }
 0x6e7   :  { %4051 = vmatpush3.msra.mxu1 %v3796_v51 }
 0x6e8   :  { %4036 = vmatprep.subr.mxu1 %v3811_v34 }
 0x6e9   :  { %4052 = vmatpush3.msra.mxu1 %v3795_v35 }
 0x6ea   :  { %4037 = vmatprep.subr.mxu1 %v3810_v36 }
 0x6eb   :  { %4053 = vmatpush3.msra.mxu1 %v3794_v37 }
 0x74c   :  { %v3542_v39 = vpop.f32.mrf.mxu1 }
 0x74e   :  { %v3544_v40 = vpop.f32.mrf.mxu1 }
 0x750   :  { %v3548_v41 = vpop.f32.mrf.mxu1 }
 0x752   :  { %v3550_v43 = vpop.f32.mrf.mxu1 }
 0x754   :  { %v3554_v20 = vpop.f32.mrf.mxu1 }
 0x756   :  { %v3556_v60 = vpop.f32.mrf.mxu1 }
 0x758   :  { %v3560_v0 = vpop.f32.mrf.mxu1 }
 0x75a   :  { %v3562_v59 = vpop.f32.mrf.mxu1 }
 0x75d   :  { %v3631_v49 = vpop.f32.mrf.mxu0 }
 0x75e   :  { %v3632_v56 = vadd.f32 %v3631_v49, %v3542_v39  ;;  %v3977_v49 = vld [vmem:[%s4734_s9] ss:$0 sm:$0xff]  ;;  %s4490_s9 = scalar_lea.vmem %s3928_s22, 512 }
 0x75f   :  { %v3633_v32 = vpop.f32.mrf.mxu0  ;;  %p4491_p11 = scmp.ne.s32.totalorder %s3928_s22, %s4490_s9  ;;  %p4496_p13 = scmp.lt.s32.totalorder %s4490_s9, %s4490_s9 }
 0x760   :  { %v3634_v44 = vadd.f32 %v3633_v32, %v3544_v40 }
 0x761   :  { %v3637_v30 = vpop.f32.mrf.mxu0  ;;  %p4497_p0 = por %p4496_p13, %p4495_p12 }
 0x762   :  { %v3638_v28 = vadd.f32 %v3637_v30, %v3548_v41 }
 0x763   :  { %v3639_v29 = vpop.f32.mrf.mxu0  ;;  %p4498_p1 = pnand %p4497_p0, %p4491_p11 }
 0x764   :  { %v3640_v16 = vadd.f32 %v3639_v29, %v3550_v43 }
 0x765   :  { %v3643_v31 = vpop.f32.mrf.mxu0 }
 0x766   :  { %v3644_v57 = vadd.f32 %v3643_v31, %v3554_v20 }
 0x767   :  { %v3645_v54 = vpop.f32.mrf.mxu0 }
 0x768   :  { %v3646_v52 = vadd.f32 %v3645_v54, %v3556_v60 }
 0x769   :  { %v3649_v12 = vpop.f32.mrf.mxu0 }
 0x76a   :  { %v3650_v2 = vadd.f32 %v3649_v12, %v3560_v0 }
 0x76b   :  { %v3651_v50 = vpop.f32.mrf.mxu0 }
 0x76c   :  { %v3652_v62 = vadd.f32 %v3651_v50, %v3562_v59 }
 0x78c   :  { %v3720_v33 = vpop.f32.mrf.mxu1 }
 0x78d   :  { %v3743_v42 = vadd.f32 %v3720_v33, %v3632_v56 }
 0x78e   :  { %v3722_v24 = vpop.f32.mrf.mxu1 }
 0x78f   :  { %v3762_v7 = vadd.f32 %v3755_v14, %v3743_v42  ;;  %v3744_v55 = vadd.f32 %v3722_v24, %v3634_v44 }
 0x790   :  { %v3726_v46 = vpop.f32.mrf.mxu1 }
 0x791   :  { %v3763_v13 = vadd.f32 %v3759_v58, %v3744_v55  ;;  %v3745_v8 = vadd.f32 %v3726_v46, %v3638_v28  ;;  %vm3770_vm0 = vcmp.ge.f32.partialorder %v3762_v7, 0.0  ;;  %v3778_v5 = vmul.f32 0.2, %v3762_v7 }
 0x792   :  { %v3728_v3 = vpop.f32.mrf.mxu1 }
 0x793   :  { %v3764_v47 = vadd.f32 %v3755_v14, %v3745_v8  ;;  %v3746_v21 = vadd.f32 %v3728_v3, %v3640_v16  ;;  %vm3771_vm1 = vcmp.ge.f32.partialorder %v3763_v13, 0.0  ;;  %v3779_v61 = vmul.f32 0.2, %v3763_v13 }
 0x794   :  { %v3732_v6 = vpop.f32.mrf.mxu1  ;;  %v3786_v11 = vsel %vm3770_vm0, %v3762_v7, %v3778_v5 }
 0x795   :  { %v3765_v10 = vadd.f32 %v3759_v58, %v3746_v21  ;;  %v3747_v45 = vadd.f32 %v3732_v6, %v3644_v57  ;;  %v3787_v19 = vsel %vm3771_vm1, %v3763_v13, %v3779_v61  ;;  %vm3772_vm14 = vcmp.ge.f32.partialorder %v3764_v47, 0.0 }
 0x796   :  { %v3734_v9 = vpop.f32.mrf.mxu1  ;;  %3897 = vmatprep.mubr.f32.mxu0 %v3787_v19  ;;  %v3780_v23 = vmul.f32 0.2, %v3764_v47 }
 0x797   :  { %v3766_v17 = vadd.f32 %v3755_v14, %v3747_v45  ;;  %v3748_v22 = vadd.f32 %v3734_v9, %v3646_v52  ;;  %3898 = vmatmul.mubr.f32.vlgmr.msra.gmra.mxu0 %v3786_v11  ;;  %vm3773_vm15 = vcmp.ge.f32.partialorder %v3765_v10, 0.0  ;;  %v3781_v38 = vmul.f32 0.2, %v3765_v10 }
 0x798   :  { %v3738_v15 = vpop.f32.mrf.mxu1  ;;  %v3788_v25 = vsel %vm3772_vm14, %v3764_v47, %v3780_v23 }
 0x799   :  { %v3767_v53 = vadd.f32 %v3759_v58, %v3748_v22  ;;  %v3749_v4 = vadd.f32 %v3738_v15, %v3650_v2  ;;  %vm3774_vm2 = vcmp.ge.f32.partialorder %v3766_v17, 0.0  ;;  %v3782_v63 = vmul.f32 0.2, %v3766_v17 }
 0x79a   :  { %v3740_v48 = vpop.f32.mrf.mxu1  ;;  %v3789_v18 = vsel %vm3773_vm15, %v3765_v10, %v3781_v38 }
 0x79b   :  { %v3768_v26 = vadd.f32 %v3755_v14, %v3749_v4  ;;  %v3750_v27 = vadd.f32 %v3740_v48, %v3652_v62  ;;  %3902 = vmatprep.mubr.f32.mxu0 %v3789_v18  ;;  %vm3775_vm3 = vcmp.ge.f32.partialorder %v3767_v53, 0.0  ;;  %v3783_v51 = vmul.f32 0.2, %v3767_v53 }
 0x79c   :  { %3903 = vmatmul.mubr.f32.gmra.mxu0 %v3788_v25  ;;  %v3790_v36 = vsel %vm3774_vm2, %v3766_v17, %v3782_v63 }
 0x79d   :  { %v3769_v34 = vadd.f32 %v3759_v58, %v3750_v27  ;;  %v3791_v35 = vsel %vm3775_vm3, %v3767_v53, %v3783_v51  ;;  %v3784_v37 = vmul.f32 0.2, %v3768_v26  ;;  %vm3776_vm5 = vcmp.ge.f32.partialorder %v3768_v26, 0.0 }
 0x79e   :  { %3907 = vmatprep.mubr.f32.mxu1 %v3791_v35 }
 0x79f   :  { %3908 = vmatmul.mubr.f32.vlgmr.msra.gmra.mxu1 %v3790_v36  ;;  %vm3777_vm4 = vcmp.ge.f32.partialorder %v3769_v34, 0.0  ;;  %v3785_v39 = vmul.f32 0.2, %v3769_v34  ;;  %v3792_v41 = vsel %vm3776_vm5, %v3768_v26, %v3784_v37 }
 0x7a1   :  { %v3793_v40 = vsel %vm3777_vm4, %v3769_v34, %v3785_v39 }
 0x7a2   :  { %3912 = vmatprep.mubr.f32.mxu1 %v3793_v40 }
 0x7a3   :  { %3913 = vmatmul.mubr.f32.gmra.mxu1 %v3792_v41 }
 0x857   :  { %v4010_v43 = vpop.f32.mrf.mxu0 }
 0x859   :  { %v4011_v20 = vpop.f32.mrf.mxu0 }
 0x85a   :  { %v4012_v32 = vadd.f32 %v4011_v20, %v4010_v43 }
 0x85c   :  { %v3900_v60 = vadd.f32 %v4012_v32, %v3977_v49  ;;  %v4013_v30 = vpop.f32.mrf.mxu0 }
 0x85e   :  { %3918 = vst [vmem:[#allocation32] sm:$0xff] %v3900_v60  ;;  %v4014_v0 = vpop.f32.mrf.mxu0 }
 0x85f   :  { %v4015_v29 = vadd.f32 %v4014_v0, %v4013_v30  ;;  %v4016_v1 = vpop.f32.mrf.mxu1 }
 0x861   :  { %v3905_v59 = vadd.f32 %v4015_v29, %v3977_v49  ;;  %v4017_v31 = vpop.f32.mrf.mxu1 }
 0x862   :  { %v4018_v56 = vadd.f32 %v4017_v31, %v4016_v1 }
 0x863   :  { %3919 = vst [vmem:[#allocation32 + $0x8] sm:$0xff] %v3905_v59  ;;  %v4019_v14 = vpop.f32.mrf.mxu1 }
 0x864   :  { %v3910_v33 = vadd.f32 %v4018_v56, %v3977_v49 }
 0x865   :  { %v4020_v44 = vpop.f32.mrf.mxu1 }
 0x866   :  { %3920 = vst [vmem:[#allocation32 + $0x10] sm:$0xff] %v3910_v33  ;;  %v4021_v42 = vadd.f32 %v4020_v44, %v4019_v14 }
 0x868   :  { %v3915_v58 = vadd.f32 %v4021_v42, %v3977_v49 }
 0x86a   :  { %3921 = vst [vmem:[#allocation32 + $0x18] sm:$0xff] %v3915_v58 }
 0x86b   :  { %4501 = shalt.err (!%p4498_p1)
}
 0x86c   :  { %3933 = dma.vmem_to_hbm [thread:$0]  %s3928_s22, 512, %s4739_s27, [#allocation4], %s4582_s17, %s4582_s17, %s4583_s15  }
 0x86d   :  { %4530 = dma.done.wait [#allocation4], 512  }
 0x86e   :  { %4531 = vsyncadd [#allocation4], 4294966784 }
 0x86f   :  { %3937 = vsyncpa [#allocation3], 1 }
 0x870   :  { %3938 = vsyncpa [#allocation6], 1 }
 0x871   :  { %3939 = vsyncpa [#allocation9], 1 }
 0x872   :  { %3940 = vsyncpa [#allocation12], 1 }
 0x873   :  { %3941 = vsyncpa [#allocation15], 1 }
 0x874   :  { %3942 = vsyncpa [#allocation18], 1 }
 0x875   :  { %3943 = vsyncpa [#allocation21], 1 }
 0x876   :  { %3944 = vsyncpa [#allocation24], 1 }
 0x877   :  { %3945 = vsyncpa [#allocation27], 1 }
 0x878   :  { %3946 = vsyncpa [#allocation30], 1 }
 0x879   :  { %3947 = vsyncpa [#allocation4], 1 }

</bundles_post_ra>
